<compile_context>
chip_gen: v7x
topology: tpu7x:2x2x1
jax: 0.10.0
libtpu: 0.0.40
codegen_flags: <defaults>
</compile_context>

<pallas_src>
import functools

import jax
import jax.numpy as jnp
from jax.experimental import pallas as pl
from jax.experimental.pallas import tpu as pltpu


# ----------------------------- helpers -------------------------------------


def _round_up(x, m):
    return (x + m - 1) // m * m


def _estimate_vmem(strip, hp, wpp, w, cin, cmid_p, cout_p):
    """Rough per-grid-step VMEM bytes: blocks (double-buffered), scratch and
    the dominant f32 temporaries (pre/z1, rolled rows, acc/z2, y)."""
    sp = strip + 2
    bpe = 2                                        # compute dtype (bf16)
    x_block = hp * wpp * cin * bpe * 2
    res_block = strip * w * cout_p * bpe * 2
    out_block = strip * w * cout_p * 4 * 2
    scratch = sp * wpp * cmid_p * bpe
    f32_live = sp * wpp * cmid_p * 4 * 2           # pre / z1
    f32_live += strip * wpp * cmid_p * 4 * 2       # rows / rolled rows
    f32_live += strip * w * cmid_p * 4 * 2         # acc / z2
    f32_live += strip * w * cout_p * 4 * 2         # y
    weights = (cin * cmid_p + 16 * cmid_p + cmid_p * cout_p) * bpe * 2
    weights += (cmid_p + cout_p) * 4 * 8
    return x_block + res_block + out_block + scratch + f32_live + weights


def _choose_strip(h, w, hp, wpp, cin, cmid_p, cout_p, budget_bytes):
    """Largest strip that divides h, keeps the flat (strip*w) blocks
    sublane-aligned, and fits the VMEM budget (incl. implicit temporaries)."""
    for s in (32, 16, 8, 4, 2, 1):
        if h % s:
            continue
        if s != h and (s * w) % 8:
            continue                               # flat residual/out blocks need 8-aligned rows
        if _estimate_vmem(s, hp, wpp, w, cin, cmid_p, cout_p) <= budget_bytes:
            return s
    return h                                       # whole image per step (always layout-legal)


# ----------------------------- fused kernel --------------------------------


def _fused_bottleneck_kernel(
    x_ref,                      # (hp, wpp, cin)       zero-padded image, resident per image
    res_ref,                    # (strip*w, res_c)     aligned residual rows (unused if no skip)
    w1_ref, s1_ref, b1_ref,     # (cin, cmid_p), (1, cmid_p), (1, cmid_p)
    w2_ref, s2_ref, b2_ref,     # (9, cmid_p),  (1, cmid_p), (1, cmid_p)
    w3_ref, s3_ref, b3_ref,     # (cmid_p, cout_p), (1, cout_p), (1, cout_p)
    o_ref,                      # (strip*w, cout_p)    lane-dense flat output slab
    z1_scr,                     # VMEM bf16 (strip+2, wpp, cmid_p) expanded intermediate
    *, strip, w, use_res_skip,
):
    cin = x_ref.shape[-1]
    cmid_p = w1_ref.shape[-1]
    cout_p = w3_ref.shape[-1]
    sp = strip + 2              # strip rows + top/bottom halo
    wpp = x_ref.shape[1]        # padded, 8-aligned width

    j = pl.program_id(1)
    r0 = pl.multiple_of(j * strip, strip)          # first padded row of this strip

    # rows covering the strip plus the 3x3 halo (input already zero-padded)
    xs = x_ref[pl.ds(r0, sp), :, :]                # (sp, wpp, cin), bf16

    # ---- stage 1: 1x1 conv (Cin -> Cmid) on the MXU, folded BN, ReLU6 ------
    # (even tiny Cin goes through the MXU: the VPU is the saturating unit here)
    pre = jnp.dot(xs.reshape(sp * wpp, cin), w1_ref[...],
                  preferred_element_type=jnp.float32).reshape(sp, wpp, cmid_p)
    z1 = jnp.clip(pre * s1_ref[...] + b1_ref[...], 0.0, 6.0)
    z1_scr[...] = z1.astype(z1_scr.dtype)

    # conv2's padding=1 pads the *expanded* tensor with zeros (NOT conv1(0)):
    # zero only the invalid regions with static sub-slice stores; the top /
    # bottom halo rows only exist for the first / last strip (pl.when-gated).
    z1_scr[:, 0:1, :] = jnp.zeros((sp, 1, cmid_p), z1_scr.dtype)
    z1_scr[:, w + 1:wpp, :] = jnp.zeros((sp, wpp - (w + 1), cmid_p), z1_scr.dtype)

    @pl.when(j == 0)
    def _():
        z1_scr[0:1, :, :] = jnp.zeros((1, wpp, cmid_p), z1_scr.dtype)

    @pl.when(j == pl.num_programs(1) - 1)
    def _():
        z1_scr[sp - 1:sp, :, :] = jnp.zeros((1, wpp, cmid_p), z1_scr.dtype)

    # ---- stage 2: 3x3 depthwise conv, folded BN, ReLU6 ---------------------
    # Per-tap weight rows hoisted out of the loop; width shifts via pltpu.roll
    # (XLU) of a once-loaded, aligned row block; accumulate in f32.
    w2f = w2_ref[...].astype(jnp.float32)                       # (9, cmid_p)
    taps_w = [w2f[k:k + 1, :].reshape(1, 1, cmid_p) for k in range(9)]
    acc = jnp.zeros((strip, w, cmid_p), jnp.float32)
    for di in range(3):
        rows = z1_scr[di:di + strip, :, :].astype(jnp.float32)  # (strip, wpp, cmid_p)
        for dj in range(3):
            # positive shift == -dj (mod wpp); wrapped columns land at >= w
            # so they never enter the [:, :w, :] window.
            shifted = rows if dj == 0 else pltpu.roll(rows, shift=wpp - dj, axis=1)
            acc = acc + shifted[:, :w, :] * taps_w[di * 3 + dj]
    z2 = jnp.clip(acc * s2_ref[...] + b2_ref[...], 0.0, 6.0)

    # ---- stage 3: 1x1 conv (Cmid -> Cout) on the MXU, BN, optional residual
    # TODO(synk): for very large cmid (>=512) chunk the expansion channel here
    # (conv1-chunk -> depthwise-chunk -> partial matmul) to bound v7x VMEM.
    y = jnp.dot(z2.reshape(strip * w, cmid_p).astype(w3_ref.dtype), w3_ref[...],
                preferred_element_type=jnp.float32)
    y = y * s3_ref[...] + b3_ref[...]                            # (strip*w, cout_p)
    if use_res_skip:
        y = y + res_ref[...].astype(jnp.float32)                 # aligned, channel-padded
    o_ref[...] = y.astype(o_ref.dtype)


# ----------------------------- wrapper --------------------------------------


def linear_bottleneck_forward(x_nchw, params, *, stride=1, use_se=False,
                              strip_rows=None, compute_dtype=jnp.bfloat16):
    """LinearBottleneck forward.

    Returns (module_output, z_nhwc):
      * module_output == x_nchw  (the reference PyTorch forward returns `x`,
        not `z` — preserved exactly),
      * z_nhwc: the computed bottleneck branch in NHWC.
    Activations/weights run through the MXU in `compute_dtype` (bf16 default);
    accumulation and the BN/ReLU6 epilogues stay in f32.
    """
    assert stride == 1, "only stride=1 implemented"
    # TODO(synk): SEUnit (use_se=True), stride=2 and 5x5 depthwise paths not implemented.
    assert not use_se

    x_nhwc = jnp.transpose(x_nchw, (0, 2, 3, 1))     # NCHW -> NHWC
    n, h, w, cin = x_nhwc.shape
    cmid = params["w1"].shape[1]
    cout = params["w3"].shape[1]
    use_res_skip = (cin == cout) and (stride == 1)

    # Lane-dense channel padding (zero-padded channels stay exactly zero
    # through BN/ReLU6/depthwise, so results are unaffected).
    cmid_p = _round_up(cmid, 128)
    cout_p = _round_up(cout, 128)

    hp = h + 2
    wpp = _round_up(w + 2, 8)        # keep the sublane (width) axis 8-aligned

    # Generation-aware VMEM budget (v7x: 64 MiB physical, v5e/v6e: 128 MiB).
    try:
        vmem_cap = int(pltpu.get_tpu_info().vmem_capacity_bytes)
    except Exception:
        vmem_cap = 64 * 1024 * 1024
    vmem_limit = min(vmem_cap * 3 // 4, 100 * 1024 * 1024)

    strip = strip_rows if strip_rows is not None else _choose_strip(
        h, w, hp, wpp, cin, cmid_p, cout_p, budget_bytes=vmem_limit // 2)
    assert h % strip == 0
    num_strips = h // strip

    x_bf = x_nhwc.astype(compute_dtype)

    # Zero-pad only the *narrow* (Cin) input once; the Cmid-wide expanded
    # intermediate never touches HBM (it lives in the kernel's VMEM scratch).
    # TODO(synk): for very large H*W*Cin switch this input to per-strip halo blocks.
    xpad = jnp.pad(x_bf, ((0, 0), (1, 1), (1, wpp - w - 1), (0, 0)))

    # Separately blocked, aligned residual input (no offset-1 slices in-kernel);
    # channel-padded to cout_p so the in-kernel add is a straight VPU op.
    if use_res_skip:
        xres = jnp.pad(x_bf, ((0, 0), (0, 0), (0, 0), (0, cout_p - cin)))
        xres = xres.reshape(n, h * w, cout_p)
        res_c = cout_p
    else:
        xres = x_bf.reshape(n, h * w, cin)
        res_c = cin

    # Weights / folded-BN params, zero-padded to the lane-dense channel counts.
    w1 = jnp.pad(params["w1"], ((0, 0), (0, cmid_p - cmid))).astype(compute_dtype)
    w2 = jnp.pad(params["w2"].reshape(9, cmid),
                 ((0, 0), (0, cmid_p - cmid))).astype(compute_dtype)
    w3 = jnp.pad(params["w3"], ((0, cmid_p - cmid), (0, cout_p - cout))).astype(compute_dtype)
    s1 = jnp.pad(params["s1"], (0, cmid_p - cmid)).reshape(1, cmid_p).astype(jnp.float32)
    b1 = jnp.pad(params["b1"], (0, cmid_p - cmid)).reshape(1, cmid_p).astype(jnp.float32)
    s2 = jnp.pad(params["s2"], (0, cmid_p - cmid)).reshape(1, cmid_p).astype(jnp.float32)
    b2 = jnp.pad(params["b2"], (0, cmid_p - cmid)).reshape(1, cmid_p).astype(jnp.float32)
    s3 = jnp.pad(params["s3"], (0, cout_p - cout)).reshape(1, cout_p).astype(jnp.float32)
    b3 = jnp.pad(params["b3"], (0, cout_p - cout)).reshape(1, cout_p).astype(jnp.float32)

    kernel = functools.partial(_fused_bottleneck_kernel, strip=strip, w=w,
                               use_res_skip=use_res_skip)

    z_flat = pl.pallas_call(
        kernel,
        grid=(n, num_strips),
        in_specs=[
            # whole padded image resident per i (block index constant in j)
            pl.BlockSpec((None, hp, wpp, cin), lambda i, j: (i, 0, 0, 0)),
            # aligned, flat residual rows for this strip
            pl.BlockSpec((None, strip * w, res_c), lambda i, j: (i, j, 0)),
            pl.BlockSpec((cin, cmid_p), lambda i, j: (0, 0)),
            pl.BlockSpec((1, cmid_p), lambda i, j: (0, 0)),
            pl.BlockSpec((1, cmid_p), lambda i, j: (0, 0)),
            pl.BlockSpec((9, cmid_p), lambda i, j: (0, 0)),
            pl.BlockSpec((1, cmid_p), lambda i, j: (0, 0)),
            pl.BlockSpec((1, cmid_p), lambda i, j: (0, 0)),
            pl.BlockSpec((cmid_p, cout_p), lambda i, j: (0, 0)),
            pl.BlockSpec((1, cout_p), lambda i, j: (0, 0)),
            pl.BlockSpec((1, cout_p), lambda i, j: (0, 0)),
        ],
        # lane-dense flat output slab: (strip*w, cout_p) with cout_p % 128 == 0
        out_specs=pl.BlockSpec((None, strip * w, cout_p), lambda i, j: (i, j, 0)),
        out_shape=jax.ShapeDtypeStruct((n, h * w, cout_p), x_nchw.dtype),
        scratch_shapes=[pltpu.VMEM((strip + 2, wpp, cmid_p), compute_dtype)],
        compiler_params=pltpu.CompilerParams(
            dimension_semantics=("parallel", "parallel"),
            vmem_limit_bytes=vmem_limit),
    )(xpad, xres, w1, s1, b1, w2, s2, b2, w3, s3, b3)

    z = z_flat.reshape(n, h, w, cout_p)[..., :cout]

    # Reference forward returns `x`, not `z` — preserved exactly.
    return x_nchw, z


# ----------------------------- pure-JAX reference ---------------------------


def _reference_forward(x_nchw, params, *, stride=1):
    """f32 reference of the bottleneck branch `z` (NHWC), for verification."""
    x = jnp.transpose(x_nchw, (0, 2, 3, 1)).astype(jnp.float32)
    n, h, w, cin = x.shape
    cout = params["w3"].shape[1]
    z = jnp.einsum("nhwc,cd->nhwd", x, params["w1"])
    z = jnp.clip(z * params["s1"] + params["b1"], 0.0, 6.0)
    zp = jnp.pad(z, ((0, 0), (1, 1), (1, 1), (0, 0)))
    acc = jnp.zeros_like(z)
    for di in range(3):
        for dj in range(3):
            acc = acc + zp[:, di:di + h, dj:dj + w, :] * params["w2"][di, dj]
    z = jnp.clip(acc * params["s2"] + params["b2"], 0.0, 6.0)
    z = jnp.einsum("nhwc,cd->nhwd", z, params["w3"]) * params["s3"] + params["b3"]
    if cin == cout and stride == 1:
        z = z + x
    return z


# ----------------------------- params ---------------------------------------


def init_params(key, in_channels, mid_channels, out_channels, eps=1e-5):
    ks = jax.random.split(key, 6)

    def fold_bn(gamma, beta, mean, var):
        scale = gamma / jnp.sqrt(var + eps)
        return scale, beta - mean * scale

    def bn_params(k, c):
        k1, k2, k3, k4 = jax.random.split(k, 4)
        gamma = jax.random.uniform(k1, (c,), jnp.float32, 0.5, 1.5)
        beta = 0.1 * jax.random.normal(k2, (c,), jnp.float32)
        mean = 0.1 * jax.random.normal(k3, (c,), jnp.float32)
        var = jax.random.uniform(k4, (c,), jnp.float32, 0.5, 1.5)
        return fold_bn(gamma, beta, mean, var)

    # conv1: PyTorch weight (mid, in, 1, 1) -> (in, mid)
    w1 = 0.1 * jax.random.normal(ks[0], (in_channels, mid_channels), jnp.float32)
    s1, b1 = bn_params(ks[1], mid_channels)
    # conv2 (depthwise): PyTorch weight (mid, 1, 3, 3) -> (3, 3, mid)
    w2 = 0.1 * jax.random.normal(ks[2], (3, 3, mid_channels), jnp.float32)
    s2, b2 = bn_params(ks[3], mid_channels)
    # conv3: PyTorch weight (out, mid, 1, 1) -> (mid, out)
    w3 = 0.1 * jax.random.normal(ks[4], (mid_channels, out_channels), jnp.float32)
    s3, b3 = bn_params(ks[5], out_channels)

    return dict(w1=w1, s1=s1, b1=b1,
                w2=w2, s2=s2, b2=b2,
                w3=w3, s3=s3, b3=b3)


# ----------------------------- main ------------------------------------------


if __name__ == "__main__":
    key = jax.random.PRNGKey(0)
    k_x, k_p = jax.random.split(key)

    batch, in_ch, mid_ch, out_ch, spatial = 2, 4, 16, 4, 16
    x = jax.random.normal(k_x, (batch, in_ch, spatial, spatial), jnp.float32)  # NCHW
    params = init_params(k_p, in_ch, mid_ch, out_ch)

    fwd = jax.jit(functools.partial(linear_bottleneck_forward,
                                    stride=1, use_se=False))
    out, z = fwd(x, params)
    out, z = jax.block_until_ready((out, z))

    assert out.shape == x.shape
    assert z.shape == (batch, spatial, spatial, out_ch)   # z is NHWC
    assert bool(jnp.all(jnp.isfinite(z)))
    # module semantics: the reference forward() returns x untouched
    assert bool(jnp.allclose(out, x))
    # numerical check of the bottleneck branch vs. f32 reference (kernel is bf16)
    z_ref = _reference_forward(x, params)
    assert bool(jnp.allclose(z, z_ref, atol=1e-1, rtol=1e-1)), \
        f"max|dz| = {float(jnp.max(jnp.abs(z - z_ref)))}"
    print("KERNEL_OK")
</pallas_src>

<mosaic_0001>
module attributes {stable_mosaic.version = 11 : i64} {
  func.func @_fused_bottleneck_kernel(%arg0: i32, %arg1: i32, %arg2: memref<1x18x24x4xbf16, #tpu.memory_space<vmem>>, %arg3: memref<1x256x128xbf16, #tpu.memory_space<vmem>>, %arg4: memref<4x128xbf16, #tpu.memory_space<vmem>>, %arg5: memref<1x128xf32, #tpu.memory_space<vmem>>, %arg6: memref<1x128xf32, #tpu.memory_space<vmem>>, %arg7: memref<9x128xbf16, #tpu.memory_space<vmem>>, %arg8: memref<1x128xf32, #tpu.memory_space<vmem>>, %arg9: memref<1x128xf32, #tpu.memory_space<vmem>>, %arg10: memref<128x128xbf16, #tpu.memory_space<vmem>>, %arg11: memref<1x128xf32, #tpu.memory_space<vmem>>, %arg12: memref<1x128xf32, #tpu.memory_space<vmem>>, %arg13: memref<1x256x128xf32, #tpu.memory_space<vmem>>, %arg14: memref<18x24x128xbf16, #tpu.memory_space<vmem>>) attributes {dimension_semantics = [#tpu.dimension_semantics<parallel>, #tpu.dimension_semantics<parallel>], iteration_bounds = array<i64: 2, 1>, scalar_prefetch = 0 : i64, scratch_operands = 1 : i64, tpu.core_type = #tpu.core_type<tc>, window_params = [{transform_indices = @transform_0, window_bounds = array<i64: 1, 18, 24, 4>}, {transform_indices = @transform_1, window_bounds = array<i64: 1, 256, 128>}, {pipeline_mode = #tpu.pipeline_mode<synchronous>, transform_indices = @transform_2, window_bounds = array<i64: 4, 128>}, {pipeline_mode = #tpu.pipeline_mode<synchronous>, transform_indices = @transform_3, window_bounds = array<i64: 1, 128>}, {pipeline_mode = #tpu.pipeline_mode<synchronous>, transform_indices = @transform_4, window_bounds = array<i64: 1, 128>}, {pipeline_mode = #tpu.pipeline_mode<synchronous>, transform_indices = @transform_5, window_bounds = array<i64: 9, 128>}, {pipeline_mode = #tpu.pipeline_mode<synchronous>, transform_indices = @transform_6, window_bounds = array<i64: 1, 128>}, {pipeline_mode = #tpu.pipeline_mode<synchronous>, transform_indices = @transform_7, window_bounds = array<i64: 1, 128>}, {pipeline_mode = #tpu.pipeline_mode<synchronous>, transform_indices = @transform_8, window_bounds = array<i64: 128, 128>}, {pipeline_mode = #tpu.pipeline_mode<synchronous>, transform_indices = @transform_9, window_bounds = array<i64: 1, 128>}, {pipeline_mode = #tpu.pipeline_mode<synchronous>, transform_indices = @transform_10, window_bounds = array<i64: 1, 128>}, {transform_indices = @transform_11, window_bounds = array<i64: 1, 256, 128>}]} {
    %c16_i32 = arith.constant 16 : i32
    %0 = arith.muli %arg1, %c16_i32 : i32
    %1 = tpu.assume_multiple %0, 16 : i32
    %c0 = arith.constant 0 : index
    %2 = arith.index_cast %1 : i32 to index
    %c0_0 = arith.constant 0 : index
    %c0_1 = arith.constant 0 : index
    %3 = vector.load %arg2[%c0, %2, %c0_0, %c0_1] : memref<1x18x24x4xbf16, #tpu.memory_space<vmem>>, vector<1x18x24x4xbf16>
    %4 = vector.shape_cast %3 : vector<1x18x24x4xbf16> to vector<18x24x4xbf16>
    %5 = vector.shape_cast %4 : vector<18x24x4xbf16> to vector<432x4xbf16>
    %c0_2 = arith.constant 0 : index
    %c0_3 = arith.constant 0 : index
    %6 = vector.load %arg4[%c0_2, %c0_3] : memref<4x128xbf16, #tpu.memory_space<vmem>>, vector<4x128xbf16>
    %cst = arith.constant dense<0.000000e+00> : vector<432x128xf32>
    %7 = tpu.matmul %5, %6, %cst {dimension_numbers = #tpu.dot_dimension_numbers<[1], [0], [0], [1], [0, 0, 1, 1], [], []>} : vector<432x4xbf16>, vector<4x128xbf16>, vector<432x128xf32> -> vector<432x128xf32>
    %8 = vector.shape_cast %7 : vector<432x128xf32> to vector<18x24x128xf32>
    %c0_4 = arith.constant 0 : index
    %c0_5 = arith.constant 0 : index
    %9 = vector.load %arg5[%c0_4, %c0_5] : memref<1x128xf32, #tpu.memory_space<vmem>>, vector<1x128xf32>
    %10 = vector.shape_cast %9 : vector<1x128xf32> to vector<1x1x128xf32>
    %11 = vector.broadcast %10 : vector<1x1x128xf32> to vector<18x24x128xf32>
    %12 = arith.mulf %8, %11 : vector<18x24x128xf32>
    %c0_6 = arith.constant 0 : index
    %c0_7 = arith.constant 0 : index
    %13 = vector.load %arg6[%c0_6, %c0_7] : memref<1x128xf32, #tpu.memory_space<vmem>>, vector<1x128xf32>
    %14 = vector.shape_cast %13 : vector<1x128xf32> to vector<1x1x128xf32>
    %15 = vector.broadcast %14 : vector<1x1x128xf32> to vector<18x24x128xf32>
    %16 = arith.addf %12, %15 : vector<18x24x128xf32>
    %cst_8 = arith.constant 0.000000e+00 : f32
    %cst_9 = arith.constant 6.000000e+00 : f32
    %17 = vector.broadcast %cst_8 : f32 to vector<18x24x128xf32>
    %18 = arith.maximumf %17, %16 : vector<18x24x128xf32>
    %19 = vector.broadcast %cst_9 : f32 to vector<18x24x128xf32>
    %20 = arith.minimumf %19, %18 : vector<18x24x128xf32>
    %21 = arith.truncf %20 : vector<18x24x128xf32> to vector<18x24x128xbf16>
    %c0_10 = arith.constant 0 : index
    %c0_11 = arith.constant 0 : index
    %c0_12 = arith.constant 0 : index
    %22 = vector.load %arg14[%c0_10, %c0_11, %c0_12] : memref<18x24x128xbf16, #tpu.memory_space<vmem>>, vector<18x24x128xbf16>
    tpu.vector_store %arg14[%c0_10, %c0_11, %c0_12], %21 {strides = array<i32>} : memref<18x24x128xbf16, #tpu.memory_space<vmem>>, vector<18x24x128xbf16>,
    %cst_13 = arith.constant 0.000000e+00 : bf16
    %23 = vector.broadcast %cst_13 : bf16 to vector<18x1x128xbf16>
    %c0_14 = arith.constant 0 : index
    %c0_15 = arith.constant 0 : index
    %c0_16 = arith.constant 0 : index
    %24 = vector.load %arg14[%c0_14, %c0_15, %c0_16] : memref<18x24x128xbf16, #tpu.memory_space<vmem>>, vector<18x1x128xbf16>
    tpu.vector_store %arg14[%c0_14, %c0_15, %c0_16], %23 {strides = array<i32>} : memref<18x24x128xbf16, #tpu.memory_space<vmem>>, vector<18x1x128xbf16>,
    %cst_17 = arith.constant 0.000000e+00 : bf16
    %25 = vector.broadcast %cst_17 : bf16 to vector<18x7x128xbf16>
    %c0_18 = arith.constant 0 : index
    %c17 = arith.constant 17 : index
    %c0_19 = arith.constant 0 : index
    %26 = vector.load %arg14[%c0_18, %c17, %c0_19] : memref<18x24x128xbf16, #tpu.memory_space<vmem>>, vector<18x7x128xbf16>
    tpu.vector_store %arg14[%c0_18, %c17, %c0_19], %25 {strides = array<i32>} : memref<18x24x128xbf16, #tpu.memory_space<vmem>>, vector<18x7x128xbf16>,
    %c0_i32 = arith.constant 0 : i32
    %27 = arith.cmpi eq, %arg1, %c0_i32 : i32
    %28 = arith.extui %27 : i1 to i32
    %c0_i32_20 = arith.constant 0 : i32
    %29 = arith.cmpi ne, %28, %c0_i32_20 : i32
    scf.if %29 {
      %cst_56 = arith.constant 0.000000e+00 : bf16
      %131 = vector.broadcast %cst_56 : bf16 to vector<1x24x128xbf16>
      %c0_57 = arith.constant 0 : index
      %c0_58 = arith.constant 0 : index
      %c0_59 = arith.constant 0 : index
      %132 = vector.load %arg14[%c0_57, %c0_58, %c0_59] : memref<18x24x128xbf16, #tpu.memory_space<vmem>>, vector<1x24x128xbf16>
      tpu.vector_store %arg14[%c0_57, %c0_58, %c0_59], %131 {strides = array<i32>} : memref<18x24x128xbf16, #tpu.memory_space<vmem>>, vector<1x24x128xbf16>,
    } else {
    }
    %c0_i32_21 = arith.constant 0 : i32
    %30 = arith.cmpi eq, %arg1, %c0_i32_21 : i32
    %31 = arith.extui %30 : i1 to i32
    %c0_i32_22 = arith.constant 0 : i32
    %32 = arith.cmpi ne, %31, %c0_i32_22 : i32
    scf.if %32 {
      %cst_56 = arith.constant 0.000000e+00 : bf16
      %131 = vector.broadcast %cst_56 : bf16 to vector<1x24x128xbf16>
      %c17_57 = arith.constant 17 : index
      %c0_58 = arith.constant 0 : index
      %c0_59 = arith.constant 0 : index
      %132 = vector.load %arg14[%c17_57, %c0_58, %c0_59] : memref<18x24x128xbf16, #tpu.memory_space<vmem>>, vector<1x24x128xbf16>
      tpu.vector_store %arg14[%c17_57, %c0_58, %c0_59], %131 {strides = array<i32>} : memref<18x24x128xbf16, #tpu.memory_space<vmem>>, vector<1x24x128xbf16>,
    } else {
    }
    %c0_23 = arith.constant 0 : index
    %c0_24 = arith.constant 0 : index
    %33 = vector.load %arg7[%c0_23, %c0_24] : memref<9x128xbf16, #tpu.memory_space<vmem>>, vector<9x128xbf16>
    %34 = arith.extf %33 : vector<9x128xbf16> to vector<9x128xf32>
    %35 = vector.extract_strided_slice %34 {offsets = [0, 0], sizes = [1, 128], strides = [1, 1]} : vector<9x128xf32> to vector<1x128xf32>
    %36 = vector.shape_cast %35 : vector<1x128xf32> to vector<1x1x128xf32>
    %37 = vector.extract_strided_slice %34 {offsets = [1, 0], sizes = [1, 128], strides = [1, 1]} : vector<9x128xf32> to vector<1x128xf32>
    %38 = vector.shape_cast %37 : vector<1x128xf32> to vector<1x1x128xf32>
    %39 = vector.extract_strided_slice %34 {offsets = [2, 0], sizes = [1, 128], strides = [1, 1]} : vector<9x128xf32> to vector<1x128xf32>
    %40 = vector.shape_cast %39 : vector<1x128xf32> to vector<1x1x128xf32>
    %41 = vector.extract_strided_slice %34 {offsets = [3, 0], sizes = [1, 128], strides = [1, 1]} : vector<9x128xf32> to vector<1x128xf32>
    %42 = vector.shape_cast %41 : vector<1x128xf32> to vector<1x1x128xf32>
    %43 = vector.extract_strided_slice %34 {offsets = [4, 0], sizes = [1, 128], strides = [1, 1]} : vector<9x128xf32> to vector<1x128xf32>
    %44 = vector.shape_cast %43 : vector<1x128xf32> to vector<1x1x128xf32>
    %45 = vector.extract_strided_slice %34 {offsets = [5, 0], sizes = [1, 128], strides = [1, 1]} : vector<9x128xf32> to vector<1x128xf32>
    %46 = vector.shape_cast %45 : vector<1x128xf32> to vector<1x1x128xf32>
    %47 = vector.extract_strided_slice %34 {offsets = [6, 0], sizes = [1, 128], strides = [1, 1]} : vector<9x128xf32> to vector<1x128xf32>
    %48 = vector.shape_cast %47 : vector<1x128xf32> to vector<1x1x128xf32>
    %49 = vector.extract_strided_slice %34 {offsets = [7, 0], sizes = [1, 128], strides = [1, 1]} : vector<9x128xf32> to vector<1x128xf32>
    %50 = vector.shape_cast %49 : vector<1x128xf32> to vector<1x1x128xf32>
    %51 = vector.extract_strided_slice %34 {offsets = [8, 0], sizes = [1, 128], strides = [1, 1]} : vector<9x128xf32> to vector<1x128xf32>
    %52 = vector.shape_cast %51 : vector<1x128xf32> to vector<1x1x128xf32>
    %cst_25 = arith.constant 0.000000e+00 : f32
    %53 = vector.broadcast %cst_25 : f32 to vector<16x16x128xf32>
    %c0_26 = arith.constant 0 : index
    %c0_27 = arith.constant 0 : index
    %c0_28 = arith.constant 0 : index
    %54 = vector.load %arg14[%c0_26, %c0_27, %c0_28] : memref<18x24x128xbf16, #tpu.memory_space<vmem>>, vector<16x24x128xbf16>
    %55 = arith.extf %54 : vector<16x24x128xbf16> to vector<16x24x128xf32>
    %56 = vector.extract_strided_slice %55 {offsets = [0, 0, 0], sizes = [16, 16, 128], strides = [1, 1, 1]} : vector<16x24x128xf32> to vector<16x16x128xf32>
    %57 = vector.broadcast %36 : vector<1x1x128xf32> to vector<16x16x128xf32>
    %58 = arith.mulf %56, %57 : vector<16x16x128xf32>
    %59 = arith.addf %53, %58 : vector<16x16x128xf32>
    %c23_i32 = arith.constant 23 : i32
    %60 = tpu.dynamic_rotate %55 by %c23_i32 dim 1 : vector<16x24x128xf32>, i32 -> vector<16x24x128xf32>
    %61 = vector.extract_strided_slice %60 {offsets = [0, 0, 0], sizes = [16, 16, 128], strides = [1, 1, 1]} : vector<16x24x128xf32> to vector<16x16x128xf32>
    %62 = vector.broadcast %38 : vector<1x1x128xf32> to vector<16x16x128xf32>
    %63 = arith.mulf %61, %62 : vector<16x16x128xf32>
    %64 = arith.addf %59, %63 : vector<16x16x128xf32>
    %c22_i32 = arith.constant 22 : i32
    %65 = tpu.dynamic_rotate %55 by %c22_i32 dim 1 : vector<16x24x128xf32>, i32 -> vector<16x24x128xf32>
    %66 = vector.extract_strided_slice %65 {offsets = [0, 0, 0], sizes = [16, 16, 128], strides = [1, 1, 1]} : vector<16x24x128xf32> to vector<16x16x128xf32>
    %67 = vector.broadcast %40 : vector<1x1x128xf32> to vector<16x16x128xf32>
    %68 = arith.mulf %66, %67 : vector<16x16x128xf32>
    %69 = arith.addf %64, %68 : vector<16x16x128xf32>
    %c1 = arith.constant 1 : index
    %c0_29 = arith.constant 0 : index
    %c0_30 = arith.constant 0 : index
    %70 = vector.load %arg14[%c1, %c0_29, %c0_30] : memref<18x24x128xbf16, #tpu.memory_space<vmem>>, vector<16x24x128xbf16>
    %71 = arith.extf %70 : vector<16x24x128xbf16> to vector<16x24x128xf32>
    %72 = vector.extract_strided_slice %71 {offsets = [0, 0, 0], sizes = [16, 16, 128], strides = [1, 1, 1]} : vector<16x24x128xf32> to vector<16x16x128xf32>
    %73 = vector.broadcast %42 : vector<1x1x128xf32> to vector<16x16x128xf32>
    %74 = arith.mulf %72, %73 : vector<16x16x128xf32>
    %75 = arith.addf %69, %74 : vector<16x16x128xf32>
    %c23_i32_31 = arith.constant 23 : i32
    %76 = tpu.dynamic_rotate %71 by %c23_i32_31 dim 1 : vector<16x24x128xf32>, i32 -> vector<16x24x128xf32>
    %77 = vector.extract_strided_slice %76 {offsets = [0, 0, 0], sizes = [16, 16, 128], strides = [1, 1, 1]} : vector<16x24x128xf32> to vector<16x16x128xf32>
    %78 = vector.broadcast %44 : vector<1x1x128xf32> to vector<16x16x128xf32>
    %79 = arith.mulf %77, %78 : vector<16x16x128xf32>
    %80 = arith.addf %75, %79 : vector<16x16x128xf32>
    %c22_i32_32 = arith.constant 22 : i32
    %81 = tpu.dynamic_rotate %71 by %c22_i32_32 dim 1 : vector<16x24x128xf32>, i32 -> vector<16x24x128xf32>
    %82 = vector.extract_strided_slice %81 {offsets = [0, 0, 0], sizes = [16, 16, 128], strides = [1, 1, 1]} : vector<16x24x128xf32> to vector<16x16x128xf32>
    %83 = vector.broadcast %46 : vector<1x1x128xf32> to vector<16x16x128xf32>
    %84 = arith.mulf %82, %83 : vector<16x16x128xf32>
    %85 = arith.addf %80, %84 : vector<16x16x128xf32>
    %c2 = arith.constant 2 : index
    %c0_33 = arith.constant 0 : index
    %c0_34 = arith.constant 0 : index
    %86 = vector.load %arg14[%c2, %c0_33, %c0_34] : memref<18x24x128xbf16, #tpu.memory_space<vmem>>, vector<16x24x128xbf16>
    %87 = arith.extf %86 : vector<16x24x128xbf16> to vector<16x24x128xf32>
    %88 = vector.extract_strided_slice %87 {offsets = [0, 0, 0], sizes = [16, 16, 128], strides = [1, 1, 1]} : vector<16x24x128xf32> to vector<16x16x128xf32>
    %89 = vector.broadcast %48 : vector<1x1x128xf32> to vector<16x16x128xf32>
    %90 = arith.mulf %88, %89 : vector<16x16x128xf32>
    %91 = arith.addf %85, %90 : vector<16x16x128xf32>
    %c23_i32_35 = arith.constant 23 : i32
    %92 = tpu.dynamic_rotate %87 by %c23_i32_35 dim 1 : vector<16x24x128xf32>, i32 -> vector<16x24x128xf32>
    %93 = vector.extract_strided_slice %92 {offsets = [0, 0, 0], sizes = [16, 16, 128], strides = [1, 1, 1]} : vector<16x24x128xf32> to vector<16x16x128xf32>
    %94 = vector.broadcast %50 : vector<1x1x128xf32> to vector<16x16x128xf32>
    %95 = arith.mulf %93, %94 : vector<16x16x128xf32>
    %96 = arith.addf %91, %95 : vector<16x16x128xf32>
    %c22_i32_36 = arith.constant 22 : i32
    %97 = tpu.dynamic_rotate %87 by %c22_i32_36 dim 1 : vector<16x24x128xf32>, i32 -> vector<16x24x128xf32>
    %98 = vector.extract_strided_slice %97 {offsets = [0, 0, 0], sizes = [16, 16, 128], strides = [1, 1, 1]} : vector<16x24x128xf32> to vector<16x16x128xf32>
    %99 = vector.broadcast %52 : vector<1x1x128xf32> to vector<16x16x128xf32>
    %100 = arith.mulf %98, %99 : vector<16x16x128xf32>
    %101 = arith.addf %96, %100 : vector<16x16x128xf32>
    %c0_37 = arith.constant 0 : index
    %c0_38 = arith.constant 0 : index
    %102 = vector.load %arg8[%c0_37, %c0_38] : memref<1x128xf32, #tpu.memory_space<vmem>>, vector<1x128xf32>
    %103 = vector.shape_cast %102 : vector<1x128xf32> to vector<1x1x128xf32>
    %104 = vector.broadcast %103 : vector<1x1x128xf32> to vector<16x16x128xf32>
    %105 = arith.mulf %101, %104 : vector<16x16x128xf32>
    %c0_39 = arith.constant 0 : index
    %c0_40 = arith.constant 0 : index
    %106 = vector.load %arg9[%c0_39, %c0_40] : memref<1x128xf32, #tpu.memory_space<vmem>>, vector<1x128xf32>
    %107 = vector.shape_cast %106 : vector<1x128xf32> to vector<1x1x128xf32>
    %108 = vector.broadcast %107 : vector<1x1x128xf32> to vector<16x16x128xf32>
    %109 = arith.addf %105, %108 : vector<16x16x128xf32>
    %cst_41 = arith.constant 0.000000e+00 : f32
    %cst_42 = arith.constant 6.000000e+00 : f32
    %110 = vector.broadcast %cst_41 : f32 to vector<16x16x128xf32>
    %111 = arith.maximumf %110, %109 : vector<16x16x128xf32>
    %112 = vector.broadcast %cst_42 : f32 to vector<16x16x128xf32>
    %113 = arith.minimumf %112, %111 : vector<16x16x128xf32>
    %114 = vector.shape_cast %113 : vector<16x16x128xf32> to vector<256x128xf32>
    %115 = arith.truncf %114 : vector<256x128xf32> to vector<256x128xbf16>
    %c0_43 = arith.constant 0 : index
    %c0_44 = arith.constant 0 : index
    %116 = vector.load %arg10[%c0_43, %c0_44] : memref<128x128xbf16, #tpu.memory_space<vmem>>, vector<128x128xbf16>
    %cst_45 = arith.constant dense<0.000000e+00> : vector<256x128xf32>
    %117 = tpu.matmul %115, %116, %cst_45 {dimension_numbers = #tpu.dot_dimension_numbers<[1], [0], [0], [1], [0, 0, 1, 1], [], []>} : vector<256x128xbf16>, vector<128x128xbf16>, vector<256x128xf32> -> vector<256x128xf32>
    %c0_46 = arith.constant 0 : index
    %c0_47 = arith.constant 0 : index
    %118 = vector.load %arg11[%c0_46, %c0_47] : memref<1x128xf32, #tpu.memory_space<vmem>>, vector<1x128xf32>
    %119 = vector.broadcast %118 : vector<1x128xf32> to vector<256x128xf32>
    %120 = arith.mulf %117, %119 : vector<256x128xf32>
    %c0_48 = arith.constant 0 : index
    %c0_49 = arith.constant 0 : index
    %121 = vector.load %arg12[%c0_48, %c0_49] : memref<1x128xf32, #tpu.memory_space<vmem>>, vector<1x128xf32>
    %122 = vector.broadcast %121 : vector<1x128xf32> to vector<256x128xf32>
    %123 = arith.addf %120, %122 : vector<256x128xf32>
    %c0_50 = arith.constant 0 : index
    %c0_51 = arith.constant 0 : index
    %c0_52 = arith.constant 0 : index
    %124 = vector.load %arg3[%c0_50, %c0_51, %c0_52] : memref<1x256x128xbf16, #tpu.memory_space<vmem>>, vector<1x256x128xbf16>
    %125 = vector.shape_cast %124 : vector<1x256x128xbf16> to vector<256x128xbf16>
    %126 = arith.extf %125 : vector<256x128xbf16> to vector<256x128xf32>
    %127 = arith.addf %123, %126 : vector<256x128xf32>
    %c0_53 = arith.constant 0 : index
    %c0_54 = arith.constant 0 : index
    %c0_55 = arith.constant 0 : index
    %128 = vector.load %arg13[%c0_53, %c0_54, %c0_55] : memref<1x256x128xf32, #tpu.memory_space<vmem>>, vector<1x256x128xf32>
    %129 = vector.shape_cast %128 : vector<1x256x128xf32> to vector<256x128xf32>
    %130 = vector.shape_cast %127 : vector<256x128xf32> to vector<1x256x128xf32>
    tpu.vector_store %arg13[%c0_53, %c0_54, %c0_55], %130 {strides = array<i32>} : memref<1x256x128xf32, #tpu.memory_space<vmem>>, vector<1x256x128xf32>,
    return
  }
  func.func @transform_0(%arg0: i32, %arg1: i32) -> (i32, i32, i32, i32) {
    %c0_i32 = arith.constant 0 : i32
    %c0_i32_0 = arith.constant 0 : i32
    %c0_i32_1 = arith.constant 0 : i32
    %c0_i32_2 = arith.constant 0 : i32
    return %arg0, %c0_i32, %c0_i32_0, %c0_i32_1 : i32, i32, i32, i32
  }
  func.func @transform_1(%arg0: i32, %arg1: i32) -> (i32, i32, i32) {
    %c0_i32 = arith.constant 0 : i32
    %c0_i32_0 = arith.constant 0 : i32
    return %arg0, %arg1, %c0_i32 : i32, i32, i32
  }
  func.func @transform_2(%arg0: i32, %arg1: i32) -> (i32, i32) {
    %c0_i32 = arith.constant 0 : i32
    %c0_i32_0 = arith.constant 0 : i32
    %c0_i32_1 = arith.constant 0 : i32
    return %c0_i32, %c0_i32_0 : i32, i32
  }
  func.func @transform_3(%arg0: i32, %arg1: i32) -> (i32, i32) {
    %c0_i32 = arith.constant 0 : i32
    %c0_i32_0 = arith.constant 0 : i32
    %c0_i32_1 = arith.constant 0 : i32
    return %c0_i32, %c0_i32_0 : i32, i32
  }
  func.func @transform_4(%arg0: i32, %arg1: i32) -> (i32, i32) {
    %c0_i32 = arith.constant 0 : i32
    %c0_i32_0 = arith.constant 0 : i32
    %c0_i32_1 = arith.constant 0 : i32
    return %c0_i32, %c0_i32_0 : i32, i32
  }
  func.func @transform_5(%arg0: i32, %arg1: i32) -> (i32, i32) {
    %c0_i32 = arith.constant 0 : i32
    %c0_i32_0 = arith.constant 0 : i32
    %c0_i32_1 = arith.constant 0 : i32
    return %c0_i32, %c0_i32_0 : i32, i32
  }
  func.func @transform_6(%arg0: i32, %arg1: i32) -> (i32, i32) {
    %c0_i32 = arith.constant 0 : i32
    %c0_i32_0 = arith.constant 0 : i32
    %c0_i32_1 = arith.constant 0 : i32
    return %c0_i32, %c0_i32_0 : i32, i32
  }
  func.func @transform_7(%arg0: i32, %arg1: i32) -> (i32, i32) {
    %c0_i32 = arith.constant 0 : i32
    %c0_i32_0 = arith.constant 0 : i32
    %c0_i32_1 = arith.constant 0 : i32
    return %c0_i32, %c0_i32_0 : i32, i32
  }
  func.func @transform_8(%arg0: i32, %arg1: i32) -> (i32, i32) {
    %c0_i32 = arith.constant 0 : i32
    %c0_i32_0 = arith.constant 0 : i32
    %c0_i32_1 = arith.constant 0 : i32
    return %c0_i32, %c0_i32_0 : i32, i32
  }
  func.func @transform_9(%arg0: i32, %arg1: i32) -> (i32, i32) {
    %c0_i32 = arith.constant 0 : i32
    %c0_i32_0 = arith.constant 0 : i32
    %c0_i32_1 = arith.constant 0 : i32
    return %c0_i32, %c0_i32_0 : i32, i32
  }
  func.func @transform_10(%arg0: i32, %arg1: i32) -> (i32, i32) {
    %c0_i32 = arith.constant 0 : i32
    %c0_i32_0 = arith.constant 0 : i32
    %c0_i32_1 = arith.constant 0 : i32
    return %c0_i32, %c0_i32_0 : i32, i32
  }
  func.func @transform_11(%arg0: i32, %arg1: i32) -> (i32, i32, i32) {
    %c0_i32 = arith.constant 0 : i32
    %c0_i32_0 = arith.constant 0 : i32
    return %arg0, %arg1, %c0_i32 : i32, i32, i32
  }
}

</mosaic_0001>

<bundles_post_ra>
// kernel: linear_bottleneck_forward.1
= control target key start
LH: loop header
LB: loop body
LE: loop exit
PB: predicated region body
PF: predicated region fallthrough
CT: control target
= control target key end

     0   :  { %s4850_s17 = smov 0   ;;  %s4852_s18 = smov 0   ;;  %s6564_s0 = inlined_call_operand.vmem [shape: bf16[2,18,24,4], index: 0, kind: input, shape index: {}]   ;;  %s6565_s1 = inlined_call_operand.vmem [shape: bf16[2,256,128], index: 1, kind: input, shape index: {}]   ;;  %s6566_s2 = inlined_call_operand.vmem [shape: bf16[4,128], index: 2, kind: input, shape index: {}]   ;;  %s6567_s3 = inlined_call_operand.vmem [shape: f32[1,128], index: 3, kind: input, shape index: {}]   ;;  %s6568_s4 = inlined_call_operand.vmem [shape: f32[1,128], index: 4, kind: input, shape index: {}]   ;;  %s6569_s5 = inlined_call_operand.vmem [shape: bf16[9,128], index: 5, kind: input, shape index: {}]   ;;  %s6570_s6 = inlined_call_operand.vmem [shape: f32[1,128], index: 6, kind: input, shape index: {}]   ;;  %s6571_s7 = inlined_call_operand.vmem [shape: f32[1,128], index: 7, kind: input, shape index: {}]   ;;  %s6572_s8 = inlined_call_operand.vmem [shape: bf16[128,128], index: 8, kind: input, shape index: {}]   ;;  %s6573_s9 = inlined_call_operand.vmem [shape: f32[1,128], index: 9, kind: input, shape index: {}]   ;;  %s6574_s10 = inlined_call_operand.vmem [shape: f32[1,128], index: 10, kind: input, shape index: {}]   ;;  %s6575_s11 = inlined_call_operand.vmem [shape: f32[2,256,128], index: 11, kind: output, shape index: {}]  }
   0x1   :  { %s4854_s19 = smov 0  }
   0x2 LB: > { %s33_s20 = sadd.s32 1, %s4781_s18  ;;  %p3703_p0 = scmp.ge.s32.totalorder %s4785_s19, 1  ;;  %s4785_s19 = sphi %s4854_s19, %s21_s19   ;;  %s4781_s18 = sphi %s4852_s18, %s6581_s18   ;;  %s4777_s17 = sphi %s4850_s17, %s6580_s17  }
   0x3   : > { %p35_p1 = scmp.ge.s32.totalorder %s33_s20, 2  ;;  %p368_p2 = scmp.lt.s32.totalorder %s4785_s19, 3 }
   0x5   : > { %s6583_s20 = smov (%p35_p1, %s33_s20), 0  ;;  %p369_p3 = pnand %p3703_p0, %p368_p2 }
   0x6   : > { %v505_v0 = vld [vmem:[%s6566_s2] sm:$0x3] (!%p369_p3)  ;;  %vm723_vm0 = vcmask (!%p369_p3), 1041408   ;;  %p421_p4 = scmp.lt.s32.totalorder (!%p369_p3), %s4777_s17, 1  ;;  %v4787_v1 = vmov (!%p369_p3), 0.0   ;;  %vm4788_vm1 = vmmov (!%p369_p3), 0   ;;  %v1719_v59 = vlaneseq (!%p369_p3) }
   0x7   : > { %372 = sbr.rel (%p369_p3) target bundleno = 784 (0x310), region = 64  ;;  %4534 = vmatprep.subr.bf16.mxu0 (!%p369_p3), %v4787_v1  ;;  %v725_v2 = vsel (!%p369_p3), %vm723_vm0, %v505_v0, 0  ;;  %4536 = vmatprep.mubr.msk.bf16.mxu0 (!%p369_p3), %vm4788_vm1, %v4787_v1  ;;  %vm641_vm2 = vcmask (!%p369_p3), 31744   ;;  %v4749_v30 = vld [vmem:[%s6572_s8] sm:$0xff] (!%p369_p3)   ;;  %v4750_v31 = vld [vmem:[%s6572_s8 + $0x8] sm:$0xff] (!%p369_p3)   ;;  %v4751_v32 = vld [vmem:[%s6572_s8 + $0x10] sm:$0xff] (!%p369_p3)  }
   0x8   : > { %4535 = vmatpush3.bf16.msra.mxu0 (!%p369_p3), %v725_v2  ;;  %4692 = vmatprep.subr.bf16.mxu1 (!%p369_p3), %v4787_v1  ;;  %v4752_v33 = vld [vmem:[%s6572_s8 + $0x18] sm:$0xff] (!%p369_p3)   ;;  %v4753_v34 = vld [vmem:[%s6572_s8 + $0x20] sm:$0xff] (!%p369_p3)   ;;  %v4754_v35 = vld [vmem:[%s6572_s8 + $0x28] sm:$0xff] (!%p369_p3)   ;;  %vm1494_vm3 = vcmask (!%p369_p3), 1040384   ;;  %vm1495_vm4 = vsmask.f32 (!%p369_p3), 256 }
   0x9   : > { %4693 = vmatpush3.bf16.msra.mxu1 (!%p369_p3), %v725_v2  ;;  %4608 = vmatprep.mubr.msk.bf16.mxu1 (!%p369_p3), %vm4788_vm1, %v4787_v1  ;;  %v4755_v36 = vld [vmem:[%s6572_s8 + $0x30] sm:$0xff] (!%p369_p3)   ;;  %v4756_v37 = vld [vmem:[%s6572_s8 + $0x38] sm:$0xff] (!%p369_p3)   ;;  %v5016_v38 = vld [vmem:[%s6567_s3] ss:$0 sm:$0xff] (!%p369_p3)  ;;  %vm1551_vm6 = vcmask (!%p369_p3), 1043456  }
   0xa   : > { %4644 = vmatprep.subr.bf16.mxu1 (!%p369_p3), %v4749_v30  ;;  %v5021_v40 = vld [vmem:[%s6568_s4] ss:$0 sm:$0xff] (!%p369_p3)  ;;  %vm5044_vm5 = vmand (!%p369_p3), %vm1494_vm3, %vm1495_vm4  ;;  %vm1552_vm7 = vsmask.f32 (!%p369_p3), 7938 }
   0xb   : > { %vm5089_vm10 = vmand (!%p369_p3), %vm1551_vm6, %vm1552_vm7 }
   0xe   : > { %s6585_s17 = smov (!%p421_p4, %s4777_s17), 1 }
   0xf   : > { %s4694_s23 = smul.u32 216, %s6585_s17  ;;  %s3833_s22 = sshll.u32 %s6585_s17, 7 }
  0x10   : > { %s6407_s25 = scalar_lea.vmem %s6565_s1, %s3833_s22  ;;  %s3834_s30 = sshll.u32 %s6585_s17, 8 }
  0x11   : > { %s4883_s26 = scalar_lea.vmem %s6564_s0, %s4694_s23  ;;  %s6442_s13 = scalar_lea.vmem %s6575_s11, %s3834_s30 }
  0x12   : > { %v4722_v3 = vld [vmem:[%s4883_s26] sm:$0xff]   ;;  %v4723_v4 = vld [vmem:[%s4883_s26 + $0x8] sm:$0xff]   ;;  %v4731_v5 = vld [vmem:[%s4883_s26 + $0x90] sm:$0xff]  }
  0x13   : > { %4537 = vmatmul.mubr.msk.bf16.vlgmr.msra.gmra.mrb[0].mxu0 %vm641_vm2, %v4722_v3  ;;  %4609 = vmatmul.mubr.msk.bf16.vlgmr.msra.gmra.mrb[0].mxu1 %vm641_vm2, %v4731_v5  ;;  %v4724_v6 = vld [vmem:[%s4883_s26 + $0x10] sm:$0xff]   ;;  %v4733_v7 = vld [vmem:[%s4883_s26 + $0x98] sm:$0xff]   ;;  %v4735_v9 = vld [vmem:[%s4883_s26 + $0xa0] sm:$0xff]  }
  0x14   : > { %4540 = vmatprep.mubr.msk.bf16.mxu0 %vm4788_vm1, %v4787_v1  ;;  %4612 = vmatprep.mubr.msk.bf16.mxu1 %vm4788_vm1, %v4787_v1  ;;  %v4725_v8 = vld [vmem:[%s4883_s26 + $0x18] sm:$0xff]   ;;  %v4726_v10 = vld [vmem:[%s4883_s26 + $0x20] sm:$0xff]   ;;  %v4737_v11 = vld [vmem:[%s4883_s26 + $0xa8] sm:$0xff]  }
  0x15   : > { %v4727_v12 = vld [vmem:[%s4883_s26 + $0x28] sm:$0xff]   ;;  %v4739_v13 = vld [vmem:[%s4883_s26 + $0xb0] sm:$0xff]   ;;  %v4741_v15 = vld [vmem:[%s4883_s26 + $0xb8] sm:$0xff]   ;;  %4645 = vmatpush3.bf16.msra.mxu1 %v4749_v30 }
  0x16   : > { %v4728_v14 = vld [vmem:[%s4883_s26 + $0x30] sm:$0xff]   ;;  %v4729_v16 = vld [vmem:[%s4883_s26 + $0x38] sm:$0xff]   ;;  %v4743_v17 = vld [vmem:[%s4883_s26 + $0xc0] sm:$0xff]   ;;  %4646 = vmatprep.subr.bf16.mxu1 %v4750_v31 }
  0x17   : > { %v4730_v18 = vld [vmem:[%s4883_s26 + $0x40] sm:$0xff]   ;;  %v4745_v19 = vld [vmem:[%s4883_s26 + $0xc8] sm:$0xff]   ;;  %v4747_v21 = vld [vmem:[%s4883_s26 + $0xd0] sm:$0xff]  }
  0x18   : > { %v4732_v20 = vld [vmem:[%s4883_s26 + $0x48] sm:$0xff]   ;;  %v4734_v22 = vld [vmem:[%s4883_s26 + $0x50] sm:$0xff]   ;;  %v4736_v23 = vld [vmem:[%s4883_s26 + $0x58] sm:$0xff]  }
  0x19   : > { %v4738_v24 = vld [vmem:[%s4883_s26 + $0x60] sm:$0xff]   ;;  %v4740_v25 = vld [vmem:[%s4883_s26 + $0x68] sm:$0xff]   ;;  %v4742_v26 = vld [vmem:[%s4883_s26 + $0x70] sm:$0xff]   ;;  %4647 = vmatpush3.bf16.msra.mxu1 %v4750_v31 }
  0x1a   : > { %v4744_v27 = vld [vmem:[%s4883_s26 + $0x78] sm:$0xff]   ;;  %v4746_v28 = vld [vmem:[%s4883_s26 + $0x80] sm:$0xff]   ;;  %v4748_v29 = vld [vmem:[%s4883_s26 + $0x88] sm:$0xff]   ;;  %4648 = vmatprep.subr.bf16.mxu1 %v4751_v32 }
  0x1b   : > { %4541 = vmatmul.mubr.msk.bf16.gmra.mrb[4].mxu0 %vm641_vm2, %v4723_v4  ;;  %4613 = vmatmul.mubr.msk.bf16.gmra.mrb[4].mxu1 %vm641_vm2, %v4733_v7 }
  0x1c   : > { %4544 = vmatprep.mubr.msk.bf16.mxu0 %vm4788_vm1, %v4787_v1  ;;  %4616 = vmatprep.mubr.msk.bf16.mxu1 %vm4788_vm1, %v4787_v1 }
  0x1d   : > { %4649 = vmatpush3.bf16.msra.mxu1 %v4751_v32 }
  0x1e   : > { %4650 = vmatprep.subr.bf16.mxu1 %v4752_v33 }
  0x21   : > { %4651 = vmatpush3.bf16.msra.mxu1 %v4752_v33 }
  0x22   : > { %4652 = vmatprep.subr.bf16.mxu1 %v4753_v34 }
  0x23   : > { %4545 = vmatmul.mubr.msk.bf16.gmra.mrb[8].mxu0 %vm641_vm2, %v4724_v6  ;;  %4617 = vmatmul.mubr.msk.bf16.gmra.mrb[8].mxu1 %vm641_vm2, %v4735_v9  ;;  %v4789_v6 = vmov 0   ;;  %v1619_v9 = vld [vmem:[%s6569_s5] sm:$0xf] }
  0x24   : > { %4548 = vmatprep.mubr.msk.bf16.mxu0 %vm4788_vm1, %v4787_v1  ;;  %4620 = vmatprep.mubr.msk.bf16.mxu1 %vm4788_vm1, %v4787_v1 }
  0x25   : > { %4653 = vmatpush3.bf16.msra.mxu1 %v4753_v34 }
  0x26   : > { %4654 = vmatprep.subr.bf16.mxu1 %v4754_v35 }
  0x29   : > { %4655 = vmatpush3.bf16.msra.mxu1 %v4754_v35 }
  0x2a   : > { %4656 = vmatprep.subr.bf16.mxu1 %v4755_v36 }
  0x2b   : > { %4549 = vmatmul.mubr.msk.bf16.gmra.mrb[12].mxu0 %vm641_vm2, %v4725_v8  ;;  %4621 = vmatmul.mubr.msk.bf16.gmra.mrb[12].mxu1 %vm641_vm2, %v4737_v11 }
  0x2c   : > { %4552 = vmatprep.mubr.msk.bf16.mxu0 %vm4788_vm1, %v4787_v1  ;;  %4624 = vmatprep.mubr.msk.bf16.mxu1 %vm4788_vm1, %v4787_v1 }
  0x2d   : > { %4657 = vmatpush3.bf16.msra.mxu1 %v4755_v36 }
  0x2e   : > { %4658 = vmatprep.subr.bf16.mxu1 %v4756_v37 }
  0x31   : > { %4659 = vmatpush3.bf16.msra.mxu1 %v4756_v37 }
  0x33   : > { %4553 = vmatmul.mubr.msk.bf16.gmra.mrb[16].mxu0 %vm641_vm2, %v4726_v10  ;;  %4625 = vmatmul.mubr.msk.bf16.gmra.mrb[16].mxu1 %vm641_vm2, %v4739_v13  ;;  %v5039_v10 = vshrl.u32 %v1719_v59, 7 }
  0x34   : > { %4556 = vmatprep.mubr.msk.bf16.mxu0 %vm4788_vm1, %v4787_v1  ;;  %4628 = vmatprep.mubr.msk.bf16.mxu1 %vm4788_vm1, %v4787_v1 }
  0x35   : > { %v2021_v32 = vsub.s32 2, %v5039_v10  ;;  %v2186_v36 = vsub.s32 3, %v5039_v10  ;;  %vm1837_vm8 = vcmp.lt.s32.totalorder %v5039_v10, 7  ;;  %vm1986_vm9 = vcmp.lt.s32.totalorder %v5039_v10, 6 }
  0x3b   : > { %4557 = vmatmul.mubr.msk.bf16.gmra.mrb[20].mxu0 %vm641_vm2, %v4727_v12  ;;  %4629 = vmatmul.mubr.msk.bf16.gmra.mrb[20].mxu1 %vm641_vm2, %v4741_v15 }
  0x3c   : > { %4560 = vmatprep.mubr.msk.bf16.mxu0 %vm4788_vm1, %v4787_v1  ;;  %4632 = vmatprep.mubr.msk.bf16.mxu1 %vm4788_vm1, %v4787_v1 }
  0x43   : > { %4561 = vmatmul.mubr.msk.bf16.gmra.mrb[24].mxu0 %vm641_vm2, %v4728_v14  ;;  %4633 = vmatmul.mubr.msk.bf16.gmra.mrb[24].mxu1 %vm641_vm2, %v4743_v17 }
  0x44   : > { %4564 = vmatprep.mubr.msk.bf16.mxu0 %vm4788_vm1, %v4787_v1  ;;  %4636 = vmatprep.mubr.msk.bf16.mxu1 %vm4788_vm1, %v4787_v1 }
  0x4b   : > { %4565 = vmatmul.mubr.msk.bf16.gmra.mrb[28].mxu0 %vm641_vm2, %v4729_v16  ;;  %4637 = vmatmul.mubr.msk.bf16.gmra.mrb[28].mxu1 %vm641_vm2, %v4745_v19  ;;  %v5042_v19 = vunpack.c.l.bf16 %v1619_v9 }
  0x4c   : > { %4568 = vmatprep.mubr.msk.bf16.mxu0 %vm4788_vm1, %v4787_v1  ;;  %4640 = vmatprep.mubr.msk.bf16.mxu1 %vm4788_vm1, %v4787_v1 }
  0x53   : > { %4569 = vmatmul.mubr.msk.bf16.gmra.mrb[32].mxu0 %vm641_vm2, %v4730_v18  ;;  %4641 = vmatmul.mubr.msk.bf16.gmra.mrb[32].mxu1 %vm641_vm2, %v4747_v21 }
  0x54   : > { %4572 = vmatprep.mubr.msk.bf16.mxu0 %vm4788_vm1, %v4787_v1 }
  0x5b   : > { %4573 = vmatmul.mubr.msk.bf16.gmra.mrb[36].mxu0 %vm641_vm2, %v4732_v20 }
  0x5c   : > { %4576 = vmatprep.mubr.msk.bf16.mxu0 %vm4788_vm1, %v4787_v1 }
  0x63   : > { %4577 = vmatmul.mubr.msk.bf16.gmra.mrb[40].mxu0 %vm641_vm2, %v4734_v22 }
  0x64   : > { %4580 = vmatprep.mubr.msk.bf16.mxu0 %vm4788_vm1, %v4787_v1 }
  0x6b   : > { %4581 = vmatmul.mubr.msk.bf16.gmra.mrb[44].mxu0 %vm641_vm2, %v4736_v23 }
  0x6c   : > { %4584 = vmatprep.mubr.msk.bf16.mxu0 %vm4788_vm1, %v4787_v1 }
  0x73   : > { %4585 = vmatmul.mubr.msk.bf16.gmra.mrb[48].mxu0 %vm641_vm2, %v4738_v24  ;;  %v1721_v24 = vsub.s32 0, %v5039_v10 }
  0x74   : > { %4588 = vmatprep.mubr.msk.bf16.mxu0 %vm4788_vm1, %v4787_v1 }
  0x7b   : > { %4589 = vmatmul.mubr.msk.bf16.gmra.mrb[52].mxu0 %vm641_vm2, %v4740_v25  ;;  %v1872_v25 = vsub.s32 1, %v5039_v10 }
  0x7c   : > { %4592 = vmatprep.mubr.msk.bf16.mxu0 %vm4788_vm1, %v4787_v1 }
  0x83   : > { %4593 = vmatmul.mubr.msk.bf16.gmra.mrb[56].mxu0 %vm641_vm2, %v4742_v26 }
  0x84   : > { %4596 = vmatprep.mubr.msk.bf16.mxu0 %vm4788_vm1, %v4787_v1 }
  0x8b   : > { %4597 = vmatmul.mubr.msk.bf16.gmra.mrb[60].mxu0 %vm641_vm2, %v4744_v27 }
  0x8c   : > { %4600 = vmatprep.mubr.msk.bf16.mxu0 %vm4788_vm1, %v4787_v1 }
  0x93   : > { %4601 = vmatmul.mubr.msk.bf16.gmra.mrb[64].mxu0 %vm641_vm2, %v4746_v28 }
  0x94   : > { %4604 = vmatprep.mubr.msk.bf16.mxu0 %vm4788_vm1, %v4787_v1 }
  0x9b   : > { %4605 = vmatmul.mubr.msk.bf16.gmra.mrb[68].mxu0 %vm641_vm2, %v4748_v29 }
  0xe6   : > { %v761_v39 = vpop.f32.mrb[0].mxu0  ;;  %v905_v55 = vpop.f32.mrb[0].mxu1 }
  0xe7   : > { %v983_v41 = vmul.f32 %v5016_v38, %v761_v39  ;;  %v4538_v42 = vpop.f32.mrb[1].mxu0  ;;  %v1019_v57 = vmul.f32 %v5016_v38, %v905_v55  ;;  %v4610_v58 = vpop.f32.mrb[1].mxu1 }
  0xe8   : > { %v764_v43 = vpop.f32.mrb[2].mxu0  ;;  %v908_v0 = vpop.f32.mrb[2].mxu1 }
  0xe9   : > { %v1044_v44 = vadd.f32 %v5021_v40, %v983_v41  ;;  %v984_v45 = vmul.f32 %v5016_v38, %v764_v43  ;;  %v4539_v46 = vpop.f32.mrb[3].mxu0  ;;  %v1080_v1 = vadd.f32 %v5021_v40, %v1019_v57  ;;  %v1020_v2 = vmul.f32 %v5016_v38, %v908_v0  ;;  %v4611_v3 = vpop.f32.mrb[3].mxu1 }
  0xea   : > { %v2482_v46 = vsub.s32 5, %v5039_v10  ;;  %v2647_v3 = vsub.s32 6, %v5039_v10 }
  0xeb   : > { %v1098_v47 = vmax.f32 %v1044_v44, 0.0  ;;  %v1045_v48 = vadd.f32 %v5021_v40, %v984_v45  ;;  %v1134_v7 = vmax.f32 %v1080_v1, 0.0  ;;  %v1081_v8 = vadd.f32 %v5021_v40, %v1020_v2 }
  0xec   : > { %v2334_v45 = vsub.s32 4, %v5039_v10  ;;  %v5094_v2 = vrot.slane %v5042_v19, %v2482_v46 }
  0xed   : > { %v1099_v49 = vmax.f32 %v1045_v48, 0.0  ;;  %v1152_v51 = vmin.f32 %v1098_v47, 6.0  ;;  %v1188_v13 = vmin.f32 %v1134_v7, 6.0  ;;  %v1135_v14 = vmax.f32 %v1081_v8, 0.0 }
  0xee   : > { %v769_v50 = vpop.f32.mrb[4].mxu0  ;;  %v913_v20 = vpop.f32.mrb[4].mxu1 }
  0xef   : > { %v1153_v52 = vmin.f32 %v1099_v49, 6.0  ;;  %v985_v53 = vmul.f32 %v5016_v38, %v769_v50  ;;  %v4542_v54 = vpop.f32.mrb[5].mxu0  ;;  %v1189_v23 = vmin.f32 %v1135_v14, 6.0  ;;  %v1021_v26 = vmul.f32 %v5016_v38, %v913_v20  ;;  %v4614_v27 = vpop.f32.mrb[5].mxu1 }
  0xf0   : > { %v772_v56 = vpop.f32.mrb[6].mxu0  ;;  %v916_v33 = vpop.f32.mrb[6].mxu1  ;;  %v5067_v50 = vrot.slane %v5042_v19, %v1721_v24  ;;  %v5076_v54 = vrot.slane %v5042_v19, %v2186_v36 }
  0xf1   : > { %v3892_v60 = vpack.c.bf16 %v1153_v52, %v1152_v51  ;;  %v1046_v61 = vadd.f32 %v5021_v40, %v985_v53  ;;  %v986_v62 = vmul.f32 %v5016_v38, %v772_v56  ;;  %v4543_v63 = vpop.f32.mrb[7].mxu0  ;;  %v3982_v35 = vpack.c.bf16 %v1189_v23, %v1188_v13  ;;  %v4615_v41 = vpop.f32.mrb[7].mxu1 }
  0xf2   : > { %v1082_v37 = vadd.f32 %v5021_v40, %v1021_v26  ;;  %v1022_v39 = vmul.f32 %v5016_v38, %v916_v33  ;;  %v5070_v51 = vrot.slane %v5042_v19, %v1872_v25  ;;  %v5073_v53 = vrot.slane %v5042_v19, %v2021_v32 }
  0xf3   : > { %3893 = vst [vmem:[#allocation2] sm:$0xff] %v3892_v60   ;;  %v1100_v4 = vmax.f32 %v1046_v61, 0.0  ;;  %v1047_v5 = vadd.f32 %v5021_v40, %v986_v62  ;;  %4389 = vst [vmem:[#allocation2 + $0x90] sm:$0xff] %v3982_v35   ;;  %v1620_v61 = vld [vmem:[%s6569_s5 + $0x4] sm:$0x1]  ;;  %v5085_v62 = vrot.slane %v5042_v19, %v2334_v45  ;;  %v2795_v13 = vsub.s32 7, %v5039_v10 }
  0xf4   : > { %1613 = vst [vmem:[#allocation2 + $0x4] sm:$0xf] %v4789_v6  ;;  %v1136_v47 = vmax.f32 %v1082_v37, 0.0  ;;  %v1083_v48 = vadd.f32 %v5021_v40, %v1022_v39  ;;  %v5111_v32 = vrot.slane %v5042_v19, %v2647_v3 }
  0xf5   : > { %v1101_v11 = vmax.f32 %v1047_v5, 0.0  ;;  %v1154_v15 = vmin.f32 %v1100_v4, 6.0  ;;  %v5118_v39 = vrot.slane %v5042_v19, %v2795_v13 }
  0xf6   : > { %v777_v12 = vpop.f32.mrb[8].mxu0  ;;  %v1190_v55 = vmin.f32 %v1136_v47, 6.0  ;;  %v1137_v56 = vmax.f32 %v1083_v48, 0.0  ;;  %v921_v63 = vpop.f32.mrb[8].mxu1 }
  0xf7   : > { %v1155_v16 = vmin.f32 %v1101_v11, 6.0  ;;  %v987_v17 = vmul.f32 %v5016_v38, %v777_v12  ;;  %v4546_v18 = vpop.f32.mrb[9].mxu0  ;;  %v1023_v5 = vmul.f32 %v5016_v38, %v921_v63  ;;  %v4618_v7 = vpop.f32.mrb[9].mxu1 }
  0xf8   : > { %v780_v22 = vpop.f32.mrb[10].mxu0  ;;  %v1191_v4 = vmin.f32 %v1137_v56, 6.0  ;;  %v924_v14 = vpop.f32.mrb[10].mxu1 }
  0xf9   : > { %v3897_v28 = vpack.c.bf16 %v1155_v16, %v1154_v15  ;;  %v1048_v29 = vadd.f32 %v5021_v40, %v987_v17  ;;  %v988_v30 = vmul.f32 %v5016_v38, %v780_v22  ;;  %v4547_v31 = vpop.f32.mrb[11].mxu0  ;;  %v1622_v17 = vunpack.c.l.bf16 %v1620_v61  ;;  %v4619_v23 = vpop.f32.mrb[11].mxu1 }
  0xfa   : > { %v1497_v34 = vld [vmem:[#allocation2] sm:$0x1]  ;;  %v3987_v18 = vpack.c.bf16 %v1191_v4, %v1190_v55  ;;  %v1084_v20 = vadd.f32 %v5021_v40, %v1023_v5  ;;  %v1024_v22 = vmul.f32 %v5016_v38, %v924_v14 }
  0xfb   : > { %v1498_v42 = vsel %vm5044_vm5, 0, %v1497_v34  ;;  %4372 = vst [vmem:[#allocation2 + $0x8] sm:$0xff] %v3897_v28   ;;  %v1102_v43 = vmax.f32 %v1048_v29, 0.0  ;;  %v1049_v44 = vadd.f32 %v5021_v40, %v988_v30  ;;  %v1533_v29 = vld [vmem:[#allocation2 + $0x90] sm:$0x1] }
  0xfc   : > { %1499 = vst [vmem:[#allocation2] sm:$0x1] %v1498_v42  ;;  %v1534_v30 = vsel %vm5044_vm5, 0, %v1533_v29  ;;  %4390 = vst [vmem:[#allocation2 + $0x98] sm:$0xff] %v3987_v18   ;;  %v1138_v33 = vmax.f32 %v1084_v20, 0.0  ;;  %v1085_v34 = vadd.f32 %v5021_v40, %v1024_v22 }
  0xfd   : > { %1612 = vst [vmem:[#allocation2] sm:$0xf] %v4789_v6  ;;  %v1103_v49 = vmax.f32 %v1049_v44, 0.0  ;;  %v1156_v57 = vmin.f32 %v1102_v43, 6.0  ;;  %1535 = vst [vmem:[#allocation2 + $0x90] sm:$0x1] %v1534_v30  ;;  %v5122_v43 = vrot.slane %v1622_v17, %v1721_v24 }
  0xfe   : > { %v785_v52 = vpop.f32.mrb[12].mxu0  ;;  %v1192_v44 = vmin.f32 %v1138_v33, 6.0  ;;  %v1139_v45 = vmax.f32 %v1085_v34, 0.0  ;;  %v929_v19 = vpop.f32.mrb[12].mxu1 }
  0xff   : > { %v1157_v58 = vmin.f32 %v1103_v49, 6.0  ;;  %v989_v59 = vmul.f32 %v5016_v38, %v785_v52  ;;  %v4550_v60 = vpop.f32.mrb[13].mxu0 }
 0x100   : > { %v788_v1 = vpop.f32.mrb[14].mxu0  ;;  %v1193_v3 = vmin.f32 %v1139_v45, 6.0 }
 0x101   : > { %v3902_v8 = vpack.c.bf16 %v1157_v58, %v1156_v57  ;;  %v1050_v9 = vadd.f32 %v5021_v40, %v989_v59  ;;  %v990_v11 = vmul.f32 %v5016_v38, %v788_v1  ;;  %v4551_v12 = vpop.f32.mrb[15].mxu0  ;;  %v4622_v59 = vpop.f32.mrb[13].mxu1 }
 0x102   : > { %v1500_v15 = vld [vmem:[#allocation2 + $0xc] sm:$0x1]  ;;  %v1554_v16 = vld [vmem:[#allocation2 + $0x8] sm:$0xf]  ;;  %v932_v4 = vpop.f32.mrb[14].mxu1 }
 0x103   : > { %v1501_v25 = vsel %vm5044_vm5, 0, %v1500_v15  ;;  %v1555_v26 = vsel %vm5089_vm10, 0, %v1554_v16  ;;  %4373 = vst [vmem:[#allocation2 + $0x10] sm:$0xff] %v3902_v8   ;;  %v1104_v27 = vmax.f32 %v1050_v9, 0.0  ;;  %v1051_v28 = vadd.f32 %v5021_v40, %v990_v11  ;;  %v4623_v12 = vpop.f32.mrb[15].mxu1 }
 0x104   : > { %1502 = vst [vmem:[#allocation2 + $0xc] sm:$0x1] %v1501_v25  ;;  %1556 = vst [vmem:[#allocation2 + $0x8] sm:$0xf] %v1555_v26  ;;  %v4025_v31 = vld [vmem:[#allocation2] sm:$0xff]   ;;  %v5139_v9 = vmul.f32 %v5016_v38, %v929_v19  ;;  %v5142_v11 = vmul.f32 %v5016_v38, %v932_v4  ;;  %v3992_v26 = vpack.c.bf16 %v1193_v3, %v1192_v44 }
 0x105   : > { %1614 = vst [vmem:[#allocation2 + $0x8] sm:$0xf] %v4789_v6  ;;  %v1105_v35 = vmax.f32 %v1051_v28, 0.0  ;;  %v4026_v36 = vunpack.c.l.bf16 %v4025_v31  ;;  %v5115_v37 = vunpack.c.h.bf16 %v4025_v31  ;;  %v1158_v41 = vmin.f32 %v1104_v27, 6.0  ;;  %v1536_v18 = vld [vmem:[#allocation2 + $0x9c] sm:$0x1] }
 0x106   : > { %v793_v42 = vpop.f32.mrb[16].mxu0  ;;  %v1537_v25 = vsel %vm5044_vm5, 0, %v1536_v18  ;;  %v1590_v31 = vld [vmem:[#allocation2 + $0x98] sm:$0xf]  ;;  %4391 = vst [vmem:[#allocation2 + $0xa0] sm:$0xff] %v3992_v26  }
 0x107   : > { %v1159_v46 = vmin.f32 %v1105_v35, 6.0  ;;  %v991_v47 = vmul.f32 %v5016_v38, %v793_v42  ;;  %v4554_v48 = vpop.f32.mrb[17].mxu0  ;;  %v1723_v49 = vmul.f32 %v4026_v36, %v5067_v50  ;;  %v5128_v52 = vmul.f32 %v5115_v37, %v5067_v50  ;;  %1538 = vst [vmem:[#allocation2 + $0x9c] sm:$0x1] %v1537_v25 }
 0x108   : > { %v796_v55 = vpop.f32.mrb[18].mxu0  ;;  %v1787_v56 = vrot.slane %v4026_v36, 1  ;;  %v1803_v57 = vrot.slane %v5115_v37, 1  ;;  %v1938_v58 = vrot.slane %v4026_v36, 2  ;;  %v1954_v24 = vrot.slane %v5115_v37, 2 }
 0x109   : > { %v3907_v60 = vpack.c.bf16 %v1159_v46, %v1158_v41  ;;  %v1052_v61 = vadd.f32 %v5021_v40, %v991_v47  ;;  %v992_v63 = vmul.f32 %v5016_v38, %v796_v55  ;;  %v4555_v1 = vpop.f32.mrb[19].mxu0  ;;  %v937_v47 = vpop.f32.mrb[16].mxu1 }
 0x10a   : > { %v1557_v5 = vld [vmem:[#allocation2 + $0x14] sm:$0xf]  ;;  %v1854_v7 = vsel %vm1837_vm8, %v1787_v56, %v1803_v57  ;;  %v2003_v8 = vsel %vm1986_vm9, %v1938_v58, %v1954_v24  ;;  %v4626_v58 = vpop.f32.mrb[17].mxu1 }
 0x10b   : > { %v1558_v13 = vsel %vm5089_vm10, 0, %v1557_v5  ;;  %4374 = vst [vmem:[#allocation2 + $0x18] sm:$0xff] %v3907_v60   ;;  %v1106_v14 = vmax.f32 %v1052_v61, 0.0  ;;  %v1053_v15 = vadd.f32 %v5021_v40, %v992_v63  ;;  %v1874_v16 = vmul.f32 %v5070_v51, %v1854_v7  ;;  %v2088_v17 = vld [vmem:[#allocation2 + $0xc] sm:$0xf]  ;;  %v5171_v3 = vpop.f32.mrb[18].mxu1 }
 0x10c   : > { %1559 = vst [vmem:[#allocation2 + $0x14] sm:$0xf] %v1558_v13  ;;  %v4398_v20 = vld [vmem:[#allocation2 + $0x8] sm:$0xff]   ;;  %v2023_v22 = vmul.f32 %v5073_v53, %v2003_v8  ;;  %v5149_v23 = vunpack.c.l.bf16 %v2088_v17  ;;  %v4627_v13 = vpop.f32.mrb[19].mxu1 }
 0x10d   : > { %v1160_v27 = vmin.f32 %v1106_v14, 6.0  ;;  %v1107_v28 = vmax.f32 %v1053_v15, 0.0  ;;  %v4030_v29 = vunpack.c.l.bf16 %v4398_v20  ;;  %v5153_v30 = vunpack.c.h.bf16 %v4398_v20 }
 0x10e   : > { %v801_v33 = vpop.f32.mrb[20].mxu0  ;;  %v1906_v34 = vadd.f32 %v1874_v16, %v1723_v49  ;;  %v2188_v35 = vmul.f32 %v5076_v54, %v5149_v23  ;;  %v2252_v36 = vrot.slane %v5149_v23, 1  ;;  %v2400_v37 = vrot.slane %v5149_v23, 2 }
 0x10f   : > { %v1161_v41 = vmin.f32 %v1107_v28, 6.0  ;;  %v993_v42 = vmul.f32 %v5016_v38, %v801_v33  ;;  %v4558_v44 = vpop.f32.mrb[21].mxu0  ;;  %v1788_v45 = vrot.slane %v5153_v30, 1  ;;  %v1819_v46 = vrot.slane %v4030_v29, 1 }
 0x110   : > { %v804_v48 = vpop.f32.mrb[22].mxu0  ;;  %v1970_v19 = vrot.slane %v4030_v29, 2  ;;  %v2055_v55 = vadd.f32 %v2023_v22, %v1906_v34  ;;  %v1591_v49 = vsel %vm5089_vm10, 0, %v1590_v31  ;;  %v5165_v56 = vmul.f32 %v5153_v30, %v5067_v50 }
 0x111   : > { %v3912_v59 = vpack.c.bf16 %v1161_v41, %v1160_v27  ;;  %v1054_v60 = vadd.f32 %v5021_v40, %v993_v42  ;;  %v994_v61 = vmul.f32 %v5016_v38, %v804_v48  ;;  %v4559_v63 = vpop.f32.mrb[23].mxu0  ;;  %v1838_v1 = vsel %vm1837_vm8, %v1803_v57, %v1819_v46  ;;  %1592 = vst [vmem:[#allocation2 + $0x98] sm:$0xf] %v1591_v49  ;;  %v1593_v27 = vld [vmem:[#allocation2 + $0xa4] sm:$0xf]  ;;  %v5199_v48 = vpop.f32.mrb[20].mxu1 }
 0x112   : > { %v1503_v4 = vld [vmem:[#allocation2 + $0x18] sm:$0x1]  ;;  %v1875_v5 = vmul.f32 %v5070_v51, %v1838_v1  ;;  %v1987_v7 = vsel %vm1986_vm9, %v1954_v24, %v1970_v19  ;;  %v2220_v8 = vadd.f32 %v2188_v35, %v2055_v55  ;;  %v1939_v12 = vrot.slane %v5153_v30, 2  ;;  %v4630_v58 = vpop.f32.mrb[21].mxu1 }
 0x113   : > { %v4399_v14 = vld [vmem:[#allocation2 + $0x10] sm:$0xff]   ;;  %v1504_v15 = vsel %vm5044_vm5, 0, %v1503_v4  ;;  %4375 = vst [vmem:[#allocation2 + $0x20] sm:$0xff] %v3912_v59   ;;  %v1108_v16 = vmax.f32 %v1054_v60, 0.0  ;;  %v1055_v57 = vadd.f32 %v5021_v40, %v994_v61  ;;  %v2024_v17 = vmul.f32 %v5073_v53, %v1987_v7  ;;  %v5214_v4 = vpop.f32.mrb[22].mxu1 }
 0x114   : > { %v4034_v18 = vunpack.c.l.bf16 %v4399_v14  ;;  %v4035_v20 = vunpack.c.h.bf16 %v4399_v14  ;;  %1505 = vst [vmem:[#allocation2 + $0x18] sm:$0x1] %v1504_v15  ;;  %v1907_v22 = vadd.f32 %v1875_v5, %v5128_v52  ;;  %v5184_v24 = vadd.f32 %v5021_v40, %v5139_v9 }
 0x115   : > { %v1162_v25 = vmin.f32 %v1108_v16, 6.0  ;;  %v1109_v26 = vmax.f32 %v1055_v57, 0.0  ;;  %v5188_v28 = vadd.f32 %v5021_v40, %v5142_v11  ;;  %v5191_v29 = vmul.f32 %v5016_v38, %v937_v47  ;;  %v4631_v16 = vpop.f32.mrb[23].mxu1 }
 0x116   : > { %v809_v31 = vpop.f32.mrb[24].mxu0  ;;  %v2056_v33 = vadd.f32 %v2024_v17, %v1907_v22  ;;  %v2189_v34 = vmul.f32 %v4034_v18, %v5076_v54  ;;  %v5194_v35 = vrot.slane %v4034_v18, 1  ;;  %v2284_v52 = vrot.slane %v4035_v20, 1 }
 0x117   : > { %v1163_v41 = vmin.f32 %v1109_v26, 6.0  ;;  %v995_v9 = vmul.f32 %v5016_v38, %v809_v31  ;;  %v4562_v42 = vpop.f32.mrb[25].mxu0  ;;  %v5197_v44 = vrot.slane %v4034_v18, 2  ;;  %v2432_v46 = vrot.slane %v4035_v20, 2 }
 0x118   : > { %v812_v11 = vpop.f32.mrb[26].mxu0  ;;  %v2221_v19 = vadd.f32 %v2189_v34, %v2056_v33  ;;  %v5204_v47 = vsel %vm1837_vm8, %v5194_v35, %v2284_v52  ;;  %v2316_v55 = vsel %vm1837_vm8, %v2252_v36, %v5194_v35  ;;  %v1594_v49 = vsel %vm5089_vm10, 0, %v1593_v27 }
 0x119   : > { %v3917_v59 = vpack.c.bf16 %v1163_v41, %v1162_v25  ;;  %v1056_v60 = vadd.f32 %v5021_v40, %v995_v9  ;;  %v996_v61 = vmul.f32 %v5016_v38, %v812_v11  ;;  %v4563_v63 = vpop.f32.mrb[27].mxu0  ;;  %v2336_v1 = vmul.f32 %v5085_v62, %v2316_v55  ;;  %1595 = vst [vmem:[#allocation2 + $0xa4] sm:$0xf] %v1594_v49  ;;  %v5248_v55 = vpop.f32.mrb[24].mxu1 }
 0x11a   : > { %v1506_v5 = vld [vmem:[#allocation2 + $0x24] sm:$0x1]  ;;  %v1560_v7 = vld [vmem:[#allocation2 + $0x20] sm:$0xf]  ;;  %v2337_v36 = vmul.f32 %v5085_v62, %v5204_v47  ;;  %v5221_v13 = vsel %vm1986_vm9, %v5197_v44, %v2432_v46  ;;  %v2464_v14 = vsel %vm1986_vm9, %v2400_v37, %v5197_v44  ;;  %v5229_v15 = vmul.f32 %v4034_v18, %v5067_v50  ;;  %v4634_v63 = vpop.f32.mrb[25].mxu1 }
 0x11b   : > { %v1507_v57 = vsel %vm5044_vm5, 0, %v1506_v5  ;;  %v1561_v17 = vsel %vm5089_vm10, 0, %v1560_v7  ;;  %4376 = vst [vmem:[#allocation2 + $0x28] sm:$0xff] %v3917_v59   ;;  %v1110_v20 = vmax.f32 %v1056_v60, 0.0  ;;  %v1057_v22 = vadd.f32 %v5021_v40, %v996_v61  ;;  %v4213_v25 = vld [vmem:[#allocation2 + $0x18] sm:$0xff]   ;;  %v5256_v16 = vpop.f32.mrb[26].mxu1 }
 0x11c   : > { %1508 = vst [vmem:[#allocation2 + $0x24] sm:$0x1] %v1507_v57  ;;  %1562 = vst [vmem:[#allocation2 + $0x20] sm:$0xf] %v1561_v17  ;;  %v2368_v23 = vadd.f32 %v2336_v1, %v2220_v8  ;;  %v2369_v26 = vadd.f32 %v2337_v36, %v2221_v19  ;;  %v2484_v37 = vmul.f32 %v5094_v2, %v2464_v14  ;;  %v5239_v33 = vunpack.c.l.bf16 %v4213_v25 }
 0x11d   : > { %v2485_v18 = vmul.f32 %v5094_v2, %v5221_v13  ;;  %v1164_v27 = vmin.f32 %v1110_v20, 6.0  ;;  %v1111_v31 = vmax.f32 %v1057_v22, 0.0  ;;  %v5241_v34 = vunpack.c.h.bf16 %v4213_v25  ;;  %v4635_v25 = vpop.f32.mrb[27].mxu1 }
 0x11e   : > { %v817_v52 = vpop.f32.mrb[28].mxu0  ;;  %v2516_v41 = vadd.f32 %v2484_v37, %v2368_v23  ;;  %v2649_v8 = vmul.f32 %v5239_v33, %v5111_v32  ;;  %v2713_v58 = vrot.slane %v5239_v33, 1  ;;  %v2861_v60 = vrot.slane %v5239_v33, 2 }
 0x11f   : > { %v2517_v9 = vadd.f32 %v2485_v18, %v2369_v26  ;;  %v1165_v42 = vmin.f32 %v1111_v31, 6.0  ;;  %v997_v46 = vmul.f32 %v5016_v38, %v817_v52  ;;  %v4566_v11 = vpop.f32.mrb[29].mxu0  ;;  %v2650_v19 = vmul.f32 %v5241_v34, %v5111_v32 }
 0x120   : > { %v820_v49 = vpop.f32.mrb[30].mxu0  ;;  %v2729_v59 = vrot.slane %v5241_v34, 1  ;;  %v2877_v61 = vrot.slane %v5241_v34, 2  ;;  %v2681_v14 = vadd.f32 %v2649_v8, %v2516_v41  ;;  %v1877_v63 = vmul.f32 %v5204_v47, %v5070_v51 }
 0x121   : > { %v3922_v1 = vpack.c.bf16 %v1165_v42, %v1164_v27  ;;  %v1058_v5 = vadd.f32 %v5021_v40, %v997_v46  ;;  %v998_v7 = vmul.f32 %v5016_v38, %v820_v49  ;;  %v4567_v36 = vpop.f32.mrb[31].mxu0  ;;  %v2682_v17 = vadd.f32 %v2650_v19, %v2517_v9 }
 0x122   : > { %v1563_v57 = vld [vmem:[#allocation2 + $0x2c] sm:$0xf]  ;;  %v5260_v20 = vsel %vm1837_vm8, %v2713_v58, %v2729_v59  ;;  %v5264_v22 = vsel %vm1986_vm9, %v2861_v60, %v2877_v61  ;;  %v1855_v9 = vsel %vm1837_vm8, %v1788_v45, %v5194_v35  ;;  %v5288_v45 = vld [vmem:[%s6570_s6] ss:$0 sm:$0xff]  ;;  %v2190_v30 = vmul.f32 %v5239_v33, %v5076_v54 }
 0x123   : > { %v1564_v23 = vsel %vm5089_vm10, 0, %v1563_v57  ;;  %4377 = vst [vmem:[#allocation2 + $0x30] sm:$0xff] %v3922_v1   ;;  %v1112_v26 = vmax.f32 %v1058_v5, 0.0  ;;  %v1059_v37 = vadd.f32 %v5021_v40, %v998_v7  ;;  %v4444_v18 = vld [vmem:[#allocation2 + $0x20] sm:$0xff]   ;;  %v2797_v27 = vmul.f32 %v5118_v39, %v5260_v20 }
 0x124   : > { %1565 = vst [vmem:[#allocation2 + $0x2c] sm:$0xf] %v1564_v23  ;;  %v4218_v31 = vunpack.c.l.bf16 %v4444_v18  ;;  %v5271_v52 = vunpack.c.h.bf16 %v4444_v18  ;;  %v2945_v41 = vmul.f32 %v5122_v43, %v5264_v22  ;;  %v1876_v8 = vmul.f32 %v5070_v51, %v1855_v9 }
 0x125   : > { %v1166_v42 = vmin.f32 %v1112_v26, 6.0  ;;  %v1113_v46 = vmax.f32 %v1059_v37, 0.0  ;;  %v2829_v11 = vadd.f32 %v2797_v27, %v2681_v14  ;;  %v5291_v14 = vpop.f32.mrb[28].mxu1  ;;  %v1909_v23 = vadd.f32 %v1877_v63, %v5229_v15 }
 0x126   : > { %v825_v19 = vpop.f32.mrb[32].mxu0  ;;  %v2714_v49 = vrot.slane %v5271_v52, 1  ;;  %v2745_v58 = vrot.slane %v4218_v31, 1  ;;  %v2893_v60 = vrot.slane %v4218_v31, 2  ;;  %v1908_v35 = vadd.f32 %v1876_v8, %v5165_v56  ;;  %v4638_v26 = vpop.f32.mrb[29].mxu1 }
 0x127   : > { %v1167_v1 = vmin.f32 %v1113_v46, 6.0  ;;  %v999_v5 = vmul.f32 %v5016_v38, %v825_v19  ;;  %v4570_v7 = vpop.f32.mrb[33].mxu0  ;;  %v2977_v36 = vadd.f32 %v2945_v41, %v2829_v11  ;;  %v5311_v41 = vpop.f32.mrb[30].mxu1  ;;  %v2338_v26 = vmul.f32 %v5260_v20, %v5085_v62 }
 0x128   : > { %v828_v57 = vpop.f32.mrb[34].mxu0  ;;  %v5295_v25 = vsel %vm1837_vm8, %v2729_v59, %v2745_v58  ;;  %v5299_v47 = vsel %vm1986_vm9, %v2877_v61, %v2893_v60  ;;  %v5309_v59 = vld [vmem:[%s6571_s7] ss:$0 sm:$0xff]  ;;  %v4639_v46 = vpop.f32.mrb[31].mxu1 }
 0x129   : > { %v3927_v37 = vpack.c.bf16 %v1167_v1, %v1166_v42  ;;  %v1060_v18 = vadd.f32 %v5021_v40, %v999_v5  ;;  %v1000_v27 = vmul.f32 %v5016_v38, %v828_v57  ;;  %v4571_v56 = vpop.f32.mrb[35].mxu0  ;;  %v2798_v31 = vmul.f32 %v5118_v39, %v5295_v25 }
 0x12a   : > { %v1509_v61 = vld [vmem:[#allocation2 + $0x30] sm:$0x1]  ;;  %v2946_v15 = vmul.f32 %v5122_v43, %v5299_v47  ;;  %v3016_v9 = vmul.f32 %v5288_v45, %v2977_v36  ;;  %v2004_v42 = vsel %vm1986_vm9, %v1939_v12, %v5197_v44  ;;  %v2026_v44 = vmul.f32 %v5221_v13, %v5073_v53 }
 0x12b   : > { %v1510_v11 = vsel %vm5044_vm5, 0, %v1509_v61  ;;  %4378 = vst [vmem:[#allocation2 + $0x38] sm:$0xff] %v3927_v37   ;;  %v1114_v8 = vmax.f32 %v1060_v18, 0.0  ;;  %v1061_v19 = vadd.f32 %v5021_v40, %v1000_v27  ;;  %v2830_v58 = vadd.f32 %v2798_v31, %v2682_v17  ;;  %v4445_v61 = vld [vmem:[#allocation2 + $0x28] sm:$0xff]  }
 0x12c   : > { %1511 = vst [vmem:[#allocation2 + $0x30] sm:$0x1] %v1510_v11  ;;  %v3055_v60 = vadd.f32 %v5309_v59, %v3016_v9  ;;  %v2025_v63 = vmul.f32 %v5073_v53, %v2004_v42  ;;  %v2191_v17 = vmul.f32 %v5241_v34, %v5076_v54  ;;  %v2058_v31 = vadd.f32 %v2026_v44, %v1909_v23 }
 0x12d   : > { %v1168_v1 = vmin.f32 %v1114_v8, 6.0  ;;  %v1115_v5 = vmax.f32 %v1061_v19, 0.0  ;;  %v2978_v12 = vadd.f32 %v2946_v15, %v2830_v58  ;;  %v5336_v15 = vpop.f32.mrb[32].mxu1  ;;  %v2486_v46 = vmul.f32 %v5264_v22, %v5094_v2 }
 0x12e   : > { %v833_v7 = vpop.f32.mrb[36].mxu0  ;;  %v3087_v36 = vmax.f32 %v3055_v60, 0.0  ;;  %v2057_v57 = vadd.f32 %v2025_v63, %v1908_v35  ;;  %v2339_v35 = vmul.f32 %v5295_v25, %v5085_v62  ;;  %v4642_v11 = vpop.f32.mrb[33].mxu1 }
 0x12f   : > { %v1169_v37 = vmin.f32 %v1115_v5, 6.0  ;;  %v1001_v18 = vmul.f32 %v5016_v38, %v833_v7  ;;  %v4574_v27 = vpop.f32.mrb[37].mxu0  ;;  %v3017_v56 = vmul.f32 %v5288_v45, %v2978_v12  ;;  %v5345_v63 = vpop.f32.mrb[34].mxu1  ;;  %v2487_v7 = vmul.f32 %v5299_v47, %v5094_v2 }
 0x130   : > { %v836_v13 = vpop.f32.mrb[38].mxu0  ;;  %v3119_v9 = vmin.f32 %v3087_v36, 6.0  ;;  %v2222_v42 = vadd.f32 %v2190_v30, %v2057_v57  ;;  %v2223_v30 = vadd.f32 %v2191_v17, %v2058_v31  ;;  %v5349_v36 = vunpack.c.l.bf16 %v4445_v61  ;;  %v4643_v57 = vpop.f32.mrb[35].mxu1 }
 0x131   : > { %v3932_v8 = vpack.c.bf16 %v1169_v37, %v1168_v1  ;;  %v1062_v19 = vadd.f32 %v5021_v40, %v1001_v18  ;;  %v1002_v58 = vmul.f32 %v5016_v38, %v836_v13  ;;  %v4575_v60 = vpop.f32.mrb[39].mxu0  ;;  %v3056_v23 = vadd.f32 %v5309_v59, %v3017_v56 }
 0x132   : > { %v1512_v5 = vld [vmem:[#allocation2 + $0x3c] sm:$0x1]  ;;  %v1566_v12 = vld [vmem:[#allocation2 + $0x38] sm:$0xf]  ;;  %v2370_v44 = vadd.f32 %v2338_v26, %v2222_v42  ;;  %v2371_v26 = vadd.f32 %v2339_v35, %v2223_v30  ;;  %v4223_v31 = vunpack.c.h.bf16 %v4445_v61  ;;  %v2651_v11 = vmul.f32 %v5271_v52, %v5111_v32 }
 0x133   : > { %v1513_v1 = vsel %vm5044_vm5, 0, %v1512_v5  ;;  %v1567_v37 = vsel %vm5089_vm10, 0, %v1566_v12  ;;  %4379 = vst [vmem:[#allocation2 + $0x40] sm:$0xff] %v3932_v8   ;;  %v1116_v18 = vmax.f32 %v1062_v19, 0.0  ;;  %v1063_v27 = vadd.f32 %v5021_v40, %v1002_v58 }
 0x134   : > { %1514 = vst [vmem:[#allocation2 + $0x3c] sm:$0x1] %v1513_v1  ;;  %1568 = vst [vmem:[#allocation2 + $0x38] sm:$0xf] %v1567_v37  ;;  %v3088_v17 = vmax.f32 %v3056_v23, 0.0  ;;  %v2518_v56 = vadd.f32 %v2486_v46, %v2370_v44  ;;  %v2652_v60 = vmul.f32 %v5349_v36, %v5111_v32  ;;  %v2519_v8 = vadd.f32 %v2487_v7, %v2371_v26 }
 0x135   : > { %v1170_v13 = vmin.f32 %v1116_v18, 6.0  ;;  %v1117_v42 = vmax.f32 %v1063_v27, 0.0  ;;  %v2730_v19 = vrot.slane %v5349_v36, 1  ;;  %v2746_v58 = vrot.slane %v4223_v31, 1 }
 0x136   : > { %v841_v5 = vpop.f32.mrb[40].mxu0  ;;  %v3120_v12 = vmin.f32 %v3088_v17, 6.0  ;;  %v2683_v46 = vadd.f32 %v2651_v11, %v2518_v56  ;;  %v2862_v61 = vrot.slane %v5271_v52, 2  ;;  %v2684_v1 = vadd.f32 %v2652_v60, %v2519_v8 }
 0x137   : > { %v1171_v57 = vmin.f32 %v1117_v42, 6.0  ;;  %v1003_v23 = vmul.f32 %v5016_v38, %v841_v5  ;;  %v4578_v35 = vpop.f32.mrb[41].mxu0  ;;  %v5365_v37 = vsel %vm1837_vm8, %v2730_v19, %v2746_v58  ;;  %v5371_v7 = vsel %vm1837_vm8, %v2714_v49, %v2730_v19 }
 0x138   : > { %v844_v30 = vpop.f32.mrb[42].mxu0  ;;  %v3151_v44 = vpack.c.bf16 %v3120_v12, %v3119_v9  ;;  %v2799_v9 = vmul.f32 %v5118_v39, %v5371_v7  ;;  %v2800_v42 = vmul.f32 %v5118_v39, %v5365_v37  ;;  %v2878_v11 = vrot.slane %v5349_v36, 2 }
 0x139   : > { %v3937_v18 = vpack.c.bf16 %v1171_v57, %v1170_v13  ;;  %v1064_v27 = vadd.f32 %v5021_v40, %v1003_v23  ;;  %v1004_v17 = vmul.f32 %v5016_v38, %v844_v30  ;;  %v4579_v26 = vpop.f32.mrb[43].mxu0  ;;  %v2894_v60 = vrot.slane %v4223_v31, 2 }
 0x13a   : > { %v1569_v56 = vld [vmem:[#allocation2 + $0x44] sm:$0xf]  ;;  %4660 = vmatprep.mubr.bf16.mxu1 %v3151_v44  ;;  %v1140_v49 = vmax.f32 %v5184_v24, 0.0  ;;  %v2831_v8 = vadd.f32 %v2799_v9, %v2683_v46  ;;  %v2832_v19 = vadd.f32 %v2800_v42, %v2684_v1  ;;  %v5390_v57 = vsel %vm1986_vm9, %v2862_v61, %v2878_v11 }
 0x13b   : > { %v1570_v13 = vsel %vm5089_vm10, 0, %v1569_v56  ;;  %4380 = vst [vmem:[#allocation2 + $0x48] sm:$0xff] %v3937_v18   ;;  %v1118_v5 = vmax.f32 %v1064_v27, 0.0  ;;  %v1065_v12 = vadd.f32 %v5021_v40, %v1004_v17  ;;  %v5386_v58 = vsel %vm1986_vm9, %v2878_v11, %v2894_v60 }
 0x13c   : > { %1571 = vst [vmem:[#allocation2 + $0x44] sm:$0xf] %v1570_v13  ;;  %v1194_v31 = vmin.f32 %v1140_v49, 6.0  ;;  %v2947_v35 = vmul.f32 %v5122_v43, %v5390_v57  ;;  %v2948_v30 = vmul.f32 %v5122_v43, %v5386_v58  ;;  %v1141_v44 = vmax.f32 %v5188_v28, 0.0 }
 0x13d   : > { %v1172_v24 = vmin.f32 %v1118_v5, 6.0  ;;  %v1119_v23 = vmax.f32 %v1065_v12, 0.0  ;;  %v1088_v1 = vadd.f32 %v5021_v40, %v5191_v29  ;;  %v1028_v18 = vmul.f32 %v5016_v38, %v5171_v3 }
 0x13e   : > { %v849_v46 = vpop.f32.mrb[44].mxu0  ;;  %v1029_v61 = vmul.f32 %v5016_v38, %v5199_v48  ;;  %v2979_v9 = vadd.f32 %v2947_v35, %v2831_v8  ;;  %v2980_v56 = vadd.f32 %v2948_v30, %v2832_v19  ;;  %v1195_v11 = vmin.f32 %v1141_v44, 6.0 }
 0x13f   : > { %v1173_v27 = vmin.f32 %v1119_v23, 6.0  ;;  %v1005_v17 = vmul.f32 %v5016_v38, %v849_v46  ;;  %v4582_v26 = vpop.f32.mrb[45].mxu0  ;;  %v1142_v60 = vmax.f32 %v1088_v1, 0.0  ;;  %v1089_v28 = vadd.f32 %v5021_v40, %v1028_v18 }
 0x140   : > { %v852_v42 = vpop.f32.mrb[46].mxu0  ;;  %v1090_v49 = vadd.f32 %v5021_v40, %v1029_v61  ;;  %v3018_v48 = vmul.f32 %v5288_v45, %v2979_v9  ;;  %v3019_v23 = vmul.f32 %v5288_v45, %v2980_v56  ;;  %v3997_v8 = vpack.c.bf16 %v1195_v11, %v1194_v31 }
 0x141   : > { %v3942_v29 = vpack.c.bf16 %v1173_v27, %v1172_v24  ;;  %v1066_v13 = vadd.f32 %v5021_v40, %v1005_v17  ;;  %v1006_v3 = vmul.f32 %v5016_v38, %v852_v42  ;;  %v4583_v5 = vpop.f32.mrb[47].mxu0  ;;  %v1196_v19 = vmin.f32 %v1142_v60, 6.0 }
 0x142   : > { %v1515_v12 = vld [vmem:[#allocation2 + $0x48] sm:$0x1]  ;;  %v1143_v35 = vmax.f32 %v1089_v28, 0.0  ;;  %v3057_v44 = vadd.f32 %v5309_v59, %v3018_v48  ;;  %v3058_v1 = vadd.f32 %v5309_v59, %v3019_v23  ;;  %4392 = vst [vmem:[#allocation2 + $0xa8] sm:$0xff] %v3997_v8   ;;  %v1144_v61 = vmax.f32 %v1090_v49, 0.0 }
 0x143   : > { %v1516_v30 = vsel %vm5044_vm5, 0, %v1515_v12  ;;  %4381 = vst [vmem:[#allocation2 + $0x50] sm:$0xff] %v3942_v29   ;;  %v1120_v46 = vmax.f32 %v1066_v13, 0.0  ;;  %v1067_v24 = vadd.f32 %v5021_v40, %v1006_v3  ;;  %v1030_v31 = vmul.f32 %v5016_v38, %v5214_v4 }
 0x144   : > { %1517 = vst [vmem:[#allocation2 + $0x48] sm:$0x1] %v1516_v30  ;;  %v1197_v18 = vmin.f32 %v1143_v35, 6.0  ;;  %v3089_v26 = vmax.f32 %v3057_v44, 0.0  ;;  %v1727_v9 = vmul.f32 %v5239_v33, %v5067_v50  ;;  %v3090_v56 = vmax.f32 %v3058_v1, 0.0 }
 0x145   : > { %v1174_v27 = vmin.f32 %v1120_v46, 6.0  ;;  %v1121_v17 = vmax.f32 %v1067_v24, 0.0  ;;  %v1198_v60 = vmin.f32 %v1144_v61, 6.0  ;;  %v1091_v28 = vadd.f32 %v5021_v40, %v1030_v31  ;;  %v5430_v40 = vld [vmem:[%s6568_s4] ss:$0 sm:$0xff] }
 0x146   : > { %v857_v42 = vpop.f32.mrb[48].mxu0  ;;  %v4002_v11 = vpack.c.bf16 %v1197_v18, %v1196_v19  ;;  %v3121_v13 = vmin.f32 %v3089_v26, 6.0  ;;  %v1728_v4 = vmul.f32 %v5241_v34, %v5067_v50  ;;  %v3122_v5 = vmin.f32 %v3090_v56, 6.0  ;;  %v5436_v34 = vld [vmem:[%s6567_s3] ss:$0 sm:$0xff] }
 0x147   : > { %v1175_v29 = vmin.f32 %v1121_v17, 6.0  ;;  %v1007_v3 = vmul.f32 %v5016_v38, %v857_v42  ;;  %v4586_v49 = vpop.f32.mrb[49].mxu0  ;;  %v1145_v12 = vmax.f32 %v1091_v28, 0.0  ;;  %v1878_v33 = vmul.f32 %v5260_v20, %v5070_v51 }
 0x148   : > { %v860_v48 = vpop.f32.mrb[50].mxu0  ;;  %4393 = vst [vmem:[#allocation2 + $0xb0] sm:$0xff] %v4002_v11   ;;  %v1879_v23 = vmul.f32 %v5295_v25, %v5070_v51  ;;  %v2027_v20 = vmul.f32 %v5264_v22, %v5073_v53  ;;  %v3152_v46 = vpack.c.bf16 %v3122_v5, %v3121_v13  ;;  %v2192_v28 = vmul.f32 %v5271_v52, %v5076_v54  ;;  %v4446_v13 = vld [vmem:[#allocation2 + $0x30] sm:$0xff]   ;;  %v5460_v5 = vld [vmem:[#allocation2 + $0x38] sm:$0xff]  }
 0x149   : > { %v3947_v8 = vpack.c.bf16 %v1175_v29, %v1174_v27  ;;  %v1068_v38 = vadd.f32 %v5430_v40, %v1007_v3  ;;  %v1008_v19 = vmul.f32 %v5436_v34, %v860_v48  ;;  %v4587_v35 = vpop.f32.mrb[51].mxu0  ;;  %v1199_v24 = vmin.f32 %v1145_v12, 6.0  ;;  %v1539_v31 = vld [vmem:[#allocation2 + $0xa8] sm:$0x1] }
 0x14a   : > { %v1518_v25 = vld [vmem:[#allocation2 + $0x54] sm:$0x1]  ;;  %v1572_v30 = vld [vmem:[#allocation2 + $0x50] sm:$0xf]  ;;  %v1910_v44 = vadd.f32 %v1878_v33, %v1727_v9  ;;  %v1911_v1 = vadd.f32 %v1879_v23, %v1728_v4  ;;  %4661 = vmatmul.mubr.bf16.vlgmr.msra.gmra.mrb[36].mxu1 %v3152_v46  ;;  %v1540_v22 = vsel %vm5044_vm5, 0, %v1539_v31  ;;  %v2028_v9 = vmul.f32 %v5299_v47, %v5073_v53 }
 0x14b   : > { %v1519_v18 = vsel %vm5044_vm5, 0, %v1518_v25  ;;  %v1573_v61 = vsel %vm5089_vm10, 0, %v1572_v30  ;;  %4382 = vst [vmem:[#allocation2 + $0x58] sm:$0xff] %v3947_v8   ;;  %v1122_v27 = vmax.f32 %v1068_v38, 0.0  ;;  %v1069_v17 = vadd.f32 %v5430_v40, %v1008_v19  ;;  %1541 = vst [vmem:[#allocation2 + $0xa8] sm:$0x1] %v1540_v22 }
 0x14c   : > { %1520 = vst [vmem:[#allocation2 + $0x54] sm:$0x1] %v1519_v18  ;;  %1574 = vst [vmem:[#allocation2 + $0x50] sm:$0xf] %v1573_v61  ;;  %v4007_v26 = vpack.c.bf16 %v1199_v24, %v1198_v60  ;;  %v2059_v56 = vadd.f32 %v2027_v20, %v1910_v44  ;;  %v2193_v29 = vmul.f32 %v5349_v36, %v5076_v54  ;;  %v5469_v46 = vunpack.c.l.bf16 %v4446_v13 }
 0x14d   : > { %v1176_v42 = vmin.f32 %v1122_v27, 6.0  ;;  %v1123_v11 = vmax.f32 %v1069_v17, 0.0  ;;  %v2060_v49 = vadd.f32 %v2028_v9, %v1911_v1  ;;  %v2340_v60 = vmul.f32 %v5371_v7, %v5085_v62 }
 0x14e   : > { %v865_v3 = vpop.f32.mrb[52].mxu0  ;;  %4394 = vst [vmem:[#allocation2 + $0xb8] sm:$0xff] %v4007_v26   ;;  %v2341_v47 = vmul.f32 %v5365_v37, %v5085_v62  ;;  %v2488_v4 = vmul.f32 %v5390_v57, %v5094_v2  ;;  %v2224_v38 = vadd.f32 %v2192_v28, %v2059_v56  ;;  %v2489_v19 = vmul.f32 %v5386_v58, %v5094_v2 }
 0x14f   : > { %v1177_v48 = vmin.f32 %v1123_v11, 6.0  ;;  %v1542_v12 = vld [vmem:[#allocation2 + $0xb4] sm:$0x1]  ;;  %v1596_v33 = vld [vmem:[#allocation2 + $0xb0] sm:$0xf]  ;;  %v1009_v23 = vmul.f32 %v5436_v34, %v865_v3  ;;  %v4590_v8 = vpop.f32.mrb[53].mxu0  ;;  %v2225_v30 = vadd.f32 %v2193_v29, %v2060_v49  ;;  %v5473_v17 = vunpack.c.h.bf16 %v4446_v13 }
 0x150   : > { %v1543_v35 = vsel %vm5044_vm5, 0, %v1542_v12  ;;  %v1597_v20 = vsel %vm5089_vm10, 0, %v1596_v33  ;;  %v868_v25 = vpop.f32.mrb[54].mxu0  ;;  %v2372_v61 = vadd.f32 %v2340_v60, %v2224_v38  ;;  %v4230_v22 = vunpack.c.l.bf16 %v5460_v5 }
 0x151   : > { %v3952_v24 = vpack.c.bf16 %v1177_v48, %v1176_v42  ;;  %1544 = vst [vmem:[#allocation2 + $0xb4] sm:$0x1] %v1543_v35  ;;  %1598 = vst [vmem:[#allocation2 + $0xb0] sm:$0xf] %v1597_v20  ;;  %v1070_v44 = vadd.f32 %v5430_v40, %v1009_v23  ;;  %v1010_v1 = vmul.f32 %v5436_v34, %v868_v25  ;;  %v4591_v18 = vpop.f32.mrb[55].mxu0  ;;  %v2715_v13 = vrot.slane %v5469_v46, 1 }
 0x152   : > { %v1575_v31 = vld [vmem:[#allocation2 + $0x5c] sm:$0xf]  ;;  %v2373_v27 = vadd.f32 %v2341_v47, %v2225_v30  ;;  %v2653_v26 = vmul.f32 %v5469_v46, %v5111_v32  ;;  %v2520_v11 = vadd.f32 %v2488_v4, %v2372_v61  ;;  %v2654_v29 = vmul.f32 %v5473_v17, %v5111_v32 }
 0x153   : > { %v1576_v9 = vsel %vm5089_vm10, 0, %v1575_v31  ;;  %4383 = vst [vmem:[#allocation2 + $0x60] sm:$0xff] %v3952_v24   ;;  %v1124_v56 = vmax.f32 %v1070_v44, 0.0  ;;  %v1071_v42 = vadd.f32 %v5430_v40, %v1010_v1  ;;  %v2731_v3 = vrot.slane %v5473_v17, 1 }
 0x154   : > { %1577 = vst [vmem:[#allocation2 + $0x5c] sm:$0xf] %v1576_v9  ;;  %v2521_v28 = vadd.f32 %v2489_v19, %v2373_v27  ;;  %v2685_v48 = vadd.f32 %v2653_v26, %v2520_v11  ;;  %v2747_v12 = vrot.slane %v4230_v22, 1  ;;  %v2863_v8 = vrot.slane %v5469_v46, 2 }
 0x155   : > { %v1178_v49 = vmin.f32 %v1124_v56, 6.0  ;;  %v1125_v60 = vmax.f32 %v1071_v42, 0.0  ;;  %v1599_v47 = vld [vmem:[#allocation2 + $0xbc] sm:$0xf]  ;;  %v5489_v4 = vsel %vm1837_vm8, %v2715_v13, %v2731_v3  ;;  %v2879_v25 = vrot.slane %v5473_v17, 2 }
 0x156   : > { %v1600_v33 = vsel %vm5089_vm10, 0, %v1599_v47  ;;  %v2686_v23 = vadd.f32 %v2654_v29, %v2521_v28  ;;  %v873_v38 = vpop.f32.mrb[56].mxu0  ;;  %v5494_v35 = vsel %vm1837_vm8, %v2731_v3, %v2747_v12  ;;  %v2801_v20 = vmul.f32 %v5118_v39, %v5489_v4 }
 0x157   : > { %v1179_v19 = vmin.f32 %v1125_v60, 6.0  ;;  %1601 = vst [vmem:[#allocation2 + $0xbc] sm:$0xf] %v1600_v33  ;;  %v4594_v30 = vpop.f32.mrb[57].mxu0  ;;  %v2802_v24 = vmul.f32 %v5118_v39, %v5494_v35  ;;  %v2895_v44 = vrot.slane %v4230_v22, 2  ;;  %v1011_v1 = vmul.f32 %v5436_v34, %v873_v38 }
 0x158   : > { %v876_v18 = vpop.f32.mrb[58].mxu0  ;;  %v1729_v61 = vmul.f32 %v5271_v52, %v5067_v50  ;;  %v2833_v27 = vadd.f32 %v2801_v20, %v2685_v48  ;;  %v5506_v26 = vsel %vm1986_vm9, %v2863_v8, %v2879_v25  ;;  %v1880_v48 = vmul.f32 %v5371_v7, %v5070_v51 }
 0x159   : > { %v3957_v31 = vpack.c.bf16 %v1179_v19, %v1178_v49  ;;  %v1012_v9 = vmul.f32 %v5436_v34, %v876_v18  ;;  %v4595_v56 = vpop.f32.mrb[59].mxu0  ;;  %v2834_v11 = vadd.f32 %v2802_v24, %v2686_v23  ;;  %v5511_v22 = vsel %vm1986_vm9, %v2879_v25, %v2895_v44 }
 0x15a   : > { %v1521_v42 = vld [vmem:[#allocation2 + $0x60] sm:$0x1]  ;;  %v2949_v28 = vmul.f32 %v5122_v43, %v5506_v26  ;;  %v1072_v52 = vadd.f32 %v5430_v40, %v1011_v1  ;;  %v2950_v13 = vmul.f32 %v5122_v43, %v5511_v22  ;;  %v1730_v49 = vmul.f32 %v5349_v36, %v5067_v50 }
 0x15b   : > { %v1522_v29 = vsel %vm5044_vm5, 0, %v1521_v42  ;;  %4384 = vst [vmem:[#allocation2 + $0x68] sm:$0xff] %v3957_v31   ;;  %v1073_v3 = vadd.f32 %v5430_v40, %v1012_v9  ;;  %v1881_v12 = vmul.f32 %v5365_v37, %v5070_v51  ;;  %v2029_v8 = vmul.f32 %v5390_v57, %v5073_v53 }
 0x15c   : > { %1523 = vst [vmem:[#allocation2 + $0x60] sm:$0x1] %v1522_v29  ;;  %v2981_v60 = vadd.f32 %v2949_v28, %v2833_v27  ;;  %v1126_v47 = vmax.f32 %v1072_v52, 0.0  ;;  %v2982_v33 = vadd.f32 %v2950_v13, %v2834_v11  ;;  %v2030_v38 = vmul.f32 %v5386_v58, %v5073_v53  ;;  %v4448_v11 = vld [vmem:[#allocation2 + $0x40] sm:$0xff]  }
 0x15d   : > { %v1127_v23 = vmax.f32 %v1073_v3, 0.0  ;;  %v1912_v20 = vadd.f32 %v1880_v48, %v1729_v61  ;;  %v1913_v25 = vadd.f32 %v1881_v12, %v1730_v49  ;;  %v2194_v37 = vmul.f32 %v5469_v46, %v5076_v54 }
 0x15e   : > { %v3020_v19 = vmul.f32 %v5288_v45, %v2981_v60  ;;  %v1180_v36 = vmin.f32 %v1126_v47, 6.0  ;;  %v5532_v30 = vpop.f32.mrb[60].mxu0  ;;  %v3021_v7 = vmul.f32 %v5288_v45, %v2982_v33  ;;  %v2195_v44 = vmul.f32 %v5473_v17, %v5076_v54 }
 0x15f   : > { %v1181_v24 = vmin.f32 %v1127_v23, 6.0  ;;  %v4598_v57 = vpop.f32.mrb[61].mxu0  ;;  %v2061_v58 = vadd.f32 %v2029_v8, %v1912_v20  ;;  %v2062_v18 = vadd.f32 %v2030_v38, %v1913_v25  ;;  %v2342_v61 = vmul.f32 %v5489_v4, %v5085_v62 }
 0x160   : > { %v3059_v1 = vadd.f32 %v5309_v59, %v3020_v19  ;;  %v5542_v31 = vpop.f32.mrb[62].mxu0  ;;  %v3060_v27 = vadd.f32 %v5309_v59, %v3021_v7  ;;  %v2343_v56 = vmul.f32 %v5494_v35, %v5085_v62  ;;  %v2490_v42 = vmul.f32 %v5506_v26, %v5094_v2 }
 0x161   : > { %v3962_v9 = vpack.c.bf16 %v1181_v24, %v1180_v36  ;;  %v4599_v28 = vpop.f32.mrb[63].mxu0  ;;  %v2226_v3 = vadd.f32 %v2194_v37, %v2061_v58  ;;  %v2227_v49 = vadd.f32 %v2195_v44, %v2062_v18  ;;  %v2491_v60 = vmul.f32 %v5511_v22, %v5094_v2 }
 0x162   : > { %v1524_v52 = vld [vmem:[#allocation2 + $0x6c] sm:$0x1]  ;;  %v1578_v29 = vld [vmem:[#allocation2 + $0x68] sm:$0xf]  ;;  %v3091_v13 = vmax.f32 %v3059_v1, 0.0  ;;  %v3092_v12 = vmax.f32 %v3060_v27, 0.0  ;;  %v5556_v33 = vunpack.c.h.bf16 %v5460_v5  ;;  %v5558_v19 = vunpack.c.l.bf16 %v4448_v11 }
 0x163   : > { %v1525_v47 = vsel %vm5044_vm5, 0, %v1524_v52  ;;  %v1579_v48 = vsel %vm5089_vm10, 0, %v1578_v29  ;;  %4385 = vst [vmem:[#allocation2 + $0x70] sm:$0xff] %v3962_v9   ;;  %v2374_v8 = vadd.f32 %v2342_v61, %v2226_v3  ;;  %v2375_v38 = vadd.f32 %v2343_v56, %v2227_v49 }
 0x164   : > { %1526 = vst [vmem:[#allocation2 + $0x6c] sm:$0x1] %v1525_v47  ;;  %1580 = vst [vmem:[#allocation2 + $0x68] sm:$0xf] %v1579_v48  ;;  %v3123_v23 = vmin.f32 %v3091_v13, 6.0  ;;  %v3124_v36 = vmin.f32 %v3092_v12, 6.0  ;;  %v4235_v20 = vunpack.c.h.bf16 %v4448_v11  ;;  %v2655_v25 = vmul.f32 %v5556_v33, %v5111_v32 }
 0x165   : > { %v2716_v7 = vrot.slane %v5556_v33, 1  ;;  %v2522_v24 = vadd.f32 %v2490_v42, %v2374_v8  ;;  %v2523_v37 = vadd.f32 %v2491_v60, %v2375_v38  ;;  %v2656_v5 = vmul.f32 %v5558_v19, %v5111_v32 }
 0x166   : > { %v2732_v44 = vrot.slane %v5558_v19, 1  ;;  %v889_v57 = vpop.f32.mrb[64].mxu0  ;;  %v3153_v1 = vpack.c.bf16 %v3124_v36, %v3123_v23  ;;  %v2748_v58 = vrot.slane %v4235_v20, 1  ;;  %v2864_v18 = vrot.slane %v5556_v33, 2 }
 0x167   : > { %v2880_v61 = vrot.slane %v5558_v19, 2  ;;  %v4602_v27 = vpop.f32.mrb[65].mxu0  ;;  %v2687_v9 = vadd.f32 %v2655_v25, %v2522_v24  ;;  %v2688_v56 = vadd.f32 %v2656_v5, %v2523_v37  ;;  %v2896_v42 = vrot.slane %v4235_v20, 2 }
 0x168   : > { %v5570_v11 = vsel %vm1837_vm8, %v2716_v7, %v2732_v44  ;;  %v892_v28 = vpop.f32.mrb[66].mxu0  ;;  %4664 = vmatprep.mubr.bf16.mxu1 %v3153_v1  ;;  %v5574_v52 = vsel %vm1837_vm8, %v2732_v44, %v2748_v58  ;;  %v1031_v3 = vmul.f32 %v5436_v34, %v5248_v55  ;;  %v1032_v23 = vmul.f32 %v5436_v34, %v5256_v16 }
 0x169   : > { %v2803_v29 = vmul.f32 %v5118_v39, %v5570_v11  ;;  %v5580_v13 = vsel %vm1986_vm9, %v2864_v18, %v2880_v61  ;;  %v4603_v49 = vpop.f32.mrb[67].mxu0  ;;  %v2804_v47 = vmul.f32 %v5118_v39, %v5574_v52  ;;  %v5588_v48 = vsel %vm1986_vm9, %v2880_v61, %v2896_v42 }
 0x16a   : > { %v1581_v60 = vld [vmem:[#allocation2 + $0x74] sm:$0xf]  ;;  %v2951_v12 = vmul.f32 %v5122_v43, %v5580_v13  ;;  %v2952_v55 = vmul.f32 %v5122_v43, %v5588_v48  ;;  %v1092_v36 = vadd.f32 %v5430_v40, %v1031_v3  ;;  %v1093_v25 = vadd.f32 %v5430_v40, %v1032_v23 }
 0x16b   : > { %v1582_v8 = vsel %vm5089_vm10, 0, %v1581_v60  ;;  %v2835_v38 = vadd.f32 %v2803_v29, %v2687_v9  ;;  %v2836_v20 = vadd.f32 %v2804_v47, %v2688_v56  ;;  %v1013_v7 = vmul.f32 %v5436_v34, %v5532_v30 }
 0x16c   : > { %1583 = vst [vmem:[#allocation2 + $0x74] sm:$0xf] %v1582_v8  ;;  %v1033_v24 = vmul.f32 %v5436_v34, %v5291_v14  ;;  %v1146_v37 = vmax.f32 %v1092_v36, 0.0  ;;  %v1014_v5 = vmul.f32 %v5436_v34, %v5542_v31  ;;  %v1034_v44 = vmul.f32 %v5436_v34, %v5311_v41 }
 0x16d   : > { %v2983_v16 = vadd.f32 %v2951_v12, %v2835_v38  ;;  %v2984_v1 = vadd.f32 %v2952_v55, %v2836_v20  ;;  %v1147_v58 = vmax.f32 %v1093_v25, 0.0  ;;  %v1074_v18 = vadd.f32 %v5430_v40, %v1013_v7 }
 0x16e   : > { %v1094_v61 = vadd.f32 %v5430_v40, %v1033_v24  ;;  %v5610_v27 = vpop.f32.mrb[68].mxu0  ;;  %v1200_v9 = vmin.f32 %v1146_v37, 6.0  ;;  %v1075_v14 = vadd.f32 %v5430_v40, %v1014_v5  ;;  %v1095_v56 = vadd.f32 %v5430_v40, %v1034_v44 }
 0x16f   : > { %v3022_v30 = vmul.f32 %v5288_v45, %v2983_v16  ;;  %v4606_v42 = vpop.f32.mrb[69].mxu0  ;;  %v3023_v31 = vmul.f32 %v5288_v45, %v2984_v1  ;;  %v1201_v29 = vmin.f32 %v1147_v58, 6.0  ;;  %v1128_v41 = vmax.f32 %v1074_v18, 0.0 }
 0x170   : > { %v1148_v3 = vmax.f32 %v1094_v61, 0.0  ;;  %v5616_v49 = vpop.f32.mrb[70].mxu0  ;;  %v1129_v47 = vmax.f32 %v1075_v14, 0.0  ;;  %v1149_v12 = vmax.f32 %v1095_v56, 0.0  ;;  %v1015_v23 = vmul.f32 %v5436_v34, %v889_v57 }
 0x171   : > { %v3061_v60 = vadd.f32 %v5309_v59, %v3022_v30  ;;  %v4607_v8 = vpop.f32.mrb[71].mxu0  ;;  %v3062_v38 = vadd.f32 %v5309_v59, %v3023_v31  ;;  %v4012_v55 = vpack.c.bf16 %v1201_v29, %v1200_v9  ;;  %v1182_v36 = vmin.f32 %v1128_v41, 6.0 }
 0x172   : > { %v1202_v20 = vmin.f32 %v1148_v3, 6.0  ;;  %v1183_v7 = vmin.f32 %v1129_v47, 6.0  ;;  %v1203_v45 = vmin.f32 %v1149_v12, 6.0  ;;  %v1076_v24 = vadd.f32 %v5430_v40, %v1015_v23 }
 0x173   : > { %v3093_v25 = vmax.f32 %v3061_v60, 0.0  ;;  %v3094_v16 = vmax.f32 %v3062_v38, 0.0  ;;  %4395 = vst [vmem:[#allocation2 + $0xc0] sm:$0xff] %v4012_v55   ;;  %v1035_v37 = vmul.f32 %v5436_v34, %v5336_v15  ;;  %v1016_v5 = vmul.f32 %v5436_v34, %v892_v28 }
 0x174   : > { %v1036_v57 = vmul.f32 %v5436_v34, %v5345_v63  ;;  %v3967_v59 = vpack.c.bf16 %v1183_v7, %v1182_v36  ;;  %v4017_v1 = vpack.c.bf16 %v1203_v45, %v1202_v20  ;;  %v1130_v58 = vmax.f32 %v1076_v24, 0.0  ;;  %v5648_v36 = vld [vmem:[#allocation2 + $0x50] sm:$0xff]  }
 0x175   : > { %v3125_v44 = vmin.f32 %v3093_v25, 6.0  ;;  %v3126_v18 = vmin.f32 %v3094_v16, 6.0  ;;  %v1096_v61 = vadd.f32 %v5430_v40, %v1035_v37  ;;  %v1077_v30 = vadd.f32 %v5430_v40, %v1016_v5 }
 0x176   : > { %v1097_v9 = vadd.f32 %v5430_v40, %v1036_v57  ;;  %4386 = vst [vmem:[#allocation2 + $0x78] sm:$0xff] %v3967_v59   ;;  %4396 = vst [vmem:[#allocation2 + $0xc8] sm:$0xff] %v4017_v1   ;;  %v1184_v14 = vmin.f32 %v1130_v58, 6.0  ;;  %v1731_v15 = vmul.f32 %v5469_v46, %v5067_v50  ;;  %v1732_v63 = vmul.f32 %v5473_v17, %v5067_v50 }
 0x177   : > { %v1882_v28 = vmul.f32 %v5489_v4, %v5070_v51  ;;  %v3154_v56 = vpack.c.bf16 %v3126_v18, %v3125_v44  ;;  %v1150_v42 = vmax.f32 %v1096_v61, 0.0  ;;  %v1131_v31 = vmax.f32 %v1077_v30, 0.0 }
 0x178   : > { %v1151_v29 = vmax.f32 %v1097_v9, 0.0  ;;  %v1883_v41 = vmul.f32 %v5494_v35, %v5070_v51  ;;  %v2031_v60 = vmul.f32 %v5506_v26, %v5073_v53  ;;  %v2032_v46 = vmul.f32 %v5511_v22, %v5073_v53  ;;  %v4449_v26 = vld [vmem:[#allocation2 + $0x48] sm:$0xff]  }
 0x179   : > { %v1914_v3 = vadd.f32 %v1882_v28, %v1731_v15  ;;  %4665 = vmatmul.mubr.bf16.gmra.mrb[40].mxu1 %v3154_v56  ;;  %v1204_v47 = vmin.f32 %v1150_v42, 6.0  ;;  %v1185_v17 = vmin.f32 %v1131_v31, 6.0  ;;  %v2196_v4 = vmul.f32 %v5556_v33, %v5076_v54 }
 0x17a   : > { %v1205_v12 = vmin.f32 %v1151_v29, 6.0  ;;  %v1545_v23 = vld [vmem:[#allocation2 + $0xc0] sm:$0x1]  ;;  %v1915_v8 = vadd.f32 %v1883_v41, %v1732_v63  ;;  %v2197_v35 = vmul.f32 %v5558_v19, %v5076_v54  ;;  %v2344_v55 = vmul.f32 %v5570_v11, %v5085_v62 }
 0x17b   : > { %v2063_v38 = vadd.f32 %v2031_v60, %v1914_v3  ;;  %v1546_v22 = vsel %vm5044_vm5, 0, %v1545_v23  ;;  %v3972_v20 = vpack.c.bf16 %v1185_v17, %v1184_v14  ;;  %v2345_v7 = vmul.f32 %v5574_v52, %v5085_v62 }
 0x17c   : > { %v4022_v25 = vpack.c.bf16 %v1205_v12, %v1204_v47  ;;  %1547 = vst [vmem:[#allocation2 + $0xc0] sm:$0x1] %v1546_v22  ;;  %v2064_v45 = vadd.f32 %v2032_v46, %v1915_v8  ;;  %v2492_v16 = vmul.f32 %v5580_v13, %v5094_v2  ;;  %v2493_v37 = vmul.f32 %v5588_v48, %v5094_v2 }
 0x17d   : > { %v2228_v24 = vadd.f32 %v2196_v4, %v2063_v38  ;;  %v1527_v5 = vld [vmem:[#allocation2 + $0x78] sm:$0x1]  ;;  %v1548_v57 = vld [vmem:[#allocation2 + $0xcc] sm:$0x1]  ;;  %v1602_v44 = vld [vmem:[#allocation2 + $0xc8] sm:$0xf]  ;;  %v5658_v59 = vunpack.c.l.bf16 %v4449_v26  ;;  %v5660_v1 = vunpack.c.h.bf16 %v4449_v26  ;;  %v4242_v58 = vunpack.c.l.bf16 %v5648_v36 }
 0x17e   : > { %4387 = vst [vmem:[#allocation2 + $0x80] sm:$0xff] %v3972_v20   ;;  %4397 = vst [vmem:[#allocation2 + $0xd0] sm:$0xff] %v4022_v25   ;;  %v1017_v18 = vmul.f32 %v5436_v34, %v5610_v27  ;;  %v1528_v61 = vsel %vm5044_vm5, 0, %v1527_v5  ;;  %v1549_v30 = vsel %vm5044_vm5, 0, %v1548_v57  ;;  %v1603_v9 = vsel %vm5089_vm10, 0, %v1602_v44 }
 0x17f   : > { %1617 = vst [vmem:[#allocation2 + $0xd0] sm:$0xf] %v4789_v6  ;;  %v2229_v14 = vadd.f32 %v2197_v35, %v2064_v45  ;;  %1529 = vst [vmem:[#allocation2 + $0x78] sm:$0x1] %v1528_v61  ;;  %v2376_v15 = vadd.f32 %v2344_v55, %v2228_v24  ;;  %v2657_v63 = vmul.f32 %v5658_v59, %v5111_v32  ;;  %v2717_v28 = vrot.slane %v5658_v59, 1 }
 0x180   : > { %1550 = vst [vmem:[#allocation2 + $0xcc] sm:$0x1] %v1549_v30  ;;  %1604 = vst [vmem:[#allocation2 + $0xc8] sm:$0xf] %v1603_v9  ;;  %v2658_v27 = vmul.f32 %v5660_v1, %v5111_v32  ;;  %v2733_v42 = vrot.slane %v5660_v1, 1  ;;  %v2749_v31 = vrot.slane %v4242_v58, 1  ;;  %v1078_v46 = vadd.f32 %v5430_v40, %v1017_v18 }
 0x181   : > { %1616 = vst [vmem:[#allocation2 + $0xcc] sm:$0xf] %v4789_v6  ;;  %v2377_v56 = vadd.f32 %v2345_v7, %v2229_v14  ;;  %v2865_v29 = vrot.slane %v5658_v59, 2  ;;  %v2524_v41 = vadd.f32 %v2492_v16, %v2376_v15  ;;  %v2881_v3 = vrot.slane %v5660_v1, 2 }
 0x182   : > { %v2897_v60 = vrot.slane %v4242_v58, 2  ;;  %v5684_v17 = vsel %vm1837_vm8, %v2733_v42, %v2749_v31  ;;  %v5688_v12 = vsel %vm1837_vm8, %v2717_v28, %v2733_v42  ;;  %v1018_v4 = vmul.f32 %v5436_v34, %v5616_v49  ;;  %v4451_v31 = vld [vmem:[#allocation2 + $0x58] sm:$0xff]  }
 0x183   : > { %v2525_v47 = vadd.f32 %v2493_v37, %v2377_v56  ;;  %v2689_v23 = vadd.f32 %v2657_v63, %v2524_v41  ;;  %v2805_v8 = vmul.f32 %v5118_v39, %v5688_v12  ;;  %v2806_v38 = vmul.f32 %v5118_v39, %v5684_v17 }
 0x184   : > { %v5698_v35 = vsel %vm1986_vm9, %v2881_v3, %v2897_v60  ;;  %v5702_v25 = vsel %vm1986_vm9, %v2865_v29, %v2881_v3  ;;  %v1079_v49 = vadd.f32 %v5430_v40, %v1018_v4  ;;  %v1132_v57 = vmax.f32 %v1078_v46, 0.0  ;;  %v5744_v29 = vld [vmem:[%s6571_s7] ss:$0 sm:$0xff] }
 0x185   : > { %v1530_v55 = vld [vmem:[#allocation2 + $0x84] sm:$0x1]  ;;  %v1584_v26 = vld [vmem:[#allocation2 + $0x80] sm:$0xf]  ;;  %v1605_v22 = vld [vmem:[#allocation2 + $0xd4] sm:$0xf]  ;;  %v2690_v20 = vadd.f32 %v2658_v27, %v2525_v47  ;;  %v2954_v34 = vmul.f32 %v5122_v43, %v5698_v35  ;;  %v2837_v16 = vadd.f32 %v2805_v8, %v2689_v23  ;;  %v2953_v5 = vmul.f32 %v5122_v43, %v5702_v25 }
 0x186   : > { %v1531_v7 = vsel %vm5044_vm5, 0, %v1530_v55  ;;  %v1585_v45 = vsel %vm5089_vm10, 0, %v1584_v26  ;;  %v1606_v24 = vsel %vm5089_vm10, 0, %v1605_v22  ;;  %v1133_v44 = vmax.f32 %v1079_v49, 0.0 }
 0x187   : > { %1532 = vst [vmem:[#allocation2 + $0x84] sm:$0x1] %v1531_v7  ;;  %1586 = vst [vmem:[#allocation2 + $0x80] sm:$0xf] %v1585_v45  ;;  %v2838_v37 = vadd.f32 %v2806_v38, %v2690_v20  ;;  %v1733_v21 = vmul.f32 %v5556_v33, %v5067_v50  ;;  %v1734_v40 = vmul.f32 %v5558_v19, %v5067_v50  ;;  %v1186_v9 = vmin.f32 %v1132_v57, 6.0 }
 0x188   : > { %1607 = vst [vmem:[#allocation2 + $0xd4] sm:$0xf] %v1606_v24  ;;  %v1884_v58 = vmul.f32 %v5570_v11, %v5070_v51  ;;  %v1885_v18 = vmul.f32 %v5574_v52, %v5070_v51  ;;  %v2985_v61 = vadd.f32 %v2953_v5, %v2837_v16  ;;  %v1187_v14 = vmin.f32 %v1133_v44, 6.0  ;;  %v5731_v19 = vld [vmem:[%s6570_s6] ss:$0 sm:$0xff] }
 0x189   : > { %1618 = vst [vmem:[#allocation2 + $0xd4] sm:$0xf] %v4789_v6  ;;  %v2986_v30 = vadd.f32 %v2954_v34, %v2838_v37  ;;  %v2033_v6 = vmul.f32 %v5580_v13, %v5073_v53  ;;  %v2034_v33 = vmul.f32 %v5588_v48, %v5073_v53  ;;  %v2198_v28 = vmul.f32 %v5658_v59, %v5076_v54 }
 0x18a   : > { %v1916_v15 = vadd.f32 %v1884_v58, %v1733_v21  ;;  %v1917_v63 = vadd.f32 %v1885_v18, %v1734_v40  ;;  %v3024_v11 = vmul.f32 %v5731_v19, %v2985_v61  ;;  %v3977_v27 = vpack.c.bf16 %v1187_v14, %v1186_v9 }
 0x18b   : > { %v3025_v52 = vmul.f32 %v5731_v19, %v2986_v30  ;;  %v2199_v13 = vmul.f32 %v5660_v1, %v5076_v54  ;;  %v2346_v48 = vmul.f32 %v5688_v12, %v5085_v62  ;;  %v2347_v60 = vmul.f32 %v5684_v17, %v5085_v62 }
 0x18c   : > { %v2065_v56 = vadd.f32 %v2033_v6, %v1916_v15  ;;  %v2066_v42 = vadd.f32 %v2034_v33, %v1917_v63  ;;  %v3063_v41 = vadd.f32 %v5744_v29, %v3024_v11  ;;  %4388 = vst [vmem:[#allocation2 + $0x88] sm:$0xff] %v3977_v27   ;;  %v2494_v46 = vmul.f32 %v5702_v25, %v5094_v2 }
 0x18d   : > { %v3064_v3 = vadd.f32 %v5744_v29, %v3025_v52  ;;  %v2495_v23 = vmul.f32 %v5698_v35, %v5094_v2  ;;  %v5755_v8 = vunpack.c.h.bf16 %v5648_v36  ;;  %v5757_v26 = vunpack.c.l.bf16 %v4451_v31 }
 0x18e   : > { %v2230_v47 = vadd.f32 %v2198_v28, %v2065_v56  ;;  %v2231_v4 = vadd.f32 %v2199_v13, %v2066_v42  ;;  %v3095_v38 = vmax.f32 %v3063_v41, 0.0  ;;  %v4247_v22 = vunpack.c.h.bf16 %v4451_v31 }
 0x18f   : > { %v3096_v55 = vmax.f32 %v3064_v3, 0.0  ;;  %v2659_v49 = vmul.f32 %v5755_v8, %v5111_v32  ;;  %v2718_v7 = vrot.slane %v5755_v8, 1  ;;  %v2660_v16 = vmul.f32 %v5757_v26, %v5111_v32 }
 0x190   : > { %v2378_v20 = vadd.f32 %v2346_v48, %v2230_v47  ;;  %v2379_v34 = vadd.f32 %v2347_v60, %v2231_v4  ;;  %v3127_v45 = vmin.f32 %v3095_v38, 6.0  ;;  %v2734_v36 = vrot.slane %v5757_v26, 1  ;;  %v5809_v4 = vld [vmem:[#allocation2 + $0x68] sm:$0xff]  }
 0x191   : > { %v3128_v24 = vmin.f32 %v3096_v55, 6.0  ;;  %v2750_v57 = vrot.slane %v4247_v22, 1  ;;  %v2866_v44 = vrot.slane %v5755_v8, 2  ;;  %v2882_v58 = vrot.slane %v5757_v26, 2 }
 0x192   : > { %v2526_v37 = vadd.f32 %v2494_v46, %v2378_v20  ;;  %v2527_v5 = vadd.f32 %v2495_v23, %v2379_v34  ;;  %v5768_v40 = vsel %vm1837_vm8, %v2718_v7, %v2734_v36  ;;  %v2898_v18 = vrot.slane %v4247_v22, 2 }
 0x193   : > { %v3155_v21 = vpack.c.bf16 %v3128_v24, %v3127_v45  ;;  %v1587_v61 = vld [vmem:[#allocation2 + $0x8c] sm:$0xf]  ;;  %v5773_v14 = vsel %vm1837_vm8, %v2734_v36, %v2750_v57  ;;  %v2807_v15 = vmul.f32 %v5118_v39, %v5768_v40  ;;  %v5787_v11 = vsel %vm1986_vm9, %v2866_v44, %v2882_v58 }
 0x194   : > { %v2691_v30 = vadd.f32 %v2659_v49, %v2526_v37  ;;  %v2692_v9 = vadd.f32 %v2660_v16, %v2527_v5  ;;  %v1588_v63 = vsel %vm5089_vm10, 0, %v1587_v61  ;;  %v2808_v6 = vmul.f32 %v5118_v39, %v5773_v14 }
 0x195   : > { %4668 = vmatprep.mubr.bf16.mxu1 %v3155_v21  ;;  %v5783_v33 = vsel %vm1986_vm9, %v2882_v58, %v2898_v18  ;;  %1589 = vst [vmem:[#allocation2 + $0x8c] sm:$0xf] %v1588_v63  ;;  %v2955_v27 = vmul.f32 %v5122_v43, %v5787_v11  ;;  %v1735_v28 = vmul.f32 %v5658_v59, %v5067_v50  ;;  %v4254_v45 = vunpack.c.l.bf16 %v5809_v4 }
 0x196   : > { %v2839_v52 = vadd.f32 %v2807_v15, %v2691_v30  ;;  %v2956_v0 = vmul.f32 %v5122_v43, %v5783_v33  ;;  %v2840_v56 = vadd.f32 %v2808_v6, %v2692_v9  ;;  %v1736_v42 = vmul.f32 %v5660_v1, %v5067_v50 }
 0x197   : > { %v1886_v13 = vmul.f32 %v5688_v12, %v5070_v51  ;;  %v1887_v48 = vmul.f32 %v5684_v17, %v5070_v51  ;;  %v2035_v41 = vmul.f32 %v5702_v25, %v5073_v53  ;;  %v2036_v3 = vmul.f32 %v5698_v35, %v5073_v53  ;;  %v4452_v12 = vld [vmem:[#allocation2 + $0x60] sm:$0xff]  }
 0x198   : > { %v2987_v31 = vadd.f32 %v2955_v27, %v2839_v52  ;;  %v2200_v59 = vmul.f32 %v5755_v8, %v5076_v54  ;;  %v2988_v60 = vadd.f32 %v2956_v0, %v2840_v56  ;;  %v2201_v1 = vmul.f32 %v5757_v26, %v5076_v54 }
 0x199   : > { %v1918_v46 = vadd.f32 %v1886_v13, %v1735_v28  ;;  %v1919_v47 = vadd.f32 %v1887_v48, %v1736_v42  ;;  %v2348_v25 = vmul.f32 %v5768_v40, %v5085_v62  ;;  %v2349_v35 = vmul.f32 %v5773_v14, %v5085_v62 }
 0x19a   : > { %v3026_v17 = vmul.f32 %v5731_v19, %v2987_v31  ;;  %v2496_v23 = vmul.f32 %v5787_v11, %v5094_v2  ;;  %v3027_v38 = vmul.f32 %v5731_v19, %v2988_v60  ;;  %v2497_v20 = vmul.f32 %v5783_v33, %v5094_v2 }
 0x19b   : > { %v2067_v55 = vadd.f32 %v2035_v41, %v1918_v46  ;;  %v2068_v22 = vadd.f32 %v2036_v3, %v1919_v47  ;;  %v5822_v49 = vunpack.c.l.bf16 %v4452_v12  ;;  %v5824_v7 = vunpack.c.h.bf16 %v4452_v12 }
 0x19c   : > { %v3065_v34 = vadd.f32 %v5744_v29, %v3026_v17  ;;  %v3066_v24 = vadd.f32 %v5744_v29, %v3027_v38  ;;  %v1737_v37 = vmul.f32 %v5755_v8, %v5067_v50  ;;  %v2751_v15 = vrot.slane %v4254_v45, 1 }
 0x19d   : > { %v2232_v16 = vadd.f32 %v2200_v59, %v2067_v55  ;;  %v2233_v36 = vadd.f32 %v2201_v1, %v2068_v22  ;;  %v2661_v57 = vmul.f32 %v5822_v49, %v5111_v32  ;;  %v2662_v44 = vmul.f32 %v5824_v7, %v5111_v32 }
 0x19e   : > { %v3097_v5 = vmax.f32 %v3065_v34, 0.0  ;;  %v2719_v21 = vrot.slane %v5822_v49, 1  ;;  %v3098_v58 = vmax.f32 %v3066_v24, 0.0  ;;  %v2735_v30 = vrot.slane %v5824_v7, 1  ;;  %v4454_v34 = vld [vmem:[#allocation2 + $0x70] sm:$0xff]  }
 0x19f   : > { %v2380_v18 = vadd.f32 %v2348_v25, %v2232_v16  ;;  %v2381_v61 = vadd.f32 %v2349_v35, %v2233_v36  ;;  %v2867_v63 = vrot.slane %v5822_v49, 2  ;;  %v2883_v8 = vrot.slane %v5824_v7, 2 }
 0x1a0   : > { %v3129_v9 = vmin.f32 %v3097_v5, 6.0  ;;  %v3130_v6 = vmin.f32 %v3098_v58, 6.0  ;;  %v5840_v0 = vsel %vm1837_vm8, %v2719_v21, %v2735_v30  ;;  %v5844_v28 = vsel %vm1837_vm8, %v2735_v30, %v2751_v15 }
 0x1a1   : > { %v2528_v52 = vadd.f32 %v2496_v23, %v2380_v18  ;;  %v2529_v27 = vadd.f32 %v2497_v20, %v2381_v61  ;;  %v2809_v56 = vmul.f32 %v5118_v39, %v5840_v0  ;;  %v2899_v42 = vrot.slane %v4254_v45, 2 }
 0x1a2   : > { %v5850_v13 = vsel %vm1986_vm9, %v2867_v63, %v2883_v8  ;;  %v3156_v48 = vpack.c.bf16 %v3130_v6, %v3129_v9  ;;  %v2810_v3 = vmul.f32 %v5118_v39, %v5844_v28  ;;  %v1738_v46 = vmul.f32 %v5757_v26, %v5067_v50 }
 0x1a3   : > { %v2693_v31 = vadd.f32 %v2661_v57, %v2528_v52  ;;  %v2694_v41 = vadd.f32 %v2662_v44, %v2529_v27  ;;  %v5856_v59 = vsel %vm1986_vm9, %v2883_v8, %v2899_v42  ;;  %v2957_v60 = vmul.f32 %v5122_v43, %v5850_v13 }
 0x1a4   : > { %v1888_v47 = vmul.f32 %v5768_v40, %v5070_v51  ;;  %4669 = vmatmul.mubr.bf16.gmra.mrb[44].mxu1 %v3156_v48  ;;  %v2958_v17 = vmul.f32 %v5122_v43, %v5856_v59  ;;  %v1889_v25 = vmul.f32 %v5773_v14, %v5070_v51  ;;  %v2037_v23 = vmul.f32 %v5787_v11, %v5073_v53 }
 0x1a5   : > { %v2841_v1 = vadd.f32 %v2809_v56, %v2693_v31  ;;  %v2842_v12 = vadd.f32 %v2810_v3, %v2694_v41  ;;  %v2038_v38 = vmul.f32 %v5783_v33, %v5073_v53  ;;  %v2202_v26 = vmul.f32 %v5822_v49, %v5076_v54 }
 0x1a6   : > { %v1920_v35 = vadd.f32 %v1888_v47, %v1737_v37  ;;  %v1921_v22 = vadd.f32 %v1889_v25, %v1738_v46  ;;  %v2203_v20 = vmul.f32 %v5824_v7, %v5076_v54  ;;  %v2350_v14 = vmul.f32 %v5840_v0, %v5085_v62 }
 0x1a7   : > { %v2989_v40 = vadd.f32 %v2957_v60, %v2841_v1  ;;  %v2990_v55 = vadd.f32 %v2958_v17, %v2842_v12  ;;  %v2351_v11 = vmul.f32 %v5844_v28, %v5085_v62  ;;  %v2498_v33 = vmul.f32 %v5850_v13, %v5094_v2 }
 0x1a8   : > { %v2069_v45 = vadd.f32 %v2037_v23, %v1920_v35  ;;  %v2070_v36 = vadd.f32 %v2038_v38, %v1921_v22  ;;  %v2499_v37 = vmul.f32 %v5856_v59, %v5094_v2  ;;  %v5887_v57 = vunpack.c.h.bf16 %v5809_v4 }
 0x1a9   : > { %v3028_v24 = vmul.f32 %v5731_v19, %v2989_v40  ;;  %v3029_v16 = vmul.f32 %v5731_v19, %v2990_v55  ;;  %v5889_v44 = vunpack.c.l.bf16 %v4454_v34  ;;  %v4259_v21 = vunpack.c.h.bf16 %v4454_v34 }
 0x1aa   : > { %v2234_v5 = vadd.f32 %v2202_v26, %v2069_v45  ;;  %v2235_v61 = vadd.f32 %v2203_v20, %v2070_v36  ;;  %v1739_v30 = vmul.f32 %v5822_v49, %v5067_v50  ;;  %v2663_v15 = vmul.f32 %v5887_v57, %v5111_v32 }
 0x1ab   : > { %v3067_v58 = vadd.f32 %v5744_v29, %v3028_v24  ;;  %v3068_v18 = vadd.f32 %v5744_v29, %v3029_v16  ;;  %v2664_v63 = vmul.f32 %v5889_v44, %v5111_v32  ;;  %v2720_v4 = vrot.slane %v5887_v57, 1 }
 0x1ac   : > { %v2382_v9 = vadd.f32 %v2350_v14, %v2234_v5  ;;  %v2383_v52 = vadd.f32 %v2351_v11, %v2235_v61  ;;  %v2736_v27 = vrot.slane %v5889_v44, 1  ;;  %v2752_v42 = vrot.slane %v4259_v21, 1  ;;  %v5941_v5 = vld [vmem:[#allocation2 + $0x80] sm:$0xff]  }
 0x1ad   : > { %v3099_v8 = vmax.f32 %v3067_v58, 0.0  ;;  %v3100_v6 = vmax.f32 %v3068_v18, 0.0  ;;  %v2868_v48 = vrot.slane %v5887_v57, 2  ;;  %v2884_v49 = vrot.slane %v5889_v44, 2 }
 0x1ae   : > { %v2530_v56 = vadd.f32 %v2498_v33, %v2382_v9  ;;  %v2531_v3 = vadd.f32 %v2499_v37, %v2383_v52  ;;  %v5905_v60 = vsel %vm1837_vm8, %v2720_v4, %v2736_v27  ;;  %v5909_v47 = vsel %vm1837_vm8, %v2736_v27, %v2752_v42 }
 0x1af   : > { %v3131_v31 = vmin.f32 %v3099_v8, 6.0  ;;  %v3132_v41 = vmin.f32 %v3100_v6, 6.0  ;;  %v2811_v1 = vmul.f32 %v5118_v39, %v5905_v60  ;;  %v2900_v12 = vrot.slane %v4259_v21, 2 }
 0x1b0   : > { %v2695_v46 = vadd.f32 %v2663_v15, %v2530_v56  ;;  %v2696_v25 = vadd.f32 %v2664_v63, %v2531_v3  ;;  %v2812_v35 = vmul.f32 %v5118_v39, %v5909_v47  ;;  %v5917_v23 = vsel %vm1986_vm9, %v2868_v48, %v2884_v49 }
 0x1b1   : > { %v3157_v17 = vpack.c.bf16 %v3132_v41, %v3131_v31  ;;  %v5921_v26 = vsel %vm1986_vm9, %v2884_v49, %v2900_v12  ;;  %v2959_v40 = vmul.f32 %v5122_v43, %v5917_v23  ;;  %v1740_v55 = vmul.f32 %v5824_v7, %v5067_v50 }
 0x1b2   : > { %v2843_v38 = vadd.f32 %v2811_v1, %v2695_v46  ;;  %v2844_v22 = vadd.f32 %v2812_v35, %v2696_v25  ;;  %v2960_v20 = vmul.f32 %v5122_v43, %v5921_v26  ;;  %v1890_v34 = vmul.f32 %v5840_v0, %v5070_v51  ;;  %v4455_v0 = vld [vmem:[#allocation2 + $0x78] sm:$0xff]  }
 0x1b3   : > { %4672 = vmatprep.mubr.bf16.mxu1 %v3157_v17  ;;  %v1891_v45 = vmul.f32 %v5844_v28, %v5070_v51  ;;  %v2039_v11 = vmul.f32 %v5850_v13, %v5073_v53  ;;  %v2040_v33 = vmul.f32 %v5856_v59, %v5073_v53  ;;  %v2204_v7 = vmul.f32 %v5887_v57, %v5076_v54 }
 0x1b4   : > { %v2991_v14 = vadd.f32 %v2959_v40, %v2843_v38  ;;  %v2992_v24 = vadd.f32 %v2960_v20, %v2844_v22  ;;  %v1922_v16 = vadd.f32 %v1890_v34, %v1739_v30  ;;  %v2205_v37 = vmul.f32 %v5889_v44, %v5076_v54 }
 0x1b5   : > { %v1923_v36 = vadd.f32 %v1891_v45, %v1740_v55  ;;  %v2352_v13 = vmul.f32 %v5905_v60, %v5085_v62  ;;  %v2353_v59 = vmul.f32 %v5909_v47, %v5085_v62  ;;  %v2500_v21 = vmul.f32 %v5917_v23, %v5094_v2 }
 0x1b6   : > { %v3030_v28 = vmul.f32 %v5731_v19, %v2991_v14  ;;  %v3031_v58 = vmul.f32 %v5731_v19, %v2992_v24  ;;  %v2071_v18 = vadd.f32 %v2039_v11, %v1922_v16  ;;  %v2501_v30 = vmul.f32 %v5921_v26, %v5094_v2 }
 0x1b7   : > { %v2072_v61 = vadd.f32 %v2040_v33, %v1923_v36  ;;  %v5954_v15 = vunpack.c.l.bf16 %v4455_v0  ;;  %v5956_v63 = vunpack.c.h.bf16 %v4455_v0  ;;  %v4266_v4 = vunpack.c.l.bf16 %v5941_v5 }
 0x1b8   : > { %v3069_v9 = vadd.f32 %v5744_v29, %v3030_v28  ;;  %v3070_v8 = vadd.f32 %v5744_v29, %v3031_v58  ;;  %v2236_v6 = vadd.f32 %v2204_v7, %v2071_v18  ;;  %v1741_v27 = vmul.f32 %v5887_v57, %v5067_v50 }
 0x1b9   : > { %v2237_v52 = vadd.f32 %v2205_v37, %v2072_v61  ;;  %v2665_v42 = vmul.f32 %v5954_v15, %v5111_v32  ;;  %v2666_v48 = vmul.f32 %v5956_v63, %v5111_v32  ;;  %v2721_v49 = vrot.slane %v5954_v15, 1 }
 0x1ba   : > { %v3101_v56 = vmax.f32 %v3069_v9, 0.0  ;;  %v3102_v31 = vmax.f32 %v3070_v8, 0.0  ;;  %v2384_v41 = vadd.f32 %v2352_v13, %v2236_v6  ;;  %v2737_v46 = vrot.slane %v5956_v63, 1  ;;  %v4457_v9 = vld [vmem:[#allocation2 + $0x88] sm:$0xff]  }
 0x1bb   : > { %v2385_v3 = vadd.f32 %v2353_v59, %v2237_v52  ;;  %v2753_v12 = vrot.slane %v4266_v4, 1  ;;  %v2869_v17 = vrot.slane %v5954_v15, 2  ;;  %v2885_v57 = vrot.slane %v5956_v63, 2 }
 0x1bc   : > { %v3133_v1 = vmin.f32 %v3101_v56, 6.0  ;;  %v3134_v25 = vmin.f32 %v3102_v31, 6.0  ;;  %v2532_v35 = vadd.f32 %v2500_v21, %v2384_v41  ;;  %v5972_v40 = vsel %vm1837_vm8, %v2721_v49, %v2737_v46 }
 0x1bd   : > { %v2533_v38 = vadd.f32 %v2501_v30, %v2385_v3  ;;  %v5976_v55 = vsel %vm1837_vm8, %v2737_v46, %v2753_v12  ;;  %v2813_v22 = vmul.f32 %v5118_v39, %v5972_v40  ;;  %v2901_v20 = vrot.slane %v4266_v4, 2 }
 0x1be   : > { %v5982_v34 = vsel %vm1986_vm9, %v2869_v17, %v2885_v57  ;;  %v3158_v45 = vpack.c.bf16 %v3134_v25, %v3133_v1  ;;  %v2697_v14 = vadd.f32 %v2665_v42, %v2532_v35  ;;  %v2814_v33 = vmul.f32 %v5118_v39, %v5976_v55 }
 0x1bf   : > { %v2698_v11 = vadd.f32 %v2666_v48, %v2533_v38  ;;  %v5988_v7 = vsel %vm1986_vm9, %v2885_v57, %v2901_v20  ;;  %v2961_v24 = vmul.f32 %v5122_v43, %v5982_v34  ;;  %v1742_v16 = vmul.f32 %v5889_v44, %v5067_v50 }
 0x1c0   : > { %v1892_v36 = vmul.f32 %v5905_v60, %v5070_v51  ;;  %4673 = vmatmul.mubr.bf16.gmra.mrb[48].mxu1 %v3158_v45  ;;  %v2845_v37 = vadd.f32 %v2813_v22, %v2697_v14  ;;  %v2962_v28 = vmul.f32 %v5122_v43, %v5988_v7  ;;  %v1893_v13 = vmul.f32 %v5909_v47, %v5070_v51 }
 0x1c1   : > { %v2846_v0 = vadd.f32 %v2814_v33, %v2698_v11  ;;  %v2041_v21 = vmul.f32 %v5917_v23, %v5073_v53  ;;  %v2042_v58 = vmul.f32 %v5921_v26, %v5073_v53  ;;  %v2206_v44 = vmul.f32 %v5954_v15, %v5076_v54 }
 0x1c2   : > { %v1924_v59 = vadd.f32 %v1892_v36, %v1741_v27  ;;  %v2993_v60 = vadd.f32 %v2961_v24, %v2845_v37  ;;  %v1925_v61 = vadd.f32 %v1893_v13, %v1742_v16  ;;  %v2207_v30 = vmul.f32 %v5956_v63, %v5076_v54 }
 0x1c3   : > { %v2994_v18 = vadd.f32 %v2962_v28, %v2846_v0  ;;  %v2354_v47 = vmul.f32 %v5972_v40, %v5085_v62  ;;  %v2355_v23 = vmul.f32 %v5976_v55, %v5085_v62  ;;  %v2502_v26 = vmul.f32 %v5982_v34, %v5094_v2 }
 0x1c4   : > { %v2073_v4 = vadd.f32 %v2041_v21, %v1924_v59  ;;  %v3032_v8 = vmul.f32 %v5731_v19, %v2993_v60  ;;  %v2074_v52 = vadd.f32 %v2042_v58, %v1925_v61  ;;  %v2503_v27 = vmul.f32 %v5988_v7, %v5094_v2 }
 0x1c5   : > { %v3033_v6 = vmul.f32 %v5731_v19, %v2994_v18  ;;  %v6019_v42 = vunpack.c.h.bf16 %v5941_v5  ;;  %v6021_v48 = vunpack.c.l.bf16 %v4457_v9  ;;  %v4271_v49 = vunpack.c.h.bf16 %v4457_v9 }
 0x1c6   : > { %v2238_v56 = vadd.f32 %v2206_v44, %v2073_v4  ;;  %v3071_v31 = vadd.f32 %v5744_v29, %v3032_v8  ;;  %v2239_v3 = vadd.f32 %v2207_v30, %v2074_v52  ;;  %v1743_v46 = vmul.f32 %v5954_v15, %v5067_v50 }
 0x1c7   : > { %v3072_v41 = vadd.f32 %v5744_v29, %v3033_v6  ;;  %v2667_v12 = vmul.f32 %v6019_v42, %v5111_v32  ;;  %v2668_v17 = vmul.f32 %v6021_v48, %v5111_v32  ;;  %v2722_v5 = vrot.slane %v6019_v42, 1 }
 0x1c8   : > { %v2386_v1 = vadd.f32 %v2354_v47, %v2238_v56  ;;  %v3103_v57 = vmax.f32 %v3071_v31, 0.0  ;;  %v2387_v35 = vadd.f32 %v2355_v23, %v2239_v3  ;;  %v2738_v38 = vrot.slane %v6021_v48, 1  ;;  %v6073_v56 = vld [vmem:[#allocation2 + $0x98] sm:$0xff]  }
 0x1c9   : > { %v3104_v25 = vmax.f32 %v3072_v41, 0.0  ;;  %v2754_v20 = vrot.slane %v4271_v49, 1  ;;  %v2870_v45 = vrot.slane %v6019_v42, 2  ;;  %v2886_v15 = vrot.slane %v6021_v48, 2 }
 0x1ca   : > { %v2534_v22 = vadd.f32 %v2502_v26, %v2386_v1  ;;  %v3135_v14 = vmin.f32 %v3103_v57, 6.0  ;;  %v2535_v33 = vadd.f32 %v2503_v27, %v2387_v35  ;;  %v6037_v24 = vsel %vm1837_vm8, %v2722_v5, %v2738_v38 }
 0x1cb   : > { %v3136_v11 = vmin.f32 %v3104_v25, 6.0  ;;  %v6041_v36 = vsel %vm1837_vm8, %v2738_v38, %v2754_v20  ;;  %v2815_v37 = vmul.f32 %v5118_v39, %v6037_v24  ;;  %v2902_v0 = vrot.slane %v4271_v49, 2 }
 0x1cc   : > { %v2699_v16 = vadd.f32 %v2667_v12, %v2534_v22  ;;  %v2700_v13 = vadd.f32 %v2668_v17, %v2535_v33  ;;  %v2816_v59 = vmul.f32 %v5118_v39, %v6041_v36  ;;  %v6049_v21 = vsel %vm1986_vm9, %v2870_v45, %v2886_v15 }
 0x1cd   : > { %v3159_v28 = vpack.c.bf16 %v3136_v11, %v3135_v14  ;;  %v6053_v44 = vsel %vm1986_vm9, %v2886_v15, %v2902_v0  ;;  %v2963_v60 = vmul.f32 %v5122_v43, %v6049_v21  ;;  %v1744_v18 = vmul.f32 %v5956_v63, %v5067_v50 }
 0x1ce   : > { %v2847_v58 = vadd.f32 %v2815_v37, %v2699_v16  ;;  %v2848_v61 = vadd.f32 %v2816_v59, %v2700_v13  ;;  %v2964_v30 = vmul.f32 %v5122_v43, %v6053_v44  ;;  %v1894_v9 = vmul.f32 %v5972_v40, %v5070_v51  ;;  %v4458_v40 = vld [vmem:[#allocation2 + $0x90] sm:$0xff]  }
 0x1cf   : > { %4676 = vmatprep.mubr.bf16.mxu1 %v3159_v28  ;;  %v1895_v4 = vmul.f32 %v5976_v55, %v5070_v51  ;;  %v2043_v23 = vmul.f32 %v5982_v34, %v5073_v53  ;;  %v2044_v26 = vmul.f32 %v5988_v7, %v5073_v53  ;;  %v2208_v63 = vmul.f32 %v6019_v42, %v5076_v54 }
 0x1d0   : > { %v2995_v47 = vadd.f32 %v2963_v60, %v2847_v58  ;;  %v2996_v8 = vadd.f32 %v2964_v30, %v2848_v61  ;;  %v1926_v6 = vadd.f32 %v1894_v9, %v1743_v46  ;;  %v2209_v27 = vmul.f32 %v6021_v48, %v5076_v54 }
 0x1d1   : > { %v1927_v52 = vadd.f32 %v1895_v4, %v1744_v18  ;;  %v2356_v34 = vmul.f32 %v6037_v24, %v5085_v62  ;;  %v2357_v7 = vmul.f32 %v6041_v36, %v5085_v62  ;;  %v2504_v49 = vmul.f32 %v6049_v21, %v5094_v2 }
 0x1d2   : > { %v3034_v55 = vmul.f32 %v5731_v19, %v2995_v47  ;;  %v3035_v31 = vmul.f32 %v5731_v19, %v2996_v8  ;;  %v2075_v41 = vadd.f32 %v2043_v23, %v1926_v6  ;;  %v2505_v46 = vmul.f32 %v6053_v44, %v5094_v2 }
 0x1d3   : > { %v2076_v3 = vadd.f32 %v2044_v26, %v1927_v52  ;;  %v6086_v12 = vunpack.c.l.bf16 %v4458_v40  ;;  %v6088_v17 = vunpack.c.h.bf16 %v4458_v40  ;;  %v4278_v5 = vunpack.c.l.bf16 %v6073_v56 }
 0x1d4   : > { %v3073_v1 = vadd.f32 %v5744_v29, %v3034_v55  ;;  %v3074_v57 = vadd.f32 %v5744_v29, %v3035_v31  ;;  %v2240_v25 = vadd.f32 %v2208_v63, %v2075_v41  ;;  %v1745_v38 = vmul.f32 %v6019_v42, %v5067_v50 }
 0x1d5   : > { %v2241_v35 = vadd.f32 %v2209_v27, %v2076_v3  ;;  %v2669_v20 = vmul.f32 %v6086_v12, %v5111_v32  ;;  %v2670_v45 = vmul.f32 %v6088_v17, %v5111_v32  ;;  %v2723_v15 = vrot.slane %v6086_v12, 1 }
 0x1d6   : > { %v3105_v22 = vmax.f32 %v3073_v1, 0.0  ;;  %v3106_v14 = vmax.f32 %v3074_v57, 0.0  ;;  %v2388_v11 = vadd.f32 %v2356_v34, %v2240_v25  ;;  %v2739_v16 = vrot.slane %v6088_v17, 1  ;;  %v4460_v1 = vld [vmem:[#allocation2 + $0xa0] sm:$0xff]  }
 0x1d7   : > { %v2389_v33 = vadd.f32 %v2357_v7, %v2241_v35  ;;  %v2755_v0 = vrot.slane %v4278_v5, 1  ;;  %v2871_v28 = vrot.slane %v6086_v12, 2  ;;  %v2887_v42 = vrot.slane %v6088_v17, 2 }
 0x1d8   : > { %v3137_v37 = vmin.f32 %v3105_v22, 6.0  ;;  %v3138_v13 = vmin.f32 %v3106_v14, 6.0  ;;  %v2536_v59 = vadd.f32 %v2504_v49, %v2388_v11  ;;  %v6104_v60 = vsel %vm1837_vm8, %v2723_v15, %v2739_v16 }
 0x1d9   : > { %v2537_v58 = vadd.f32 %v2505_v46, %v2389_v33  ;;  %v6108_v18 = vsel %vm1837_vm8, %v2739_v16, %v2755_v0  ;;  %v2817_v61 = vmul.f32 %v5118_v39, %v6104_v60  ;;  %v2903_v30 = vrot.slane %v4278_v5, 2 }
 0x1da   : > { %v6114_v9 = vsel %vm1986_vm9, %v2871_v28, %v2887_v42  ;;  %v3160_v4 = vpack.c.bf16 %v3138_v13, %v3137_v37  ;;  %v2701_v47 = vadd.f32 %v2669_v20, %v2536_v59  ;;  %v2818_v26 = vmul.f32 %v5118_v39, %v6108_v18 }
 0x1db   : > { %v2702_v23 = vadd.f32 %v2670_v45, %v2537_v58  ;;  %v6120_v63 = vsel %vm1986_vm9, %v2887_v42, %v2903_v30  ;;  %v2965_v8 = vmul.f32 %v5122_v43, %v6114_v9  ;;  %v1746_v6 = vmul.f32 %v6021_v48, %v5067_v50 }
 0x1dc   : > { %v1896_v52 = vmul.f32 %v6037_v24, %v5070_v51  ;;  %4677 = vmatmul.mubr.bf16.gmra.mrb[52].mxu1 %v3160_v4  ;;  %v2849_v27 = vadd.f32 %v2817_v61, %v2701_v47  ;;  %v2966_v55 = vmul.f32 %v5122_v43, %v6120_v63  ;;  %v1897_v34 = vmul.f32 %v6041_v36, %v5070_v51 }
 0x1dd   : > { %v2850_v40 = vadd.f32 %v2818_v26, %v2702_v23  ;;  %v2045_v49 = vmul.f32 %v6049_v21, %v5073_v53  ;;  %v2046_v31 = vmul.f32 %v6053_v44, %v5073_v53  ;;  %v2210_v48 = vmul.f32 %v6086_v12, %v5076_v54 }
 0x1de   : > { %v1928_v7 = vadd.f32 %v1896_v52, %v1745_v38  ;;  %v2997_v24 = vadd.f32 %v2965_v8, %v2849_v27  ;;  %v1929_v3 = vadd.f32 %v1897_v34, %v1746_v6  ;;  %v2211_v46 = vmul.f32 %v6088_v17, %v5076_v54 }
 0x1df   : > { %v2998_v41 = vadd.f32 %v2966_v55, %v2850_v40  ;;  %v2358_v36 = vmul.f32 %v6104_v60, %v5085_v62  ;;  %v2359_v21 = vmul.f32 %v6108_v18, %v5085_v62  ;;  %v2506_v44 = vmul.f32 %v6114_v9, %v5094_v2 }
 0x1e0   : > { %v2077_v5 = vadd.f32 %v2045_v49, %v1928_v7  ;;  %v3036_v57 = vmul.f32 %v5731_v19, %v2997_v24  ;;  %v2078_v35 = vadd.f32 %v2046_v31, %v1929_v3  ;;  %v2507_v38 = vmul.f32 %v6120_v63, %v5094_v2 }
 0x1e1   : > { %v3037_v25 = vmul.f32 %v5731_v19, %v2998_v41  ;;  %v6151_v20 = vunpack.c.h.bf16 %v6073_v56  ;;  %v6153_v45 = vunpack.c.l.bf16 %v4460_v1  ;;  %v4283_v15 = vunpack.c.h.bf16 %v4460_v1 }
 0x1e2   : > { %v2242_v22 = vadd.f32 %v2210_v48, %v2077_v5  ;;  %v3075_v14 = vadd.f32 %v5744_v29, %v3036_v57  ;;  %v2243_v33 = vadd.f32 %v2211_v46, %v2078_v35  ;;  %v1747_v16 = vmul.f32 %v6086_v12, %v5067_v50 }
 0x1e3   : > { %v3076_v11 = vadd.f32 %v5744_v29, %v3037_v25  ;;  %v2671_v0 = vmul.f32 %v6151_v20, %v5111_v32  ;;  %v2672_v28 = vmul.f32 %v6153_v45, %v5111_v32  ;;  %v2724_v56 = vrot.slane %v6151_v20, 1 }
 0x1e4   : > { %v2390_v37 = vadd.f32 %v2358_v36, %v2242_v22  ;;  %v3107_v42 = vmax.f32 %v3075_v14, 0.0  ;;  %v2391_v59 = vadd.f32 %v2359_v21, %v2243_v33  ;;  %v2740_v58 = vrot.slane %v6153_v45, 1  ;;  %v6205_v22 = vld [vmem:[#allocation2 + $0xb0] sm:$0xff]  }
 0x1e5   : > { %v3108_v13 = vmax.f32 %v3076_v11, 0.0  ;;  %v2756_v30 = vrot.slane %v4283_v15, 1  ;;  %v2872_v4 = vrot.slane %v6151_v20, 2  ;;  %v2888_v12 = vrot.slane %v6153_v45, 2 }
 0x1e6   : > { %v2538_v61 = vadd.f32 %v2506_v44, %v2390_v37  ;;  %v3139_v47 = vmin.f32 %v3107_v42, 6.0  ;;  %v2539_v26 = vadd.f32 %v2507_v38, %v2391_v59  ;;  %v6169_v8 = vsel %vm1837_vm8, %v2724_v56, %v2740_v58 }
 0x1e7   : > { %v3140_v23 = vmin.f32 %v3108_v13, 6.0  ;;  %v6173_v52 = vsel %vm1837_vm8, %v2740_v58, %v2756_v30  ;;  %v2819_v27 = vmul.f32 %v5118_v39, %v6169_v8  ;;  %v2904_v40 = vrot.slane %v4283_v15, 2 }
 0x1e8   : > { %v2703_v6 = vadd.f32 %v2671_v0, %v2538_v61  ;;  %v2704_v34 = vadd.f32 %v2672_v28, %v2539_v26  ;;  %v2820_v7 = vmul.f32 %v5118_v39, %v6173_v52  ;;  %v6181_v49 = vsel %vm1986_vm9, %v2872_v4, %v2888_v12 }
 0x1e9   : > { %v3161_v55 = vpack.c.bf16 %v3140_v23, %v3139_v47  ;;  %v6185_v48 = vsel %vm1986_vm9, %v2888_v12, %v2904_v40  ;;  %v2967_v24 = vmul.f32 %v5122_v43, %v6181_v49  ;;  %v1748_v41 = vmul.f32 %v6088_v17, %v5067_v50 }
 0x1ea   : > { %v2851_v31 = vadd.f32 %v2819_v27, %v2703_v6  ;;  %v2852_v3 = vadd.f32 %v2820_v7, %v2704_v34  ;;  %v2968_v46 = vmul.f32 %v5122_v43, %v6185_v48  ;;  %v1898_v1 = vmul.f32 %v6104_v60, %v5070_v51  ;;  %v4461_v60 = vld [vmem:[#allocation2 + $0xa8] sm:$0xff]  }
 0x1eb   : > { %4680 = vmatprep.mubr.bf16.mxu1 %v3161_v55  ;;  %v1899_v5 = vmul.f32 %v6108_v18, %v5070_v51  ;;  %v2047_v21 = vmul.f32 %v6114_v9, %v5073_v53  ;;  %v2048_v44 = vmul.f32 %v6120_v63, %v5073_v53  ;;  %v2212_v17 = vmul.f32 %v6151_v20, %v5076_v54 }
 0x1ec   : > { %v2999_v36 = vadd.f32 %v2967_v24, %v2851_v31  ;;  %v3000_v57 = vadd.f32 %v2968_v46, %v2852_v3  ;;  %v1930_v25 = vadd.f32 %v1898_v1, %v1747_v16  ;;  %v2213_v38 = vmul.f32 %v6153_v45, %v5076_v54 }
 0x1ed   : > { %v1931_v35 = vadd.f32 %v1899_v5, %v1748_v41  ;;  %v2360_v9 = vmul.f32 %v6169_v8, %v5085_v62  ;;  %v2361_v63 = vmul.f32 %v6173_v52, %v5085_v62  ;;  %v2508_v15 = vmul.f32 %v6181_v49, %v5094_v2 }
 0x1ee   : > { %v3038_v18 = vmul.f32 %v5731_v19, %v2999_v36  ;;  %v3039_v14 = vmul.f32 %v5731_v19, %v3000_v57  ;;  %v2079_v11 = vadd.f32 %v2047_v21, %v1930_v25  ;;  %v2509_v16 = vmul.f32 %v6185_v48, %v5094_v2 }
 0x1ef   : > { %v2080_v33 = vadd.f32 %v2048_v44, %v1931_v35  ;;  %v6218_v0 = vunpack.c.l.bf16 %v4461_v60  ;;  %v6220_v28 = vunpack.c.h.bf16 %v4461_v60  ;;  %v4290_v56 = vunpack.c.l.bf16 %v6205_v22 }
 0x1f0   : > { %v3077_v37 = vadd.f32 %v5744_v29, %v3038_v18  ;;  %v3078_v42 = vadd.f32 %v5744_v29, %v3039_v14  ;;  %v2244_v13 = vadd.f32 %v2212_v17, %v2079_v11  ;;  %v1749_v58 = vmul.f32 %v6151_v20, %v5067_v50 }
 0x1f1   : > { %v2245_v59 = vadd.f32 %v2213_v38, %v2080_v33  ;;  %v2673_v30 = vmul.f32 %v6218_v0, %v5111_v32  ;;  %v2674_v4 = vmul.f32 %v6220_v28, %v5111_v32  ;;  %v2725_v12 = vrot.slane %v6218_v0, 1 }
 0x1f2   : > { %v3109_v61 = vmax.f32 %v3077_v37, 0.0  ;;  %v3110_v47 = vmax.f32 %v3078_v42, 0.0  ;;  %v2392_v23 = vadd.f32 %v2360_v9, %v2244_v13  ;;  %v2741_v6 = vrot.slane %v6220_v28, 1  ;;  %v4463_v37 = vld [vmem:[#allocation2 + $0xb8] sm:$0xff]  }
 0x1f3   : > { %v2393_v26 = vadd.f32 %v2361_v63, %v2245_v59  ;;  %v2757_v40 = vrot.slane %v4290_v56, 1  ;;  %v2873_v55 = vrot.slane %v6218_v0, 2  ;;  %v2889_v20 = vrot.slane %v6220_v28, 2 }
 0x1f4   : > { %v3141_v27 = vmin.f32 %v3109_v61, 6.0  ;;  %v3142_v34 = vmin.f32 %v3110_v47, 6.0  ;;  %v2540_v7 = vadd.f32 %v2508_v15, %v2392_v23  ;;  %v6236_v24 = vsel %vm1837_vm8, %v2725_v12, %v2741_v6 }
 0x1f5   : > { %v2541_v31 = vadd.f32 %v2509_v16, %v2393_v26  ;;  %v6240_v41 = vsel %vm1837_vm8, %v2741_v6, %v2757_v40  ;;  %v2821_v3 = vmul.f32 %v5118_v39, %v6236_v24  ;;  %v2905_v46 = vrot.slane %v4290_v56, 2 }
 0x1f6   : > { %v6246_v1 = vsel %vm1986_vm9, %v2873_v55, %v2889_v20  ;;  %v3162_v5 = vpack.c.bf16 %v3142_v34, %v3141_v27  ;;  %v2705_v36 = vadd.f32 %v2673_v30, %v2540_v7  ;;  %v2822_v44 = vmul.f32 %v5118_v39, %v6240_v41 }
 0x1f7   : > { %v2706_v21 = vadd.f32 %v2674_v4, %v2541_v31  ;;  %v6252_v17 = vsel %vm1986_vm9, %v2889_v20, %v2905_v46  ;;  %v2969_v57 = vmul.f32 %v5122_v43, %v6246_v1  ;;  %v1750_v25 = vmul.f32 %v6153_v45, %v5067_v50 }
 0x1f8   : > { %v1900_v35 = vmul.f32 %v6169_v8, %v5070_v51  ;;  %4681 = vmatmul.mubr.bf16.gmra.mrb[56].mxu1 %v3162_v5  ;;  %v2853_v38 = vadd.f32 %v2821_v3, %v2705_v36  ;;  %v2970_v18 = vmul.f32 %v5122_v43, %v6252_v17  ;;  %v1901_v9 = vmul.f32 %v6173_v52, %v5070_v51 }
 0x1f9   : > { %v2854_v60 = vadd.f32 %v2822_v44, %v2706_v21  ;;  %v2049_v15 = vmul.f32 %v6181_v49, %v5073_v53  ;;  %v2050_v14 = vmul.f32 %v6185_v48, %v5073_v53  ;;  %v2214_v45 = vmul.f32 %v6218_v0, %v5076_v54 }
 0x1fa   : > { %v1932_v63 = vadd.f32 %v1900_v35, %v1749_v58  ;;  %v3001_v8 = vadd.f32 %v2969_v57, %v2853_v38  ;;  %v1933_v33 = vadd.f32 %v1901_v9, %v1750_v25  ;;  %v2215_v16 = vmul.f32 %v6220_v28, %v5076_v54 }
 0x1fb   : > { %v3002_v11 = vadd.f32 %v2970_v18, %v2854_v60  ;;  %v2362_v52 = vmul.f32 %v6236_v24, %v5085_v62  ;;  %v2363_v49 = vmul.f32 %v6240_v41, %v5085_v62  ;;  %v2510_v48 = vmul.f32 %v6246_v1, %v5094_v2 }
 0x1fc   : > { %v2081_v56 = vadd.f32 %v2049_v15, %v1932_v63  ;;  %v3040_v42 = vmul.f32 %v5731_v19, %v3001_v8  ;;  %v2082_v59 = vadd.f32 %v2050_v14, %v1933_v33  ;;  %v2511_v58 = vmul.f32 %v6252_v17, %v5094_v2 }
 0x1fd   : > { %v3041_v13 = vmul.f32 %v5731_v19, %v3002_v11  ;;  %v6283_v30 = vunpack.c.h.bf16 %v6205_v22  ;;  %v6285_v4 = vunpack.c.l.bf16 %v4463_v37  ;;  %v4295_v12 = vunpack.c.h.bf16 %v4463_v37 }
 0x1fe   : > { %v2246_v61 = vadd.f32 %v2214_v45, %v2081_v56  ;;  %v3079_v47 = vadd.f32 %v5744_v29, %v3040_v42  ;;  %v2247_v26 = vadd.f32 %v2215_v16, %v2082_v59  ;;  %v1751_v6 = vmul.f32 %v6218_v0, %v5067_v50  ;;  %v6337_v59 = vld [vmem:[#allocation2 + $0xc8] sm:$0xff]  }
 0x1ff   : > { %v3080_v23 = vadd.f32 %v5744_v29, %v3041_v13  ;;  %v2675_v27 = vmul.f32 %v6283_v30, %v5111_v32  ;;  %v2676_v40 = vmul.f32 %v6285_v4, %v5111_v32  ;;  %v2726_v22 = vrot.slane %v6283_v30, 1 }
 0x200   : > { %v2394_v19 = vadd.f32 %v2362_v52, %v2246_v61  ;;  %v3111_v55 = vmax.f32 %v3079_v47, 0.0  ;;  %v2395_v34 = vadd.f32 %v2363_v49, %v2247_v26  ;;  %v2742_v7 = vrot.slane %v6285_v4, 1 }
 0x201   : > { %v3112_v20 = vmax.f32 %v3080_v23, 0.0  ;;  %v2758_v29 = vrot.slane %v4295_v12, 1  ;;  %v2874_v3 = vrot.slane %v6283_v30, 2  ;;  %v2890_v0 = vrot.slane %v6285_v4, 2 }
 0x202   : > { %v2542_v31 = vadd.f32 %v2510_v48, %v2394_v19  ;;  %v3143_v46 = vmin.f32 %v3111_v55, 6.0  ;;  %v2543_v36 = vadd.f32 %v2511_v58, %v2395_v34  ;;  %v6301_v21 = vsel %vm1837_vm8, %v2726_v22, %v2742_v7 }
 0x203   : > { %v3144_v5 = vmin.f32 %v3112_v20, 6.0  ;;  %v6305_v57 = vsel %vm1837_vm8, %v2742_v7, %v2758_v29  ;;  %v2823_v25 = vmul.f32 %v5118_v39, %v6301_v21  ;;  %v2906_v35 = vrot.slane %v4295_v12, 2 }
 0x204   : > { %v2707_v44 = vadd.f32 %v2675_v27, %v2542_v31  ;;  %v2708_v60 = vadd.f32 %v2676_v40, %v2543_v36  ;;  %v2824_v18 = vmul.f32 %v5118_v39, %v6305_v57  ;;  %v6313_v9 = vsel %vm1986_vm9, %v2874_v3, %v2890_v0 }
 0x205   : > { %v3163_v38 = vpack.c.bf16 %v3144_v5, %v3143_v46  ;;  %v6317_v15 = vsel %vm1986_vm9, %v2890_v0, %v2906_v35  ;;  %v2971_v14 = vmul.f32 %v5122_v43, %v6313_v9  ;;  %v1752_v45 = vmul.f32 %v6220_v28, %v5067_v50 }
 0x206   : > { %v2855_v63 = vadd.f32 %v2823_v25, %v2707_v44  ;;  %v2856_v8 = vadd.f32 %v2824_v18, %v2708_v60  ;;  %v2972_v11 = vmul.f32 %v5122_v43, %v6317_v15  ;;  %v1902_v33 = vmul.f32 %v6236_v24, %v5070_v51  ;;  %v4464_v24 = vld [vmem:[#allocation2 + $0xc0] sm:$0xff]  }
 0x207   : > { %4684 = vmatprep.mubr.bf16.mxu1 %v3163_v38  ;;  %v1903_v16 = vmul.f32 %v6240_v41, %v5070_v51  ;;  %v2051_v56 = vmul.f32 %v6246_v1, %v5073_v53  ;;  %v2052_v52 = vmul.f32 %v6252_v17, %v5073_v53  ;;  %v2216_v28 = vmul.f32 %v6283_v30, %v5076_v54  ;;  %v6342_v41 = vld [vmem:[%s6570_s6] ss:$0 sm:$0xff] }
 0x208   : > { %v3003_v37 = vadd.f32 %v2971_v14, %v2855_v63  ;;  %v3004_v49 = vadd.f32 %v2972_v11, %v2856_v8  ;;  %v1934_v48 = vadd.f32 %v1902_v33, %v1751_v6  ;;  %v2217_v13 = vmul.f32 %v6285_v4, %v5076_v54  ;;  %v6357_v6 = vld [vmem:[%s6571_s7] ss:$0 sm:$0xff] }
 0x209   : > { %v1935_v42 = vadd.f32 %v1903_v16, %v1752_v45  ;;  %v2364_v17 = vmul.f32 %v6301_v21, %v5085_v62  ;;  %v2365_v58 = vmul.f32 %v6305_v57, %v5085_v62  ;;  %v2512_v61 = vmul.f32 %v6313_v9, %v5094_v2 }
 0x20a   : > { %v3042_v1 = vmul.f32 %v6342_v41, %v3003_v37  ;;  %v3043_v12 = vmul.f32 %v6342_v41, %v3004_v49  ;;  %v2083_v47 = vadd.f32 %v2051_v56, %v1934_v48  ;;  %v2513_v26 = vmul.f32 %v6317_v15, %v5094_v2 }
 0x20b   : > { %v2084_v23 = vadd.f32 %v2052_v52, %v1935_v42  ;;  %v4298_v27 = vunpack.c.l.bf16 %v4464_v24  ;;  %v4299_v40 = vunpack.c.h.bf16 %v4464_v24  ;;  %v4302_v22 = vunpack.c.l.bf16 %v6337_v59 }
 0x20c   : > { %v3081_v19 = vadd.f32 %v6357_v6, %v3042_v1  ;;  %v3082_v55 = vadd.f32 %v6357_v6, %v3043_v12  ;;  %v2248_v20 = vadd.f32 %v2216_v28, %v2083_v47  ;;  %v1753_v7 = vmul.f32 %v6283_v30, %v5067_v50  ;;  %v2135_v28 = vld [vmem:[#allocation2 + $0xc8] sm:$0xf] }
 0x20d   : > { %v2249_v34 = vadd.f32 %v2217_v13, %v2084_v23  ;;  %v2677_v29 = vmul.f32 %v4298_v27, %v5111_v32  ;;  %v2678_v3 = vmul.f32 %v4299_v40, %v5111_v32  ;;  %v2727_v0 = vrot.slane %v4298_v27, 1 }
 0x20e   : > { %v3113_v31 = vmax.f32 %v3081_v19, 0.0  ;;  %v3114_v46 = vmax.f32 %v3082_v55, 0.0  ;;  %v2396_v5 = vadd.f32 %v2364_v17, %v2248_v20  ;;  %v2743_v44 = vrot.slane %v4299_v40, 1 }
 0x20f   : > { %v2397_v36 = vadd.f32 %v2365_v58, %v2249_v34  ;;  %v2759_v35 = vrot.slane %v4302_v22, 1  ;;  %v2875_v38 = vrot.slane %v4298_v27, 2  ;;  %v2891_v60 = vrot.slane %v4299_v40, 2 }
 0x210   : > { %v3145_v25 = vmin.f32 %v3113_v31, 6.0  ;;  %v3146_v18 = vmin.f32 %v3114_v46, 6.0  ;;  %v2544_v63 = vadd.f32 %v2512_v61, %v2396_v5  ;;  %v2791_v30 = vsel %vm1837_vm8, %v2727_v0, %v2743_v44 }
 0x211   : > { %v2545_v14 = vadd.f32 %v2513_v26, %v2397_v36  ;;  %v2775_v45 = vsel %vm1837_vm8, %v2743_v44, %v2759_v35  ;;  %v2825_v8 = vmul.f32 %v5118_v39, %v2791_v30  ;;  %v2907_v11 = vrot.slane %v4302_v22, 2 }
 0x212   : > { %v2939_v33 = vsel %vm1986_vm9, %v2875_v38, %v2891_v60  ;;  %v3164_v16 = vpack.c.bf16 %v3146_v18, %v3145_v25  ;;  %v2709_v37 = vadd.f32 %v2677_v29, %v2544_v63  ;;  %v2826_v52 = vmul.f32 %v5118_v39, %v2775_v45 }
 0x213   : > { %v2710_v56 = vadd.f32 %v2678_v3, %v2545_v14  ;;  %v2923_v49 = vsel %vm1986_vm9, %v2891_v60, %v2907_v11  ;;  %v2973_v48 = vmul.f32 %v5122_v43, %v2939_v33  ;;  %v1754_v42 = vmul.f32 %v6285_v4, %v5067_v50 }
 0x214   : > { %v1904_v13 = vmul.f32 %v6301_v21, %v5070_v51  ;;  %4685 = vmatmul.mubr.bf16.gmra.mrb[60].mxu1 %v3164_v16  ;;  %v2857_v24 = vadd.f32 %v2825_v8, %v2709_v37  ;;  %v2974_v17 = vmul.f32 %v5122_v43, %v2923_v49  ;;  %v1905_v58 = vmul.f32 %v6305_v57, %v5070_v51 }
 0x215   : > { %v2858_v1 = vadd.f32 %v2826_v52, %v2710_v56  ;;  %v2053_v12 = vmul.f32 %v6313_v9, %v5073_v53  ;;  %v2054_v47 = vmul.f32 %v6317_v15, %v5073_v53  ;;  %v2183_v23 = vunpack.c.l.bf16 %v2135_v28  ;;  %v4466_v53 = vld [vmem:[#allocation2 + $0xd0] sm:$0xff]   ;;  %v4467_v56 = vld [vmem:[%s6407_s25 + $0x8] sm:$0xff]  }
 0x216   : > { %v1936_v61 = vadd.f32 %v1904_v13, %v1753_v7  ;;  %v3005_v50 = vadd.f32 %v2973_v48, %v2857_v24  ;;  %v1937_v21 = vadd.f32 %v1905_v58, %v1754_v42  ;;  %v2218_v26 = vmul.f32 %v4298_v27, %v5076_v54  ;;  %v6422_v42 = vld [vmem:[%s6574_s10] ss:$0 sm:$0xff] }
 0x217   : > { %v3006_v4 = vadd.f32 %v2974_v17, %v2858_v1  ;;  %v2219_v22 = vmul.f32 %v4299_v40, %v5076_v54  ;;  %v2299_v55 = vrot.slane %v2183_v23, 1  ;;  %v2366_v51 = vmul.f32 %v2791_v30, %v5085_v62 }
 0x218   : > { %v2085_v19 = vadd.f32 %v2053_v12, %v1936_v61  ;;  %v3044_v57 = vmul.f32 %v6342_v41, %v3005_v50  ;;  %v2086_v20 = vadd.f32 %v2054_v47, %v1937_v21  ;;  %v2447_v34 = vrot.slane %v2183_v23, 2  ;;  %v4309_v61 = vld [vmem:[%s6407_s25] sm:$0xff]  }
 0x219   : > { %v3045_v9 = vmul.f32 %v6342_v41, %v3006_v4  ;;  %v2315_v7 = vsel %vm1837_vm8, %v2743_v44, %v2299_v55  ;;  %v2514_v31 = vmul.f32 %v2939_v33, %v5094_v2  ;;  %v4303_v27 = vunpack.c.h.bf16 %v6337_v59 }
 0x21a   : > { %v2250_v15 = vadd.f32 %v2218_v26, %v2085_v19  ;;  %v3083_v54 = vadd.f32 %v6357_v6, %v3044_v57  ;;  %v2251_v29 = vadd.f32 %v2219_v22, %v2086_v20  ;;  %v2367_v3 = vmul.f32 %v5085_v62, %v2315_v7 }
 0x21b   : > { %v3084_v40 = vadd.f32 %v6357_v6, %v3045_v9  ;;  %v2463_v46 = vsel %vm1986_vm9, %v2891_v60, %v2447_v34  ;;  %v4306_v5 = vunpack.c.l.bf16 %v4466_v53  ;;  %v4307_v36 = vunpack.c.h.bf16 %v4466_v53 }
 0x21c   : > { %v2398_v0 = vadd.f32 %v2366_v51, %v2250_v15  ;;  %v3115_v25 = vmax.f32 %v3083_v54, 0.0  ;;  %v2399_v35 = vadd.f32 %v2367_v3, %v2251_v29  ;;  %v2515_v38 = vmul.f32 %v5094_v2, %v2463_v46  ;;  %v6414_v2 = vld [vmem:[%s6573_s9] ss:$0 sm:$0xff] }
 0x21d   : > { %v3116_v44 = vmax.f32 %v3084_v40, 0.0  ;;  %v2679_v62 = vmul.f32 %v4303_v27, %v5111_v32  ;;  %v2680_v18 = vmul.f32 %v4306_v5, %v5111_v32  ;;  %v2728_v63 = vrot.slane %v4303_v27, 1  ;;  %v4662_v8 = vpop.f32.mrb[36].mxu1 }
 0x21e   : > { %v2546_v59 = vadd.f32 %v2514_v31, %v2398_v0  ;;  %v3147_v60 = vmin.f32 %v3115_v25, 6.0  ;;  %v2547_v30 = vadd.f32 %v2515_v38, %v2399_v35  ;;  %v2744_v45 = vrot.slane %v4306_v5, 1  ;;  %v3265_v52 = vpop.f32.mrb[37].mxu1  ;;  %v4469_v35 = vld [vmem:[%s6407_s25 + $0x18] sm:$0xff]   ;;  %v4468_v38 = vld [vmem:[%s6407_s25 + $0x10] sm:$0xff]  }
 0x21f   : > { %v3148_v14 = vmin.f32 %v3116_v44, 6.0  ;;  %v2760_v33 = vrot.slane %v4307_v36, 1  ;;  %v2876_v16 = vrot.slane %v4303_v27, 2  ;;  %v2892_v37 = vrot.slane %v4306_v5, 2  ;;  %v4663_v13 = vpop.f32.mrb[38].mxu1 }
 0x220   : > { %v2711_v11 = vadd.f32 %v2679_v62, %v2546_v59  ;;  %v2712_v28 = vadd.f32 %v2680_v18, %v2547_v30  ;;  %v2792_v49 = vsel %vm1837_vm8, %v2728_v63, %v2744_v45  ;;  %v2908_v48 = vrot.slane %v4307_v36, 2  ;;  %v3268_v12 = vpop.f32.mrb[39].mxu1 }
 0x221   : > { %v3165_v32 = vpack.c.bf16 %v3148_v14, %v3147_v60  ;;  %v2776_v24 = vsel %vm1837_vm8, %v2744_v45, %v2760_v33  ;;  %v2827_v1 = vmul.f32 %v5118_v39, %v2792_v49  ;;  %v2940_v17 = vsel %vm1986_vm9, %v2876_v16, %v2892_v37 }
 0x222   : > { %v3401_v58 = vmul.f32 %v4662_v8, %v6414_v2  ;;  %v2828_v47 = vmul.f32 %v5118_v39, %v2776_v24  ;;  %v2924_v23 = vsel %vm1986_vm9, %v2892_v37, %v2908_v48  ;;  %v2975_v50 = vmul.f32 %v5122_v43, %v2940_v17  ;;  %v4471_v48 = vld [vmem:[%s6407_s25 + $0x28] sm:$0xff]  }
 0x223   : > { %4688 = vmatprep.mubr.bf16.mxu1 %v3165_v32  ;;  %v4314_v4 = vunpack.c.l.bf16 %v4467_v56  ;;  %v2859_v21 = vadd.f32 %v2827_v1, %v2711_v11  ;;  %v2976_v26 = vmul.f32 %v5122_v43, %v2924_v23  ;;  %v3399_v22 = vmul.f32 %v6414_v2, %v3265_v52 }
 0x224   : > { %v3440_v19 = vadd.f32 %v6422_v42, %v3401_v58  ;;  %v2860_v55 = vadd.f32 %v2828_v47, %v2712_v28  ;;  %v4310_v39 = vunpack.c.l.bf16 %v4309_v61  ;;  %v3402_v10 = vmul.f32 %v4663_v13, %v6414_v2  ;;  %v4470_v13 = vld [vmem:[%s6407_s25 + $0x20] sm:$0xff]  }
 0x225   : > { %v4315_v51 = vunpack.c.h.bf16 %v4467_v56  ;;  %v3007_v57 = vadd.f32 %v2975_v50, %v2859_v21  ;;  %v3438_v43 = vadd.f32 %v6422_v42, %v3399_v22  ;;  %v3400_v20 = vmul.f32 %v6414_v2, %v3268_v12 }
 0x226   : > { %v3536_v9 = vadd.f32 %v4314_v4, %v3440_v19  ;;  %v3008_v34 = vadd.f32 %v2976_v26, %v2860_v55  ;;  %v3441_v53 = vadd.f32 %v6422_v42, %v3402_v10  ;;  %v4311_v15 = vunpack.c.h.bf16 %v4309_v61 }
 0x227   : > { %v3046_v7 = vmul.f32 %v6342_v41, %v3007_v57  ;;  %v3534_v31 = vadd.f32 %v4310_v39, %v3438_v43  ;;  %v3439_v27 = vadd.f32 %v6422_v42, %v3400_v20  ;;  %v4322_v62 = vunpack.c.l.bf16 %v4469_v35  ;;  %v4473_v43 = vld [vmem:[%s6407_s25 + $0x38] sm:$0xff]   ;;  %v4472_v20 = vld [vmem:[%s6407_s25 + $0x30] sm:$0xff]  }
 0x228   : > { %3568 = vst [vmem:[%s6442_s13 + $0x10] sm:$0xff] %v3536_v9  ;;  %v3047_v54 = vmul.f32 %v6342_v41, %v3008_v34  ;;  %v3537_v40 = vadd.f32 %v4315_v51, %v3441_v53  ;;  %v4323_v45 = vunpack.c.h.bf16 %v4469_v35  ;;  %v4319_v16 = vunpack.c.h.bf16 %v4468_v38 }
 0x229   : > { %v3085_v29 = vadd.f32 %v6357_v6, %v3046_v7  ;;  %3566 = vst [vmem:[%s6442_s13] sm:$0xff] %v3534_v31  ;;  %v3535_v3 = vadd.f32 %v4311_v15, %v3439_v27  ;;  %v4330_v17 = vunpack.c.l.bf16 %v4471_v48  ;;  %v4326_v12 = vunpack.c.l.bf16 %v4470_v13 }
 0x22a   : > { %v3086_v0 = vadd.f32 %v6357_v6, %v3047_v54  ;;  %3569 = vst [vmem:[%s6442_s13 + $0x18] sm:$0xff] %v3537_v40  ;;  %v4318_v6 = vunpack.c.l.bf16 %v4468_v38  ;;  %v4331_v4 = vunpack.c.h.bf16 %v4471_v48  ;;  %v4327_v22 = vunpack.c.h.bf16 %v4470_v13 }
 0x22b   : > { %v3117_v46 = vmax.f32 %v3085_v29, 0.0  ;;  %3567 = vst [vmem:[%s6442_s13 + $0x8] sm:$0xff] %v3535_v3  ;;  %v4338_v15 = vunpack.c.l.bf16 %v4473_v43  ;;  %v4334_v27 = vunpack.c.l.bf16 %v4472_v20  ;;  %v4339_v3 = vunpack.c.h.bf16 %v4473_v43 }
 0x22c   : > { %v3118_v5 = vmax.f32 %v3086_v0, 0.0 }
 0x22d   : > { %v3149_v36 = vmin.f32 %v3117_v46, 6.0 }
 0x22e   : > { %v3150_v25 = vmin.f32 %v3118_v5, 6.0 }
 0x230   : > { %v3166_v44 = vpack.c.bf16 %v3150_v25, %v3149_v36  ;;  %v4335_v36 = vunpack.c.h.bf16 %v4472_v20 }
 0x232   : > { %4689 = vmatmul.mubr.bf16.gmra.mrb[64].mxu1 %v3166_v44 }
 0x24c   : > { %v4666_v59 = vpop.f32.mrb[40].mxu1 }
 0x24d   : > { %v3405_v41 = vmul.f32 %v4666_v59, %v6414_v2  ;;  %v3281_v18 = vpop.f32.mrb[41].mxu1 }
 0x24e   : > { %v3403_v63 = vmul.f32 %v6414_v2, %v3281_v18  ;;  %v4667_v60 = vpop.f32.mrb[42].mxu1  ;;  %v4474_v18 = vld [vmem:[%s6407_s25 + $0x40] sm:$0xff]  }
 0x24f   : > { %v3444_v14 = vadd.f32 %v6422_v42, %v3405_v41  ;;  %v3406_v30 = vmul.f32 %v4667_v60, %v6414_v2  ;;  %v3284_v8 = vpop.f32.mrb[43].mxu1 }
 0x250   : > { %v3442_v11 = vadd.f32 %v6422_v42, %v3403_v63  ;;  %v3404_v33 = vmul.f32 %v6414_v2, %v3284_v8 }
 0x251   : > { %v3540_v37 = vadd.f32 %v4322_v62, %v3444_v14  ;;  %v3445_v56 = vadd.f32 %v6422_v42, %v3406_v30  ;;  %v4475_v62 = vld [vmem:[%s6407_s25 + $0x48] sm:$0xff]  }
 0x252   : > { %v3538_v52 = vadd.f32 %v4318_v6, %v3442_v11  ;;  %v3443_v32 = vadd.f32 %v6422_v42, %v3404_v33  ;;  %v4346_v60 = vunpack.c.l.bf16 %v4475_v62 }
 0x253   : > { %3572 = vst [vmem:[%s6442_s13 + $0x30] sm:$0xff] %v3540_v37  ;;  %v3541_v28 = vadd.f32 %v4323_v45, %v3445_v56  ;;  %v4342_v45 = vunpack.c.l.bf16 %v4474_v18 }
 0x254   : > { %3570 = vst [vmem:[%s6442_s13 + $0x20] sm:$0xff] %v3538_v52  ;;  %v3539_v49 = vadd.f32 %v4319_v16, %v3443_v32  ;;  %v4347_v16 = vunpack.c.h.bf16 %v4475_v62  ;;  %v4343_v32 = vunpack.c.h.bf16 %v4474_v18 }
 0x255   : > { %3573 = vst [vmem:[%s6442_s13 + $0x38] sm:$0xff] %v3541_v28 }
 0x256   : > { %3571 = vst [vmem:[%s6442_s13 + $0x28] sm:$0xff] %v3539_v49 }
 0x277   : > { %v4670_v24 = vpop.f32.mrb[44].mxu1 }
 0x278   : > { %v3409_v1 = vmul.f32 %v4670_v24, %v6414_v2  ;;  %v3297_v58 = vpop.f32.mrb[45].mxu1 }
 0x279   : > { %v3407_v61 = vmul.f32 %v6414_v2, %v3297_v58  ;;  %v4671_v47 = vpop.f32.mrb[46].mxu1  ;;  %v4476_v58 = vld [vmem:[%s6407_s25 + $0x50] sm:$0xff]  }
 0x27a   : > { %v3448_v23 = vadd.f32 %v6422_v42, %v3409_v1  ;;  %v3410_v50 = vmul.f32 %v4671_v47, %v6414_v2  ;;  %v3300_v21 = vpop.f32.mrb[47].mxu1 }
 0x27b   : > { %v3446_v26 = vadd.f32 %v6422_v42, %v3407_v61  ;;  %v3408_v19 = vmul.f32 %v6414_v2, %v3300_v21 }
 0x27c   : > { %v3544_v55 = vadd.f32 %v4330_v17, %v3448_v23  ;;  %v3449_v39 = vadd.f32 %v6422_v42, %v3410_v50  ;;  %v4477_v17 = vld [vmem:[%s6407_s25 + $0x58] sm:$0xff]  }
 0x27d   : > { %v3542_v10 = vadd.f32 %v4326_v12, %v3446_v26  ;;  %v3447_v51 = vadd.f32 %v6422_v42, %v3408_v19  ;;  %v4354_v47 = vunpack.c.l.bf16 %v4477_v17 }
 0x27e   : > { %3576 = vst [vmem:[%s6442_s13 + $0x50] sm:$0xff] %v3544_v55  ;;  %v3545_v57 = vadd.f32 %v4331_v4, %v3449_v39  ;;  %v4350_v4 = vunpack.c.l.bf16 %v4476_v58 }
 0x27f   : > { %3574 = vst [vmem:[%s6442_s13 + $0x40] sm:$0xff] %v3542_v10  ;;  %v3543_v9 = vadd.f32 %v4327_v22, %v3447_v51  ;;  %v4355_v22 = vunpack.c.h.bf16 %v4477_v17  ;;  %v4351_v51 = vunpack.c.h.bf16 %v4476_v58 }
 0x280   : > { %3577 = vst [vmem:[%s6442_s13 + $0x58] sm:$0xff] %v3545_v57 }
 0x281   : > { %3575 = vst [vmem:[%s6442_s13 + $0x48] sm:$0xff] %v3543_v9 }
 0x293   : > { %v4674_v34 = vpop.f32.mrb[48].mxu1 }
 0x294   : > { %v3413_v53 = vmul.f32 %v4674_v34, %v6414_v2  ;;  %v3313_v7 = vpop.f32.mrb[49].mxu1 }
 0x295   : > { %v3411_v31 = vmul.f32 %v6414_v2, %v3313_v7  ;;  %v4675_v54 = vpop.f32.mrb[50].mxu1  ;;  %v4478_v7 = vld [vmem:[%s6407_s25 + $0x60] sm:$0xff]  }
 0x296   : > { %v3452_v40 = vadd.f32 %v6422_v42, %v3413_v53  ;;  %v3414_v29 = vmul.f32 %v4675_v54, %v6414_v2  ;;  %v3316_v0 = vpop.f32.mrb[51].mxu1 }
 0x297   : > { %v3450_v46 = vadd.f32 %v6422_v42, %v3411_v31  ;;  %v3412_v5 = vmul.f32 %v6414_v2, %v3316_v0 }
 0x298   : > { %v3548_v25 = vadd.f32 %v4338_v15, %v3452_v40  ;;  %v3453_v44 = vadd.f32 %v6422_v42, %v3414_v29  ;;  %v4479_v15 = vld [vmem:[%s6407_s25 + $0x68] sm:$0xff]  }
 0x299   : > { %v3546_v35 = vadd.f32 %v4334_v27, %v3450_v46  ;;  %v3451_v38 = vadd.f32 %v6422_v42, %v3412_v5  ;;  %v4362_v54 = vunpack.c.l.bf16 %v4479_v15 }
 0x29a   : > { %3580 = vst [vmem:[%s6442_s13 + $0x70] sm:$0xff] %v3548_v25  ;;  %v3549_v59 = vadd.f32 %v4339_v3, %v3453_v44  ;;  %v4358_v3 = vunpack.c.l.bf16 %v4478_v7 }
 0x29b   : > { %3578 = vst [vmem:[%s6442_s13 + $0x60] sm:$0xff] %v3546_v35  ;;  %v3547_v41 = vadd.f32 %v4335_v36, %v3451_v38  ;;  %v4363_v36 = vunpack.c.h.bf16 %v4479_v15  ;;  %v4359_v38 = vunpack.c.h.bf16 %v4478_v7 }
 0x29c   : > { %3581 = vst [vmem:[%s6442_s13 + $0x78] sm:$0xff] %v3549_v59 }
 0x29d   : > { %3579 = vst [vmem:[%s6442_s13 + $0x68] sm:$0xff] %v3547_v41 }
 0x2af   : > { %v4678_v63 = vpop.f32.mrb[52].mxu1 }
 0x2b0   : > { %v3417_v6 = vmul.f32 %v4678_v63, %v6414_v2  ;;  %v3329_v14 = vpop.f32.mrb[53].mxu1 }
 0x2b1   : > { %v3415_v30 = vmul.f32 %v6414_v2, %v3329_v14  ;;  %v4679_v8 = vpop.f32.mrb[54].mxu1  ;;  %v4480_v14 = vld [vmem:[%s6407_s25 + $0x70] sm:$0xff]  }
 0x2b2   : > { %v3456_v11 = vadd.f32 %v6422_v42, %v3417_v6  ;;  %v3418_v33 = vmul.f32 %v4679_v8, %v6414_v2  ;;  %v3332_v37 = vpop.f32.mrb[55].mxu1 }
 0x2b3   : > { %v3454_v56 = vadd.f32 %v6422_v42, %v3415_v30  ;;  %v3416_v52 = vmul.f32 %v6414_v2, %v3332_v37 }
 0x2b4   : > { %v3552_v28 = vadd.f32 %v4346_v60, %v3456_v11  ;;  %v3457_v49 = vadd.f32 %v6422_v42, %v3418_v33  ;;  %v4481_v60 = vld [vmem:[%s6407_s25 + $0x78] sm:$0xff]  }
 0x2b5   : > { %v3550_v48 = vadd.f32 %v4342_v45, %v3454_v56  ;;  %v3455_v13 = vadd.f32 %v6422_v42, %v3416_v52  ;;  %v4370_v8 = vunpack.c.l.bf16 %v4481_v60 }
 0x2b6   : > { %3584 = vst [vmem:[%s6442_s13 + $0x90] sm:$0xff] %v3552_v28  ;;  %v3553_v24 = vadd.f32 %v4347_v16, %v3457_v49  ;;  %v4366_v16 = vunpack.c.l.bf16 %v4480_v14 }
 0x2b7   : > { %3582 = vst [vmem:[%s6442_s13 + $0x80] sm:$0xff] %v3550_v48  ;;  %v3551_v1 = vadd.f32 %v4343_v32, %v3455_v13  ;;  %v4371_v32 = vunpack.c.h.bf16 %v4481_v60  ;;  %v4367_v13 = vunpack.c.h.bf16 %v4480_v14 }
 0x2b8   : > { %3585 = vst [vmem:[%s6442_s13 + $0x98] sm:$0xff] %v3553_v24 }
 0x2b9   : > { %3583 = vst [vmem:[%s6442_s13 + $0x88] sm:$0xff] %v3551_v1 }
 0x2cb   : > { %v4682_v61 = vpop.f32.mrb[56].mxu1 }
 0x2cc   : > { %v3421_v12 = vmul.f32 %v4682_v61, %v6414_v2  ;;  %v3345_v23 = vpop.f32.mrb[57].mxu1 }
 0x2cd   : > { %v3419_v50 = vmul.f32 %v6414_v2, %v3345_v23  ;;  %v4683_v21 = vpop.f32.mrb[58].mxu1 }
 0x2ce   : > { %v3460_v26 = vadd.f32 %v6422_v42, %v3421_v12  ;;  %v3422_v19 = vmul.f32 %v4683_v21, %v6414_v2  ;;  %v3348_v55 = vpop.f32.mrb[59].mxu1 }
 0x2cf   : > { %v3458_v39 = vadd.f32 %v6422_v42, %v3419_v50  ;;  %v3420_v10 = vmul.f32 %v6414_v2, %v3348_v55 }
 0x2d0   : > { %v3556_v57 = vadd.f32 %v4354_v47, %v3460_v26  ;;  %v3461_v9 = vadd.f32 %v6422_v42, %v3422_v19 }
 0x2d1   : > { %v3554_v43 = vadd.f32 %v4350_v4, %v3458_v39  ;;  %v3459_v20 = vadd.f32 %v6422_v42, %v3420_v10 }
 0x2d2   : > { %3588 = vst [vmem:[%s6442_s13 + $0xb0] sm:$0xff] %v3556_v57  ;;  %v3557_v34 = vadd.f32 %v4355_v22, %v3461_v9 }
 0x2d3   : > { %3586 = vst [vmem:[%s6442_s13 + $0xa0] sm:$0xff] %v3554_v43  ;;  %v3555_v53 = vadd.f32 %v4351_v51, %v3459_v20 }
 0x2d4   : > { %3589 = vst [vmem:[%s6442_s13 + $0xb8] sm:$0xff] %v3557_v34 }
 0x2d5   : > { %3587 = vst [vmem:[%s6442_s13 + $0xa8] sm:$0xff] %v3555_v53 }
 0x2e7   : > { %v4686_v31 = vpop.f32.mrb[60].mxu1 }
 0x2e8   : > { %v3425_v27 = vmul.f32 %v4686_v31, %v6414_v2  ;;  %v3361_v40 = vpop.f32.mrb[61].mxu1 }
 0x2e9   : > { %v3423_v29 = vmul.f32 %v6414_v2, %v3361_v40  ;;  %v4687_v0 = vpop.f32.mrb[62].mxu1 }
 0x2ea   : > { %v3464_v46 = vadd.f32 %v6422_v42, %v3425_v27  ;;  %v3426_v5 = vmul.f32 %v4687_v0, %v6414_v2  ;;  %v3364_v25 = vpop.f32.mrb[63].mxu1 }
 0x2eb   : > { %v3462_v44 = vadd.f32 %v6422_v42, %v3423_v29  ;;  %v3424_v35 = vmul.f32 %v6414_v2, %v3364_v25 }
 0x2ec   : > { %v3560_v59 = vadd.f32 %v4362_v54, %v3464_v46  ;;  %v3465_v41 = vadd.f32 %v6422_v42, %v3426_v5 }
 0x2ed   : > { %v3558_v62 = vadd.f32 %v4358_v3, %v3462_v44  ;;  %v3463_v18 = vadd.f32 %v6422_v42, %v3424_v35 }
 0x2ee   : > { %3592 = vst [vmem:[%s6442_s13 + $0xd0] sm:$0xff] %v3560_v59  ;;  %v3561_v63 = vadd.f32 %v4363_v36, %v3465_v41 }
 0x2ef   : > { %3590 = vst [vmem:[%s6442_s13 + $0xc0] sm:$0xff] %v3558_v62  ;;  %v3559_v6 = vadd.f32 %v4359_v38, %v3463_v18 }
 0x2f0   : > { %3593 = vst [vmem:[%s6442_s13 + $0xd8] sm:$0xff] %v3561_v63 }
 0x2f1   : > { %3591 = vst [vmem:[%s6442_s13 + $0xc8] sm:$0xff] %v3559_v6 }
 0x305   : > { %v4690_v30 = vpop.f32.mrb[64].mxu1 }
 0x306   : > { %v3429_v45 = vmul.f32 %v4690_v30, %v6414_v2  ;;  %v3377_v11 = vpop.f32.mrb[65].mxu1 }
 0x307   : > { %v3427_v33 = vmul.f32 %v6414_v2, %v3377_v11  ;;  %v4691_v37 = vpop.f32.mrb[66].mxu1 }
 0x308   : > { %v3468_v56 = vadd.f32 %v6422_v42, %v3429_v45  ;;  %v3430_v52 = vmul.f32 %v4691_v37, %v6414_v2  ;;  %v3380_v28 = vpop.f32.mrb[67].mxu1 }
 0x309   : > { %v3466_v49 = vadd.f32 %v6422_v42, %v3427_v33  ;;  %v3428_v48 = vmul.f32 %v6414_v2, %v3380_v28 }
 0x30a   : > { %v3564_v24 = vadd.f32 %v4370_v8, %v3468_v56  ;;  %v3469_v1 = vadd.f32 %v6422_v42, %v3430_v52 }
 0x30b   : > { %v3562_v17 = vadd.f32 %v4366_v16, %v3466_v49  ;;  %v3467_v58 = vadd.f32 %v6422_v42, %v3428_v48 }
 0x30c   : > { %3596 = vst [vmem:[%s6442_s13 + $0xf0] sm:$0xff] %v3564_v24  ;;  %v3565_v61 = vadd.f32 %v4371_v32, %v3469_v1 }
 0x30d   : > { %3594 = vst [vmem:[%s6442_s13 + $0xe0] sm:$0xff] %v3562_v17  ;;  %v3563_v12 = vadd.f32 %v4367_v13, %v3467_v58 }
 0x30e   : > { %3597 = vst [vmem:[%s6442_s13 + $0xf8] sm:$0xff] %v3565_v61 }
 0x30f   : > { %3595 = vst [vmem:[%s6442_s13 + $0xe8] sm:$0xff] %v3563_v12 }
 0x310 PF: > { %s21_s19 = sadd.s32 1, %s4785_s19   ;;  %s6580_s17 = smov %s4781_s18 }
 0x311   : > { %p18_p5 = scmp.ge.s32.totalorder %s21_s19, 4   ;;  %s6581_s18 = smov %s6583_s20 }
 0x313   :  { %20 = sbr.rel (!%p18_p5) target bundleno = 2 (0x2), region = 105 }

</bundles_post_ra>
